<compile_context>
chip_gen: v5e
topology: v5e:2x2
jax: 0.10.0
libtpu: 0.0.40
codegen_flags: <defaults>
</compile_context>

<pallas_src>
import math

import jax
import jax.numpy as jnp
from jax import lax
from jax.experimental import pallas as pl
from jax.experimental.pallas import tpu as pltpu


# ---------------------- packed-bias layout (128-lane-aligned slots) -------------

_BIAS_SEGS = (("b1", 32), ("b2", 64), ("a1_bv", 64), ("a1_bt", 64),
              ("b3", 256), ("a2_bv", 256), ("a2_bt", 256))
_BIAS_SLICE = {}
_off = 0
for _name, _w in _BIAS_SEGS:
    _BIAS_SLICE[_name] = (_off, _w)
    _off += ((_w + 127) // 128) * 128
_BIAS_TOTAL = _off          # 1280


# ----------------------------------- Pallas kernel ------------------------------


def _make_pcn_kernel(B, N):
    """Build the kernel for static batch B and point count N (batch folded)."""

    def kernel(x_ref,                                  # (B*N, 78)  f32
               w1_ref, w2_ref,                         # folded conv1 / conv2 (bf16)
               a1_wqv_ref, a1_wt_ref,                  # att1: [Wqk | Wv], folded trans_conv
               w3a_ref, w3b_ref,                       # folded conv3 split h / gf parts
               a2_wqv_hbm, a2_wt_hbm,                  # att2 weights, raw HBM (manual DMA)
               b_ref,                                  # (1, 1280) packed f32 biases
               out_ref,                                # (B*N, 256) f32
               a2_wqv_buf, a2_wt_buf, dma_sem):        # scratch
        bf16 = jnp.bfloat16

        # Kick off the SA2 weight DMAs immediately; they are hidden behind
        # conv1 / conv2 / SA1 / conv3 instead of serializing in front of the
        # whole (few-microsecond) kernel.
        cp_qv = pltpu.make_async_copy(a2_wqv_hbm, a2_wqv_buf, dma_sem.at[0])
        cp_wt = pltpu.make_async_copy(a2_wt_hbm, a2_wt_buf, dma_sem.at[1])
        cp_qv.start()
        cp_wt.start()

        def bias(name):
            off, w = _BIAS_SLICE[name]
            return b_ref[:, off:off + w]               # (1, w) f32

        def mm(a16, w16):
            # bf16 x bf16 MXU matmul with f32 accumulation.
            return jnp.dot(a16, w16, preferred_element_type=jnp.float32)

        def sa_layer(h, wqv, wt, bv, bt):
            # h: merged (B*N, C) f32.  q_conv and k_conv share weights so the
            # per-batch energy matrix is symmetric; softmax(e, -1)^T is formed
            # with per-row stabilization and no NxN transpose:
            #   A^T[j, n] = exp(e[j, n] - M[n]) / S[n]
            # where M[n]/S[n] (row max / row sum) are read out as (1, N) lane
            # vectors via axis-0 (sublane) reductions of the symmetric e.
            c = h.shape[-1]
            h16 = h.astype(bf16)
            qv = mm(h16, wqv)                                    # (B*N, 2C): [x_q | x_v]
            xq16 = qv[:, :c].astype(bf16)
            xv16 = (qv[:, c:] + bv).astype(bf16)
            xr_parts = []
            for b in range(B):                                   # static unroll over batch
                xq_b = xq16[b * N:(b + 1) * N]
                xv_b = xv16[b * N:(b + 1) * N]
                e = lax.dot_general(xq_b, xq_b, (((1,), (1,)), ((), ())),
                                    preferred_element_type=jnp.float32)   # (N, N)
                m = jnp.max(e, axis=0, keepdims=True)            # (1, N) per-row maxes
                p = jnp.exp(e - m)                               # p[j, n] = exp(e[n, j] - m_n)
                s = jnp.sum(p, axis=0, keepdims=True)            # (1, N) per-row sums
                at = p * pl.reciprocal(s, approx=True)           # softmax(e, -1)^T
                col = jnp.sum(at, axis=-1, keepdims=True)        # (N,1) == torch attn.sum(dim=1)
                rc = pl.reciprocal(1e-9 + col, approx=True)
                xr_parts.append(rc * mm(at.astype(bf16), xv_b))  # (N, C)
            xr = xr_parts[0] if B == 1 else jnp.concatenate(xr_parts, axis=0)
            d16 = (h - xr).astype(bf16)
            y = jnp.maximum(mm(d16, wt) + bt, 0.0)               # folded trans_conv + BN
            return h + y

        # conv1 / conv2 on the merged (B*N, C) operand -> full MXU row occupancy.
        x16 = x_ref[...].astype(bf16)                                       # (B*N, 78)
        h = jnp.maximum(mm(x16, w1_ref[...]) + bias("b1"), 0.0)             # (B*N, 32)
        h = jnp.maximum(mm(h.astype(bf16), w2_ref[...]) + bias("b2"), 0.0)  # (B*N, 64)

        h = sa_layer(h, a1_wqv_ref[...], a1_wt_ref[...],
                     bias("a1_bv"), bias("a1_bt"))                          # (B*N, 64)

        # Per-batch global max-pool; "concat + conv3" as a split-weight matmul:
        #   concat([h, gf]) @ W3^T == h @ W3a^T + gf @ W3b^T
        h3 = mm(h.astype(bf16), w3a_ref[...])                               # (B*N, 256)
        w3b = w3b_ref[...]
        b3 = bias("b3")
        h_parts = []
        for b in range(B):
            gf = jnp.max(h[b * N:(b + 1) * N], axis=0, keepdims=True)       # (1, 64)
            be = mm(gf.astype(bf16), w3b) + b3                              # (1, 256)
            h_parts.append(jnp.maximum(h3[b * N:(b + 1) * N] + be, 0.0))
        h = h_parts[0] if B == 1 else jnp.concatenate(h_parts, axis=0)      # (B*N, 256)

        # SA2 weights must be resident now; the compute above hid the DMA.
        cp_qv.wait()
        cp_wt.wait()
        h = sa_layer(h, a2_wqv_buf[...], a2_wt_buf[...],
                     bias("a2_bv"), bias("a2_bt"))                          # (B*N, 256)

        out_ref[...] = h                       # lane-dense (B*N, 256) output only

    return kernel


# ----------------------------------- wrapper ------------------------------------


def pcn_encoder_forward(x_ncn, flat_params):
    B, Cin, N = x_ncn.shape
    assert Cin == 78
    Cout = 256
    BN = B * N
    # (B, C, N) -> merged (B*N, C): channels land on the 128-lane axis.
    x_merged = jnp.transpose(x_ncn, (0, 2, 1)).reshape(BN, Cin)

    def rep(shape):
        return pl.BlockSpec(shape, lambda i: (0, 0))    # replicated full-array block

    a2_wqv, a2_wt = flat_params[6], flat_params[7]

    in_specs = [pl.BlockSpec((BN, Cin), lambda i: (0, 0))]
    in_specs += [rep(flat_params[k].shape) for k in range(6)]   # w1,w2,a1_wqv,a1_wt,w3a,w3b
    in_specs += [pl.BlockSpec(memory_space=pl.ANY),             # a2_wqv (manual DMA)
                 pl.BlockSpec(memory_space=pl.ANY)]             # a2_wt  (manual DMA)
    in_specs += [rep(flat_params[8].shape)]                     # packed biases

    out = pl.pallas_call(
        _make_pcn_kernel(B, N),
        out_shape=jax.ShapeDtypeStruct((BN, Cout), jnp.float32),
        grid_spec=pltpu.PrefetchScalarGridSpec(
            num_scalar_prefetch=0,
            grid=(1,),                                  # batch folded into M dim
            in_specs=in_specs,
            out_specs=pl.BlockSpec((BN, Cout), lambda i: (0, 0)),
            scratch_shapes=[
                pltpu.VMEM(a2_wqv.shape, jnp.bfloat16),
                pltpu.VMEM(a2_wt.shape, jnp.bfloat16),
                pltpu.SemaphoreType.DMA((2,)),
            ],
        ),
        compiler_params=pltpu.CompilerParams(
            dimension_semantics=("arbitrary",),
            # Generous for 128-MiB chips, still leaves headroom on v7x (64 MiB).
            vmem_limit_bytes=48 * 1024 * 1024),
    )(x_merged, *flat_params)

    x_out = jnp.transpose(out.reshape(B, N, Cout), (0, 2, 1))   # XLA transpose -> (B,256,N)
    global_feature = out                                        # already (B*N, 256)
    return x_out, global_feature


# -------------------------- deterministic synthetic parameters ------------------


def _init_conv(key, cout, cin):
    kw, kb = jax.random.split(key)
    bound = 1.0 / math.sqrt(cin)
    w = jax.random.uniform(kw, (cout, cin), jnp.float32, -bound, bound)
    b = jax.random.uniform(kb, (cout,), jnp.float32, -bound, bound)
    return w, b


def _init_bn(key, c):
    k1, k2, k3, k4 = jax.random.split(key, 4)
    gamma = 1.0 + 0.1 * jax.random.normal(k1, (c,), jnp.float32)
    beta = 0.1 * jax.random.normal(k2, (c,), jnp.float32)
    mean = 0.1 * jax.random.normal(k3, (c,), jnp.float32)
    var = 0.5 + 0.5 * jnp.abs(jax.random.normal(k4, (c,), jnp.float32))
    s = gamma / jnp.sqrt(var + 1e-5)
    t = beta - mean * s
    return s, t


def _init_sa(key, c):
    k = jax.random.split(key, 4)
    wqk, _ = _init_conv(k[0], c, c)        # q_conv / k_conv share weights, no bias
    wv, bv = _init_conv(k[1], c, c)
    wt, bt = _init_conv(k[2], c, c)
    s, t = _init_bn(k[3], c)
    return dict(wqkT=wqk.T, wvT=wv.T, bv=bv[None, :],
                wtT=wt.T, bt=bt[None, :], s=s[None, :], t=t[None, :])


def build_params(key):
    ks = jax.random.split(key, 8)
    w1, b1 = _init_conv(ks[0], 32, 78)
    s1, t1 = _init_bn(ks[1], 32)
    w2, b2 = _init_conv(ks[2], 64, 32)
    s2, t2 = _init_bn(ks[3], 64)
    att1 = _init_sa(ks[4], 64)
    w3, b3 = _init_conv(ks[5], 256, 128)
    s3, t3 = _init_bn(ks[6], 256)
    att2 = _init_sa(ks[7], 256)

    p = dict(
        w1T=w1.T, b1=b1[None, :], s1=s1[None, :], t1=t1[None, :],
        w2T=w2.T, b2=b2[None, :], s2=s2[None, :], t2=t2[None, :],
        att1=att1,
        w3aT=w3[:, :64].T, w3bT=w3[:, 64:].T,
        b3=b3[None, :], s3=s3[None, :], t3=t3[None, :],
        att2=att2,
    )
    return p, pack_kernel_params(p)


def pack_kernel_params(p):
    """Fold BN into weights/biases, cast weights to bf16, consolidate refs."""
    bf16 = jnp.bfloat16

    def fold_w(wT, s):            # wT: (Cin, Cout), s: (1, Cout)
        return (wT * s).astype(bf16)

    w1 = fold_w(p["w1T"], p["s1"]);  b1 = p["b1"] * p["s1"] + p["t1"]
    w2 = fold_w(p["w2T"], p["s2"]);  b2 = p["b2"] * p["s2"] + p["t2"]

    a1, a2 = p["att1"], p["att2"]
    a1_wqv = jnp.concatenate([a1["wqkT"], a1["wvT"]], axis=1).astype(bf16)
    a1_wt = fold_w(a1["wtT"], a1["s"]);  a1_bt = a1["bt"] * a1["s"] + a1["t"]
    a2_wqv = jnp.concatenate([a2["wqkT"], a2["wvT"]], axis=1).astype(bf16)
    a2_wt = fold_w(a2["wtT"], a2["s"]);  a2_bt = a2["bt"] * a2["s"] + a2["t"]

    w3a = fold_w(p["w3aT"], p["s3"])
    w3b = fold_w(p["w3bT"], p["s3"])
    b3 = p["b3"] * p["s3"] + p["t3"]

    segs = dict(b1=b1, b2=b2, a1_bv=a1["bv"], a1_bt=a1_bt,
                b3=b3, a2_bv=a2["bv"], a2_bt=a2_bt)
    bias_all = jnp.zeros((1, _BIAS_TOTAL), jnp.float32)
    for name, (off, w) in _BIAS_SLICE.items():
        bias_all = bias_all.at[:, off:off + w].set(segs[name].reshape(1, w))

    return [w1, w2, a1_wqv, a1_wt, w3a, w3b, a2_wqv, a2_wt, bias_all]


# ------------------------------ pure-JAX reference -------------------------------


def reference_forward(x_ncn, p):
    B, Cin, N = x_ncn.shape
    h = jnp.transpose(x_ncn, (0, 2, 1)).astype(jnp.float32)

    def cbr(h, wT, b, s, t):
        return jnp.maximum((h @ wT + b) * s + t, 0.0)

    def sa(h, a):
        xq = h @ a["wqkT"]
        xv = h @ a["wvT"] + a["bv"]
        energy = jnp.einsum("bic,bjc->bij", xq, xq)
        attn = jax.nn.softmax(energy, axis=-1)
        attn = attn / (1e-9 + jnp.sum(attn, axis=1, keepdims=True))
        xr = jnp.einsum("bnj,bnc->bjc", attn, xv)
        y = jnp.maximum(((h - xr) @ a["wtT"] + a["bt"]) * a["s"] + a["t"], 0.0)
        return h + y

    h = cbr(h, p["w1T"], p["b1"], p["s1"], p["t1"])
    h = cbr(h, p["w2T"], p["b2"], p["s2"], p["t2"])
    h = sa(h, p["att1"])
    gf = jnp.max(h, axis=1, keepdims=True)                               # (B, 1, 64)
    hcat = jnp.concatenate([h, jnp.broadcast_to(gf, h.shape)], axis=2)   # (B, N, 128)
    w3T = jnp.concatenate([p["w3aT"], p["w3bT"]], axis=0)                # (128, 256)
    h = cbr(hcat, w3T, p["b3"], p["s3"], p["t3"])
    h = sa(h, p["att2"])
    x_out = jnp.transpose(h, (0, 2, 1))
    gfeat = h.reshape(B * N, -1)
    return x_out, gfeat


# --------------------------------------- main ------------------------------------


if __name__ == "__main__":
    key = jax.random.PRNGKey(0)
    k_x, k_p = jax.random.split(key)

    B, Cin, N = 2, 78, 64          # small shapes consistent with the module
    x = jax.random.normal(k_x, (B, Cin, N), jnp.float32)

    params, flat_params = build_params(k_p)

    x_out, gfeat = jax.jit(pcn_encoder_forward)(x, flat_params)
    x_out = jax.block_until_ready(x_out)
    gfeat = jax.block_until_ready(gfeat)

    x_ref, g_ref = reference_forward(x, params)
    assert x_out.shape == (B, 256, N)
    assert gfeat.shape == (B * N, 256)
    # bf16 MXU operands + approx reciprocals -> slightly looser tolerance than f32.
    assert jnp.allclose(x_out, x_ref, rtol=3e-2, atol=3e-2)
    assert jnp.allclose(gfeat, g_ref, rtol=3e-2, atol=3e-2)

    print("KERNEL_OK")
</pallas_src>

<mosaic_0001>
module attributes {stable_mosaic.version = 11 : i64} {
  func.func @kernel(%arg0: i32, %arg1: memref<128x78xf32, #tpu.memory_space<vmem>>, %arg2: memref<78x32xbf16, #tpu.memory_space<vmem>>, %arg3: memref<32x64xbf16, #tpu.memory_space<vmem>>, %arg4: memref<64x128xbf16, #tpu.memory_space<vmem>>, %arg5: memref<64x64xbf16, #tpu.memory_space<vmem>>, %arg6: memref<64x256xbf16, #tpu.memory_space<vmem>>, %arg7: memref<64x256xbf16, #tpu.memory_space<vmem>>, %arg8: memref<256x512xbf16, #tpu.memory_space<any>>, %arg9: memref<256x256xbf16, #tpu.memory_space<any>>, %arg10: memref<1x1280xf32, #tpu.memory_space<vmem>>, %arg11: memref<128x256xf32, #tpu.memory_space<vmem>>, %arg12: memref<256x512xbf16, #tpu.memory_space<vmem>>, %arg13: memref<256x256xbf16, #tpu.memory_space<vmem>>, %arg14: memref<2x!tpu.dma_semaphore, #tpu.memory_space<semaphore_mem>>) attributes {dimension_semantics = [#tpu.dimension_semantics<arbitrary>], iteration_bounds = array<i64: 1>, scalar_prefetch = 0 : i64, scratch_operands = 3 : i64, tpu.core_type = #tpu.core_type<tc>, window_params = [{pipeline_mode = #tpu.pipeline_mode<synchronous>, transform_indices = @transform_0, window_bounds = array<i64: 128, 78>}, {pipeline_mode = #tpu.pipeline_mode<synchronous>, transform_indices = @transform_1, window_bounds = array<i64: 78, 32>}, {pipeline_mode = #tpu.pipeline_mode<synchronous>, transform_indices = @transform_2, window_bounds = array<i64: 32, 64>}, {pipeline_mode = #tpu.pipeline_mode<synchronous>, transform_indices = @transform_3, window_bounds = array<i64: 64, 128>}, {pipeline_mode = #tpu.pipeline_mode<synchronous>, transform_indices = @transform_4, window_bounds = array<i64: 64, 64>}, {pipeline_mode = #tpu.pipeline_mode<synchronous>, transform_indices = @transform_5, window_bounds = array<i64: 64, 256>}, {pipeline_mode = #tpu.pipeline_mode<synchronous>, transform_indices = @transform_6, window_bounds = array<i64: 64, 256>}, {}, {}, {pipeline_mode = #tpu.pipeline_mode<synchronous>, transform_indices = @transform_9, window_bounds = array<i64: 1, 1280>}, {pipeline_mode = #tpu.pipeline_mode<synchronous>, transform_indices = @transform_10, window_bounds = array<i64: 128, 256>}]} {
    %c0_i32 = arith.constant 0 : i32
    %0 = tpu.memref_slice %arg14[%c0_i32] : memref<2x!tpu.dma_semaphore, #tpu.memory_space<semaphore_mem>> -> memref<1x!tpu.dma_semaphore, #tpu.memory_space<semaphore_mem>>
    %1 = tpu.memref_squeeze %0 : memref<1x!tpu.dma_semaphore, #tpu.memory_space<semaphore_mem>> -> memref<!tpu.dma_semaphore, #tpu.memory_space<semaphore_mem>>
    tpu.enqueue_dma source(%arg8 : memref<256x512xbf16, #tpu.memory_space<any>>) target(%arg12 : memref<256x512xbf16, #tpu.memory_space<vmem>>) target_semaphore(%1 : memref<!tpu.dma_semaphore, #tpu.memory_space<semaphore_mem>>)
    %c1_i32 = arith.constant 1 : i32
    %2 = tpu.memref_slice %arg14[%c1_i32] : memref<2x!tpu.dma_semaphore, #tpu.memory_space<semaphore_mem>> -> memref<1x!tpu.dma_semaphore, #tpu.memory_space<semaphore_mem>>
    %3 = tpu.memref_squeeze %2 : memref<1x!tpu.dma_semaphore, #tpu.memory_space<semaphore_mem>> -> memref<!tpu.dma_semaphore, #tpu.memory_space<semaphore_mem>>
    tpu.enqueue_dma source(%arg9 : memref<256x256xbf16, #tpu.memory_space<any>>) target(%arg13 : memref<256x256xbf16, #tpu.memory_space<vmem>>) target_semaphore(%3 : memref<!tpu.dma_semaphore, #tpu.memory_space<semaphore_mem>>)
    %c0 = arith.constant 0 : index
    %c0_0 = arith.constant 0 : index
    %4 = vector.load %arg1[%c0, %c0_0] : memref<128x78xf32, #tpu.memory_space<vmem>>, vector<128x78xf32>
    %5 = arith.truncf %4 : vector<128x78xf32> to vector<128x78xbf16>
    %c0_1 = arith.constant 0 : index
    %c0_2 = arith.constant 0 : index
    %6 = vector.load %arg2[%c0_1, %c0_2] : memref<78x32xbf16, #tpu.memory_space<vmem>>, vector<78x32xbf16>
    %cst = arith.constant dense<0.000000e+00> : vector<128x32xf32>
    %7 = tpu.matmul %5, %6, %cst {dimension_numbers = #tpu.dot_dimension_numbers<[1], [0], [0], [1], [0, 0, 1, 1], [], []>} : vector<128x78xbf16>, vector<78x32xbf16>, vector<128x32xf32> -> vector<128x32xf32>
    %c0_3 = arith.constant 0 : index
    %c0_4 = arith.constant 0 : index
    %8 = vector.load %arg10[%c0_3, %c0_4] : memref<1x1280xf32, #tpu.memory_space<vmem>>, vector<1x32xf32>
    %9 = vector.broadcast %8 : vector<1x32xf32> to vector<128x32xf32>
    %10 = arith.addf %7, %9 : vector<128x32xf32>
    %cst_5 = arith.constant 0.000000e+00 : f32
    %11 = vector.broadcast %cst_5 : f32 to vector<128x32xf32>
    %12 = arith.maximumf %10, %11 : vector<128x32xf32>
    %13 = arith.truncf %12 : vector<128x32xf32> to vector<128x32xbf16>
    %c0_6 = arith.constant 0 : index
    %c0_7 = arith.constant 0 : index
    %14 = vector.load %arg3[%c0_6, %c0_7] : memref<32x64xbf16, #tpu.memory_space<vmem>>, vector<32x64xbf16>
    %cst_8 = arith.constant dense<0.000000e+00> : vector<128x64xf32>
    %15 = tpu.matmul %13, %14, %cst_8 {dimension_numbers = #tpu.dot_dimension_numbers<[1], [0], [0], [1], [0, 0, 1, 1], [], []>} : vector<128x32xbf16>, vector<32x64xbf16>, vector<128x64xf32> -> vector<128x64xf32>
    %c0_9 = arith.constant 0 : index
    %c128 = arith.constant 128 : index
    %16 = vector.load %arg10[%c0_9, %c128] : memref<1x1280xf32, #tpu.memory_space<vmem>>, vector<1x64xf32>
    %17 = vector.broadcast %16 : vector<1x64xf32> to vector<128x64xf32>
    %18 = arith.addf %15, %17 : vector<128x64xf32>
    %cst_10 = arith.constant 0.000000e+00 : f32
    %19 = vector.broadcast %cst_10 : f32 to vector<128x64xf32>
    %20 = arith.maximumf %18, %19 : vector<128x64xf32>
    %c0_11 = arith.constant 0 : index
    %c0_12 = arith.constant 0 : index
    %21 = vector.load %arg4[%c0_11, %c0_12] : memref<64x128xbf16, #tpu.memory_space<vmem>>, vector<64x128xbf16>
    %c0_13 = arith.constant 0 : index
    %c0_14 = arith.constant 0 : index
    %22 = vector.load %arg5[%c0_13, %c0_14] : memref<64x64xbf16, #tpu.memory_space<vmem>>, vector<64x64xbf16>
    %c0_15 = arith.constant 0 : index
    %c256 = arith.constant 256 : index
    %23 = vector.load %arg10[%c0_15, %c256] : memref<1x1280xf32, #tpu.memory_space<vmem>>, vector<1x64xf32>
    %c0_16 = arith.constant 0 : index
    %c384 = arith.constant 384 : index
    %24 = vector.load %arg10[%c0_16, %c384] : memref<1x1280xf32, #tpu.memory_space<vmem>>, vector<1x64xf32>
    %25 = arith.truncf %20 : vector<128x64xf32> to vector<128x64xbf16>
    %cst_17 = arith.constant dense<0.000000e+00> : vector<128x128xf32>
    %26 = tpu.matmul %25, %21, %cst_17 {dimension_numbers = #tpu.dot_dimension_numbers<[1], [0], [0], [1], [0, 0, 1, 1], [], []>} : vector<128x64xbf16>, vector<64x128xbf16>, vector<128x128xf32> -> vector<128x128xf32>
    %27 = vector.extract_strided_slice %26 {offsets = [0, 0], sizes = [128, 64], strides = [1, 1]} : vector<128x128xf32> to vector<128x64xf32>
    %28 = arith.truncf %27 : vector<128x64xf32> to vector<128x64xbf16>
    %29 = vector.extract_strided_slice %26 {offsets = [0, 64], sizes = [128, 64], strides = [1, 1]} : vector<128x128xf32> to vector<128x64xf32>
    %30 = vector.broadcast %23 : vector<1x64xf32> to vector<128x64xf32>
    %31 = arith.addf %29, %30 : vector<128x64xf32>
    %32 = arith.truncf %31 : vector<128x64xf32> to vector<128x64xbf16>
    %33 = vector.extract_strided_slice %28 {offsets = [0, 0], sizes = [64, 64], strides = [1, 1]} : vector<128x64xbf16> to vector<64x64xbf16>
    %34 = vector.extract_strided_slice %32 {offsets = [0, 0], sizes = [64, 64], strides = [1, 1]} : vector<128x64xbf16> to vector<64x64xbf16>
    %cst_18 = arith.constant dense<0.000000e+00> : vector<64x64xf32>
    %35 = tpu.matmul %33, %33, %cst_18 {dimension_numbers = #tpu.dot_dimension_numbers<[1], [1], [0], [0], [0, 0, 1, 0], [], []>} : vector<64x64xbf16>, vector<64x64xbf16>, vector<64x64xf32> -> vector<64x64xf32>
    %cst_19 = arith.constant dense<0xFF800000> : vector<64xf32>
    %36 = vector.multi_reduction <maximumf>, %35, %cst_19 [0] : vector<64x64xf32> to vector<64xf32>
    %37 = vector.shape_cast %36 : vector<64xf32> to vector<1x64xf32>
    %38 = vector.broadcast %37 : vector<1x64xf32> to vector<64x64xf32>
    %39 = arith.subf %35, %38 : vector<64x64xf32>
    %40 = math.exp %39 : vector<64x64xf32>
    %cst_20 = arith.constant dense<0.000000e+00> : vector<64xf32>
    %41 = vector.multi_reduction <add>, %40, %cst_20 [0] : vector<64x64xf32> to vector<64xf32>
    %42 = vector.shape_cast %41 : vector<64xf32> to vector<1x64xf32>
    %43 = tpu.reciprocal %42 {approx = true} : vector<1x64xf32> -> vector<1x64xf32>
    %44 = vector.broadcast %43 : vector<1x64xf32> to vector<64x64xf32>
    %45 = arith.mulf %40, %44 : vector<64x64xf32>
    %cst_21 = arith.constant dense<0.000000e+00> : vector<64xf32>
    %46 = vector.multi_reduction <add>, %45, %cst_21 [1] : vector<64x64xf32> to vector<64xf32>
    %47 = vector.shape_cast %46 : vector<64xf32> to vector<64x1xf32>
    %cst_22 = arith.constant 9.99999971E-10 : f32
    %48 = vector.broadcast %cst_22 : f32 to vector<64x1xf32>
    %49 = arith.addf %48, %47 : vector<64x1xf32>
    %50 = tpu.reciprocal %49 {approx = true} : vector<64x1xf32> -> vector<64x1xf32>
    %51 = arith.truncf %45 : vector<64x64xf32> to vector<64x64xbf16>
    %cst_23 = arith.constant dense<0.000000e+00> : vector<64x64xf32>
    %52 = tpu.matmul %51, %34, %cst_23 {dimension_numbers = #tpu.dot_dimension_numbers<[1], [0], [0], [1], [0, 0, 1, 1], [], []>} : vector<64x64xbf16>, vector<64x64xbf16>, vector<64x64xf32> -> vector<64x64xf32>
    %53 = vector.broadcast %50 : vector<64x1xf32> to vector<64x64xf32>
    %54 = arith.mulf %53, %52 : vector<64x64xf32>
    %55 = vector.extract_strided_slice %28 {offsets = [64, 0], sizes = [64, 64], strides = [1, 1]} : vector<128x64xbf16> to vector<64x64xbf16>
    %56 = vector.extract_strided_slice %32 {offsets = [64, 0], sizes = [64, 64], strides = [1, 1]} : vector<128x64xbf16> to vector<64x64xbf16>
    %cst_24 = arith.constant dense<0.000000e+00> : vector<64x64xf32>
    %57 = tpu.matmul %55, %55, %cst_24 {dimension_numbers = #tpu.dot_dimension_numbers<[1], [1], [0], [0], [0, 0, 1, 0], [], []>} : vector<64x64xbf16>, vector<64x64xbf16>, vector<64x64xf32> -> vector<64x64xf32>
    %cst_25 = arith.constant dense<0xFF800000> : vector<64xf32>
    %58 = vector.multi_reduction <maximumf>, %57, %cst_25 [0] : vector<64x64xf32> to vector<64xf32>
    %59 = vector.shape_cast %58 : vector<64xf32> to vector<1x64xf32>
    %60 = vector.broadcast %59 : vector<1x64xf32> to vector<64x64xf32>
    %61 = arith.subf %57, %60 : vector<64x64xf32>
    %62 = math.exp %61 : vector<64x64xf32>
    %cst_26 = arith.constant dense<0.000000e+00> : vector<64xf32>
    %63 = vector.multi_reduction <add>, %62, %cst_26 [0] : vector<64x64xf32> to vector<64xf32>
    %64 = vector.shape_cast %63 : vector<64xf32> to vector<1x64xf32>
    %65 = tpu.reciprocal %64 {approx = true} : vector<1x64xf32> -> vector<1x64xf32>
    %66 = vector.broadcast %65 : vector<1x64xf32> to vector<64x64xf32>
    %67 = arith.mulf %62, %66 : vector<64x64xf32>
    %cst_27 = arith.constant dense<0.000000e+00> : vector<64xf32>
    %68 = vector.multi_reduction <add>, %67, %cst_27 [1] : vector<64x64xf32> to vector<64xf32>
    %69 = vector.shape_cast %68 : vector<64xf32> to vector<64x1xf32>
    %cst_28 = arith.constant 9.99999971E-10 : f32
    %70 = vector.broadcast %cst_28 : f32 to vector<64x1xf32>
    %71 = arith.addf %70, %69 : vector<64x1xf32>
    %72 = tpu.reciprocal %71 {approx = true} : vector<64x1xf32> -> vector<64x1xf32>
    %73 = arith.truncf %67 : vector<64x64xf32> to vector<64x64xbf16>
    %cst_29 = arith.constant dense<0.000000e+00> : vector<64x64xf32>
    %74 = tpu.matmul %73, %56, %cst_29 {dimension_numbers = #tpu.dot_dimension_numbers<[1], [0], [0], [1], [0, 0, 1, 1], [], []>} : vector<64x64xbf16>, vector<64x64xbf16>, vector<64x64xf32> -> vector<64x64xf32>
    %75 = vector.broadcast %72 : vector<64x1xf32> to vector<64x64xf32>
    %76 = arith.mulf %75, %74 : vector<64x64xf32>
    %77 = tpu.concatenate %54, %76 in 0 : vector<64x64xf32>, vector<64x64xf32> -> vector<128x64xf32>
    %78 = arith.subf %20, %77 : vector<128x64xf32>
    %79 = arith.truncf %78 : vector<128x64xf32> to vector<128x64xbf16>
    %cst_30 = arith.constant dense<0.000000e+00> : vector<128x64xf32>
    %80 = tpu.matmul %79, %22, %cst_30 {dimension_numbers = #tpu.dot_dimension_numbers<[1], [0], [0], [1], [0, 0, 1, 1], [], []>} : vector<128x64xbf16>, vector<64x64xbf16>, vector<128x64xf32> -> vector<128x64xf32>
    %81 = vector.broadcast %24 : vector<1x64xf32> to vector<128x64xf32>
    %82 = arith.addf %80, %81 : vector<128x64xf32>
    %cst_31 = arith.constant 0.000000e+00 : f32
    %83 = vector.broadcast %cst_31 : f32 to vector<128x64xf32>
    %84 = arith.maximumf %82, %83 : vector<128x64xf32>
    %85 = arith.addf %20, %84 : vector<128x64xf32>
    %86 = arith.truncf %85 : vector<128x64xf32> to vector<128x64xbf16>
    %c0_32 = arith.constant 0 : index
    %c0_33 = arith.constant 0 : index
    %87 = vector.load %arg6[%c0_32, %c0_33] : memref<64x256xbf16, #tpu.memory_space<vmem>>, vector<64x256xbf16>
    %cst_34 = arith.constant dense<0.000000e+00> : vector<128x256xf32>
    %88 = tpu.matmul %86, %87, %cst_34 {dimension_numbers = #tpu.dot_dimension_numbers<[1], [0], [0], [1], [0, 0, 1, 1], [], []>} : vector<128x64xbf16>, vector<64x256xbf16>, vector<128x256xf32> -> vector<128x256xf32>
    %c0_35 = arith.constant 0 : index
    %c0_36 = arith.constant 0 : index
    %89 = vector.load %arg7[%c0_35, %c0_36] : memref<64x256xbf16, #tpu.memory_space<vmem>>, vector<64x256xbf16>
    %c0_37 = arith.constant 0 : index
    %c512 = arith.constant 512 : index
    %90 = vector.load %arg10[%c0_37, %c512] : memref<1x1280xf32, #tpu.memory_space<vmem>>, vector<1x256xf32>
    %91 = vector.extract_strided_slice %85 {offsets = [0, 0], sizes = [64, 64], strides = [1, 1]} : vector<128x64xf32> to vector<64x64xf32>
    %cst_38 = arith.constant dense<0xFF800000> : vector<64xf32>
    %92 = vector.multi_reduction <maximumf>, %91, %cst_38 [0] : vector<64x64xf32> to vector<64xf32>
    %93 = vector.shape_cast %92 : vector<64xf32> to vector<1x64xf32>
    %94 = arith.truncf %93 : vector<1x64xf32> to vector<1x64xbf16>
    %cst_39 = arith.constant dense<0.000000e+00> : vector<1x256xf32>
    %95 = tpu.matmul %94, %89, %cst_39 {dimension_numbers = #tpu.dot_dimension_numbers<[1], [0], [0], [1], [0, 0, 1, 1], [], []>} : vector<1x64xbf16>, vector<64x256xbf16>, vector<1x256xf32> -> vector<1x256xf32>
    %96 = arith.addf %95, %90 : vector<1x256xf32>
    %97 = vector.extract_strided_slice %88 {offsets = [0, 0], sizes = [64, 256], strides = [1, 1]} : vector<128x256xf32> to vector<64x256xf32>
    %98 = vector.broadcast %96 : vector<1x256xf32> to vector<64x256xf32>
    %99 = arith.addf %97, %98 : vector<64x256xf32>
    %cst_40 = arith.constant 0.000000e+00 : f32
    %100 = vector.broadcast %cst_40 : f32 to vector<64x256xf32>
    %101 = arith.maximumf %99, %100 : vector<64x256xf32>
    %102 = vector.extract_strided_slice %85 {offsets = [64, 0], sizes = [64, 64], strides = [1, 1]} : vector<128x64xf32> to vector<64x64xf32>
    %cst_41 = arith.constant dense<0xFF800000> : vector<64xf32>
    %103 = vector.multi_reduction <maximumf>, %102, %cst_41 [0] : vector<64x64xf32> to vector<64xf32>
    %104 = vector.shape_cast %103 : vector<64xf32> to vector<1x64xf32>
    %105 = arith.truncf %104 : vector<1x64xf32> to vector<1x64xbf16>
    %cst_42 = arith.constant dense<0.000000e+00> : vector<1x256xf32>
    %106 = tpu.matmul %105, %89, %cst_42 {dimension_numbers = #tpu.dot_dimension_numbers<[1], [0], [0], [1], [0, 0, 1, 1], [], []>} : vector<1x64xbf16>, vector<64x256xbf16>, vector<1x256xf32> -> vector<1x256xf32>
    %107 = arith.addf %106, %90 : vector<1x256xf32>
    %108 = vector.extract_strided_slice %88 {offsets = [64, 0], sizes = [64, 256], strides = [1, 1]} : vector<128x256xf32> to vector<64x256xf32>
    %109 = vector.broadcast %107 : vector<1x256xf32> to vector<64x256xf32>
    %110 = arith.addf %108, %109 : vector<64x256xf32>
    %cst_43 = arith.constant 0.000000e+00 : f32
    %111 = vector.broadcast %cst_43 : f32 to vector<64x256xf32>
    %112 = arith.maximumf %110, %111 : vector<64x256xf32>
    %113 = tpu.concatenate %101, %112 in 0 : vector<64x256xf32>, vector<64x256xf32> -> vector<128x256xf32>
    %c0_i32_44 = arith.constant 0 : i32
    %114 = tpu.memref_slice %arg14[%c0_i32_44] : memref<2x!tpu.dma_semaphore, #tpu.memory_space<semaphore_mem>> -> memref<1x!tpu.dma_semaphore, #tpu.memory_space<semaphore_mem>>
    %115 = tpu.memref_squeeze %114 : memref<1x!tpu.dma_semaphore, #tpu.memory_space<semaphore_mem>> -> memref<!tpu.dma_semaphore, #tpu.memory_space<semaphore_mem>>
    tpu.wait_dma2 semaphore(%115 : memref<!tpu.dma_semaphore, #tpu.memory_space<semaphore_mem>>) src(%arg8 : memref<256x512xbf16, #tpu.memory_space<any>>) dst(%arg12 : memref<256x512xbf16, #tpu.memory_space<vmem>>)
    %c1_i32_45 = arith.constant 1 : i32
    %116 = tpu.memref_slice %arg14[%c1_i32_45] : memref<2x!tpu.dma_semaphore, #tpu.memory_space<semaphore_mem>> -> memref<1x!tpu.dma_semaphore, #tpu.memory_space<semaphore_mem>>
    %117 = tpu.memref_squeeze %116 : memref<1x!tpu.dma_semaphore, #tpu.memory_space<semaphore_mem>> -> memref<!tpu.dma_semaphore, #tpu.memory_space<semaphore_mem>>
    tpu.wait_dma2 semaphore(%117 : memref<!tpu.dma_semaphore, #tpu.memory_space<semaphore_mem>>) src(%arg9 : memref<256x256xbf16, #tpu.memory_space<any>>) dst(%arg13 : memref<256x256xbf16, #tpu.memory_space<vmem>>)
    %c0_46 = arith.constant 0 : index
    %c0_47 = arith.constant 0 : index
    %118 = vector.load %arg12[%c0_46, %c0_47] : memref<256x512xbf16, #tpu.memory_space<vmem>>, vector<256x512xbf16>
    %c0_48 = arith.constant 0 : index
    %c0_49 = arith.constant 0 : index
    %119 = vector.load %arg13[%c0_48, %c0_49] : memref<256x256xbf16, #tpu.memory_space<vmem>>, vector<256x256xbf16>
    %c0_50 = arith.constant 0 : index
    %c768 = arith.constant 768 : index
    %120 = vector.load %arg10[%c0_50, %c768] : memref<1x1280xf32, #tpu.memory_space<vmem>>, vector<1x256xf32>
    %c0_51 = arith.constant 0 : index
    %c1024 = arith.constant 1024 : index
    %121 = vector.load %arg10[%c0_51, %c1024] : memref<1x1280xf32, #tpu.memory_space<vmem>>, vector<1x256xf32>
    %122 = arith.truncf %113 : vector<128x256xf32> to vector<128x256xbf16>
    %cst_52 = arith.constant dense<0.000000e+00> : vector<128x512xf32>
    %123 = tpu.matmul %122, %118, %cst_52 {dimension_numbers = #tpu.dot_dimension_numbers<[1], [0], [0], [1], [0, 0, 1, 1], [], []>} : vector<128x256xbf16>, vector<256x512xbf16>, vector<128x512xf32> -> vector<128x512xf32>
    %124 = vector.extract_strided_slice %123 {offsets = [0, 0], sizes = [128, 256], strides = [1, 1]} : vector<128x512xf32> to vector<128x256xf32>
    %125 = arith.truncf %124 : vector<128x256xf32> to vector<128x256xbf16>
    %126 = vector.extract_strided_slice %123 {offsets = [0, 256], sizes = [128, 256], strides = [1, 1]} : vector<128x512xf32> to vector<128x256xf32>
    %127 = vector.broadcast %120 : vector<1x256xf32> to vector<128x256xf32>
    %128 = arith.addf %126, %127 : vector<128x256xf32>
    %129 = arith.truncf %128 : vector<128x256xf32> to vector<128x256xbf16>
    %130 = vector.extract_strided_slice %125 {offsets = [0, 0], sizes = [64, 256], strides = [1, 1]} : vector<128x256xbf16> to vector<64x256xbf16>
    %131 = vector.extract_strided_slice %129 {offsets = [0, 0], sizes = [64, 256], strides = [1, 1]} : vector<128x256xbf16> to vector<64x256xbf16>
    %cst_53 = arith.constant dense<0.000000e+00> : vector<64x64xf32>
    %132 = tpu.matmul %130, %130, %cst_53 {dimension_numbers = #tpu.dot_dimension_numbers<[1], [1], [0], [0], [0, 0, 1, 0], [], []>} : vector<64x256xbf16>, vector<64x256xbf16>, vector<64x64xf32> -> vector<64x64xf32>
    %cst_54 = arith.constant dense<0xFF800000> : vector<64xf32>
    %133 = vector.multi_reduction <maximumf>, %132, %cst_54 [0] : vector<64x64xf32> to vector<64xf32>
    %134 = vector.shape_cast %133 : vector<64xf32> to vector<1x64xf32>
    %135 = vector.broadcast %134 : vector<1x64xf32> to vector<64x64xf32>
    %136 = arith.subf %132, %135 : vector<64x64xf32>
    %137 = math.exp %136 : vector<64x64xf32>
    %cst_55 = arith.constant dense<0.000000e+00> : vector<64xf32>
    %138 = vector.multi_reduction <add>, %137, %cst_55 [0] : vector<64x64xf32> to vector<64xf32>
    %139 = vector.shape_cast %138 : vector<64xf32> to vector<1x64xf32>
    %140 = tpu.reciprocal %139 {approx = true} : vector<1x64xf32> -> vector<1x64xf32>
    %141 = vector.broadcast %140 : vector<1x64xf32> to vector<64x64xf32>
    %142 = arith.mulf %137, %141 : vector<64x64xf32>
    %cst_56 = arith.constant dense<0.000000e+00> : vector<64xf32>
    %143 = vector.multi_reduction <add>, %142, %cst_56 [1] : vector<64x64xf32> to vector<64xf32>
    %144 = vector.shape_cast %143 : vector<64xf32> to vector<64x1xf32>
    %cst_57 = arith.constant 9.99999971E-10 : f32
    %145 = vector.broadcast %cst_57 : f32 to vector<64x1xf32>
    %146 = arith.addf %145, %144 : vector<64x1xf32>
    %147 = tpu.reciprocal %146 {approx = true} : vector<64x1xf32> -> vector<64x1xf32>
    %148 = arith.truncf %142 : vector<64x64xf32> to vector<64x64xbf16>
    %cst_58 = arith.constant dense<0.000000e+00> : vector<64x256xf32>
    %149 = tpu.matmul %148, %131, %cst_58 {dimension_numbers = #tpu.dot_dimension_numbers<[1], [0], [0], [1], [0, 0, 1, 1], [], []>} : vector<64x64xbf16>, vector<64x256xbf16>, vector<64x256xf32> -> vector<64x256xf32>
    %150 = vector.broadcast %147 : vector<64x1xf32> to vector<64x256xf32>
    %151 = arith.mulf %150, %149 : vector<64x256xf32>
    %152 = vector.extract_strided_slice %125 {offsets = [64, 0], sizes = [64, 256], strides = [1, 1]} : vector<128x256xbf16> to vector<64x256xbf16>
    %153 = vector.extract_strided_slice %129 {offsets = [64, 0], sizes = [64, 256], strides = [1, 1]} : vector<128x256xbf16> to vector<64x256xbf16>
    %cst_59 = arith.constant dense<0.000000e+00> : vector<64x64xf32>
    %154 = tpu.matmul %152, %152, %cst_59 {dimension_numbers = #tpu.dot_dimension_numbers<[1], [1], [0], [0], [0, 0, 1, 0], [], []>} : vector<64x256xbf16>, vector<64x256xbf16>, vector<64x64xf32> -> vector<64x64xf32>
    %cst_60 = arith.constant dense<0xFF800000> : vector<64xf32>
    %155 = vector.multi_reduction <maximumf>, %154, %cst_60 [0] : vector<64x64xf32> to vector<64xf32>
    %156 = vector.shape_cast %155 : vector<64xf32> to vector<1x64xf32>
    %157 = vector.broadcast %156 : vector<1x64xf32> to vector<64x64xf32>
    %158 = arith.subf %154, %157 : vector<64x64xf32>
    %159 = math.exp %158 : vector<64x64xf32>
    %cst_61 = arith.constant dense<0.000000e+00> : vector<64xf32>
    %160 = vector.multi_reduction <add>, %159, %cst_61 [0] : vector<64x64xf32> to vector<64xf32>
    %161 = vector.shape_cast %160 : vector<64xf32> to vector<1x64xf32>
    %162 = tpu.reciprocal %161 {approx = true} : vector<1x64xf32> -> vector<1x64xf32>
    %163 = vector.broadcast %162 : vector<1x64xf32> to vector<64x64xf32>
    %164 = arith.mulf %159, %163 : vector<64x64xf32>
    %cst_62 = arith.constant dense<0.000000e+00> : vector<64xf32>
    %165 = vector.multi_reduction <add>, %164, %cst_62 [1] : vector<64x64xf32> to vector<64xf32>
    %166 = vector.shape_cast %165 : vector<64xf32> to vector<64x1xf32>
    %cst_63 = arith.constant 9.99999971E-10 : f32
    %167 = vector.broadcast %cst_63 : f32 to vector<64x1xf32>
    %168 = arith.addf %167, %166 : vector<64x1xf32>
    %169 = tpu.reciprocal %168 {approx = true} : vector<64x1xf32> -> vector<64x1xf32>
    %170 = arith.truncf %164 : vector<64x64xf32> to vector<64x64xbf16>
    %cst_64 = arith.constant dense<0.000000e+00> : vector<64x256xf32>
    %171 = tpu.matmul %170, %153, %cst_64 {dimension_numbers = #tpu.dot_dimension_numbers<[1], [0], [0], [1], [0, 0, 1, 1], [], []>} : vector<64x64xbf16>, vector<64x256xbf16>, vector<64x256xf32> -> vector<64x256xf32>
    %172 = vector.broadcast %169 : vector<64x1xf32> to vector<64x256xf32>
    %173 = arith.mulf %172, %171 : vector<64x256xf32>
    %174 = tpu.concatenate %151, %173 in 0 : vector<64x256xf32>, vector<64x256xf32> -> vector<128x256xf32>
    %175 = arith.subf %113, %174 : vector<128x256xf32>
    %176 = arith.truncf %175 : vector<128x256xf32> to vector<128x256xbf16>
    %cst_65 = arith.constant dense<0.000000e+00> : vector<128x256xf32>
    %177 = tpu.matmul %176, %119, %cst_65 {dimension_numbers = #tpu.dot_dimension_numbers<[1], [0], [0], [1], [0, 0, 1, 1], [], []>} : vector<128x256xbf16>, vector<256x256xbf16>, vector<128x256xf32> -> vector<128x256xf32>
    %178 = vector.broadcast %121 : vector<1x256xf32> to vector<128x256xf32>
    %179 = arith.addf %177, %178 : vector<128x256xf32>
    %cst_66 = arith.constant 0.000000e+00 : f32
    %180 = vector.broadcast %cst_66 : f32 to vector<128x256xf32>
    %181 = arith.maximumf %179, %180 : vector<128x256xf32>
    %182 = arith.addf %113, %181 : vector<128x256xf32>
    %c0_67 = arith.constant 0 : index
    %c0_68 = arith.constant 0 : index
    %183 = vector.load %arg11[%c0_67, %c0_68] : memref<128x256xf32, #tpu.memory_space<vmem>>, vector<128x256xf32>
    tpu.vector_store %arg11[%c0_67, %c0_68], %182 {strides = array<i32>} : memref<128x256xf32, #tpu.memory_space<vmem>>, vector<128x256xf32>,
    return
  }
  func.func @transform_0(%arg0: i32) -> (i32, i32) {
    %c0_i32 = arith.constant 0 : i32
    %c0_i32_0 = arith.constant 0 : i32
    %c0_i32_1 = arith.constant 0 : i32
    return %c0_i32, %c0_i32_0 : i32, i32
  }
  func.func @transform_1(%arg0: i32) -> (i32, i32) {
    %c0_i32 = arith.constant 0 : i32
    %c0_i32_0 = arith.constant 0 : i32
    %c0_i32_1 = arith.constant 0 : i32
    return %c0_i32, %c0_i32_0 : i32, i32
  }
  func.func @transform_2(%arg0: i32) -> (i32, i32) {
    %c0_i32 = arith.constant 0 : i32
    %c0_i32_0 = arith.constant 0 : i32
    %c0_i32_1 = arith.constant 0 : i32
    return %c0_i32, %c0_i32_0 : i32, i32
  }
  func.func @transform_3(%arg0: i32) -> (i32, i32) {
    %c0_i32 = arith.constant 0 : i32
    %c0_i32_0 = arith.constant 0 : i32
    %c0_i32_1 = arith.constant 0 : i32
    return %c0_i32, %c0_i32_0 : i32, i32
  }
  func.func @transform_4(%arg0: i32) -> (i32, i32) {
    %c0_i32 = arith.constant 0 : i32
    %c0_i32_0 = arith.constant 0 : i32
    %c0_i32_1 = arith.constant 0 : i32
    return %c0_i32, %c0_i32_0 : i32, i32
  }
  func.func @transform_5(%arg0: i32) -> (i32, i32) {
    %c0_i32 = arith.constant 0 : i32
    %c0_i32_0 = arith.constant 0 : i32
    %c0_i32_1 = arith.constant 0 : i32
    return %c0_i32, %c0_i32_0 : i32, i32
  }
  func.func @transform_6(%arg0: i32) -> (i32, i32) {
    %c0_i32 = arith.constant 0 : i32
    %c0_i32_0 = arith.constant 0 : i32
    %c0_i32_1 = arith.constant 0 : i32
    return %c0_i32, %c0_i32_0 : i32, i32
  }
  func.func @transform_9(%arg0: i32) -> (i32, i32) {
    %c0_i32 = arith.constant 0 : i32
    %c0_i32_0 = arith.constant 0 : i32
    %c0_i32_1 = arith.constant 0 : i32
    return %c0_i32, %c0_i32_0 : i32, i32
  }
  func.func @transform_10(%arg0: i32) -> (i32, i32) {
    %c0_i32 = arith.constant 0 : i32
    %c0_i32_0 = arith.constant 0 : i32
    %c0_i32_1 = arith.constant 0 : i32
    return %c0_i32, %c0_i32_0 : i32, i32
  }
}

</mosaic_0001>

<bundles_post_ra>
// kernel: pcn_encoder_forward.1
= control target key start
LH: loop header
LB: loop body
LE: loop exit
PB: predicated region body
PF: predicated region fallthrough
CT: control target
= control target key end

     0   :  { %15 = vsyncpa [#allocation6], 0  ;;  %s6013_s0 = inlined_call_operand.hbm [shape: f32[128,78], index: 0, kind: input, shape index: {}]   ;;  %s6014_s1 = inlined_call_operand.vmem [shape: bf16[78,32], index: 1, kind: input, shape index: {}]   ;;  %s6015_s2 = inlined_call_operand.vmem [shape: bf16[32,64], index: 2, kind: input, shape index: {}]   ;;  %s6016_s3 = inlined_call_operand.vmem [shape: bf16[64,128], index: 3, kind: input, shape index: {}]   ;;  %s6017_s4 = inlined_call_operand.hbm [shape: bf16[64,64], index: 4, kind: input, shape index: {}]   ;;  %s6018_s5 = inlined_call_operand.hbm [shape: bf16[64,256], index: 5, kind: input, shape index: {}]   ;;  %s6019_s6 = inlined_call_operand.hbm [shape: bf16[64,256], index: 6, kind: input, shape index: {}]   ;;  %s6020_s7 = inlined_call_operand.hbm [shape: bf16[256,512], index: 7, kind: input, shape index: {}]   ;;  %s6021_s8 = inlined_call_operand.hbm [shape: bf16[256,256], index: 8, kind: input, shape index: {}]   ;;  %s6022_s9 = inlined_call_operand.vmem [shape: f32[1,1280], index: 9, kind: input, shape index: {}]   ;;  %s6023_s10 = inlined_call_operand.vmem [shape: f32[128,256], index: 10, kind: output, shape index: {}]  }
   0x1   :  { %16 = vsyncpa [#allocation8], 0  ;;  %s41_s15 = sshll.u32 %s6017_s4, 4  ;;  %s42_s15 = int_to_ptr.hbm [resolvable:$true] %s41_s15 }
   0x2   :  { %17 = vsyncpa [#allocation11], 0  ;;  %s4800_s16 = smov [#allocation7]   ;;  %s22_s20 = sshll.u32 %s6013_s0, 4  ;;  %s23_s20 = int_to_ptr.hbm [resolvable:$true] %s22_s20 }
   0x3   :  { %s43_s17 = sshll.u32 %s4800_s16, 4  ;;  %s4801_s21 = smov 64   ;;  %s44_s17 = int_to_ptr.vmem [resolvable:$true] %s43_s17 }
   0x4   :  { %s4802_s22 = smov 4   ;;  %s4803_s23 = smov [#allocation5]  }
   0x5   :  { %49 = dma.hbm_to_vmem [thread:$0]  %s42_s15, 512, %s44_s17, [#allocation8], %s4801_s21, %s4801_s21, %s4802_s22  }
   0x6   :  { %s24_s24 = sshll.u32 %s4803_s23, 4  ;;  %s4804_s25 = smov 128   ;;  %s25_s24 = int_to_ptr.vmem [resolvable:$true] %s24_s24 }
   0x7   :  { %s4805_s4 = smov 8   ;;  %s54_s28 = sshll.u32 %s6018_s5, 4  ;;  %s55_s28 = int_to_ptr.hbm [resolvable:$true] %s54_s28 }
   0x8   :  { %30 = dma.hbm_to_vmem [thread:$0]  %s23_s20, 2048, %s25_s24, [#allocation6], %s4804_s25, %s4804_s25, %s4805_s4  }
   0x9   :  { %s4806_s29 = smov [#allocation9]   ;;  %s67_s12 = sshll.u32 %s6019_s6, 4  ;;  %s68_s12 = int_to_ptr.hbm [resolvable:$true] %s67_s12 }
   0xa   :  { %s56_s30 = sshll.u32 %s4806_s29, 4  ;;  %s4807_s13 = smov [#allocation10]   ;;  %s57_s30 = int_to_ptr.vmem [resolvable:$true] %s56_s30 }
   0xb   :  { %62 = dma.hbm_to_vmem [thread:$0]  %s55_s28, 1024, %s57_s30, [#allocation8], %s4804_s25, %s4804_s25, %s4805_s4  }
   0xc   :  { %s69_s14 = sshll.u32 %s4807_s13, 4  ;;  %s70_s14 = int_to_ptr.vmem [resolvable:$true] %s69_s14 }
   0xd   :  { %75 = dma.hbm_to_vmem [thread:$0]  %s68_s12, 1024, %s70_s14, [#allocation11], %s4804_s25, %s4804_s25, %s4805_s4  }
   0xe   :  { %4790 = dma.done.wait [#allocation6], 2048  }
   0xf   :  { %4791 = vsyncadd [#allocation6], 4294965248 }
  0x10   :  { %4792 = dma.done.wait [#allocation8], 1536  }
  0x11   :  { %4793 = vsyncadd [#allocation8], 4294965760 }
  0x12   :  { %4794 = dma.done.wait [#allocation11], 1024  }
  0x13   :  { %4795 = vsyncadd [#allocation11], 4294966272  ;;  %v3789_v0 = vld [vmem:[%s6014_s1 + $0x20] sm:$0xf]  ;;  %v4369_v1 = vld [vmem:[%s6014_s1 + $0x20] sm:$0x70] }
  0x14   :  { %vm214_vm0 = vcmask 1046528   ;;  %v3790_v2 = vor.u32 %v4369_v1, %v3789_v0  ;;  %v4368_v4 = vld [vmem:[%s6014_s1 + $0x18] sm:$0xff]  ;;  %v4367_v5 = vld [vmem:[%s6014_s1 + $0x10] sm:$0xff]  ;;  %v4366_v6 = vld [vmem:[%s6014_s1 + $0x8] sm:$0xff]  ;;  %vm189_vm1 = vcmask 637952   ;;  %vm311_vm2 = vcmask 261120  }
  0x15   :  { %v4365_v7 = vld [vmem:[%s6014_s1] sm:$0xff]  ;;  %v123_v9 = vld [vmem:[#allocation5 + $0x8] sm:$0xff]  ;;  %v124_v11 = vld [vmem:[#allocation5 + $0x10] sm:$0xff]  ;;  %vm451_vm3 = vcmask 523264   ;;  %s102_s20 = sshll.u32 %s6020_s7, 4  ;;  %s4808_s22 = smov [#allocation2]   ;;  %s103_s20 = int_to_ptr.hbm [resolvable:$true] %s102_s20 }
  0x16   :  { %v216_v3 = vsel %vm214_vm0, %v3790_v2, 0  ;;  %v122_v8 = vld [vmem:[#allocation5] sm:$0xff]  ;;  %v125_v12 = vld [vmem:[#allocation5 + $0x18] sm:$0xff]  ;;  %v127_v15 = vld [vmem:[#allocation5 + $0x28] sm:$0xff]  ;;  %s104_s23 = sshll.u32 %s4808_s22, 4  ;;  %s116_s4 = sshll.u32 %s6021_s8, 4  ;;  %s105_s23 = int_to_ptr.vmem [resolvable:$true] %s104_s23  ;;  %s117_s4 = int_to_ptr.hbm [resolvable:$true] %s116_s4 }
  0x17   :  { %221 = vmatpush.bf16.msra.mxu0 %v216_v3  ;;  %v138_v10 = vpack.c.bf16 %v123_v9, %v122_v8  ;;  %v139_v13 = vpack.c.bf16 %v125_v12, %v124_v11  ;;  %v126_v14 = vld [vmem:[#allocation5 + $0x20] sm:$0xff]  ;;  %v4371_v17 = vld [vmem:[%s6015_s2 + $0x8] sm:$0xff]  ;;  %v128_v18 = vld [vmem:[#allocation5 + $0x30] sm:$0xff]  ;;  %107 = dma.hbm_to_vmem [thread:$0]  %s103_s20, 8192, %s105_s23, [#allocation4] }
  0x18   :  { %v140_v16 = vpack.c.bf16 %v127_v15, %v126_v14  ;;  %4492 = vmatpush.bf16.msra.mxu1 %v4371_v17  ;;  %4493 = vmatpush.bf16.msra.mxu2 %v4371_v17  ;;  %v129_v19 = vld [vmem:[#allocation5 + $0x38] sm:$0xff]  ;;  %v130_v21 = vld [vmem:[#allocation5 + $0x40] sm:$0xff]  ;;  %v131_v22 = vld [vmem:[#allocation5 + $0x48] sm:$0xff]  ;;  %s4809_s26 = smov [#allocation3]  }
  0x19   :  { %v141_v20 = vpack.c.bf16 %v129_v19, %v128_v18  ;;  %v142_v23 = vpack.c.bf16 %v131_v22, %v130_v21  ;;  %v132_v24 = vld [vmem:[#allocation5 + $0x50] sm:$0xff]  ;;  %v133_v25 = vld [vmem:[#allocation5 + $0x58] sm:$0xff]  ;;  %v134_v27 = vld [vmem:[#allocation5 + $0x60] sm:$0xff]  ;;  %s118_s1 = sshll.u32 %s4809_s26, 4  ;;  %s119_s1 = int_to_ptr.vmem [resolvable:$true] %s118_s1 }
  0x1a   :  { %v143_v26 = vpack.c.bf16 %v133_v25, %v132_v24  ;;  %v135_v28 = vld [vmem:[#allocation5 + $0x68] sm:$0xff]  ;;  %v4370_v30 = vld [vmem:[%s6015_s2] sm:$0xff]  ;;  %v136_v31 = vld [vmem:[#allocation5 + $0x70] sm:$0xff]  ;;  %121 = dma.hbm_to_vmem [thread:$0]  %s117_s4, 4096, %s119_s1, [#allocation4 + $0x1] }
  0x1b   :  { %222 = vmatpush.bf16.msra.mxu0 %v4368_v4  ;;  %v144_v29 = vpack.c.bf16 %v135_v28, %v134_v27  ;;  %v137_v32 = vld [vmem:[#allocation5 + $0x78] sm:$0xff]  ;;  %v4914_v35 = vld [vmem:[%s6022_s9] ss:$0 sm:$0xff]  ;;  %v4374_v21 = vld [vmem:[%s6016_s3 + $0x10] sm:$0xff] }
  0x1c   :  { %4494 = vmatpush.bf16.msra.mxu1 %v4370_v30  ;;  %4495 = vmatpush.bf16.msra.mxu2 %v4370_v30  ;;  %v145_v33 = vpack.c.bf16 %v137_v32, %v136_v31  ;;  %v4372_v24 = vld [vmem:[%s6016_s3] sm:$0xff] }
  0x1d   :  { %v4508_v31 = vld [vmem:[%s6022_s9 + $0x2] ss:$0 sm:$0xff] }
  0x1e   :  { %543 = vrot.lane.b32.xlu0 %v4508_v31, %s4801_s21 }
  0x1f   :  { %223 = vmatpush.bf16.msra.mxu0 %v4367_v5 }
  0x23   :  { %224 = vmatpush.bf16.msra.mxu0 %v4366_v6 }
  0x27   :  { %225 = vmatpush.bf16.msra.mxu0 %v4365_v7 }
  0x2a   :  { %3791 = vmatmul.msk.bf16.vlgmr.msra.gmra.mxu0 %vm189_vm1, %v138_v10 }
  0x2b   :  { %342 = vmatpush.bf16.msrb.mxu0 %v4371_v17  ;;  %v4375_v17 = vld [vmem:[%s6016_s3 + $0x18] sm:$0xff] }
  0x2c   :  { %480 = vmatpush.bf16.msrb.mxu2 %v4375_v17 }
  0x2f   :  { %343 = vmatpush.bf16.msrb.mxu0 %v4370_v30 }
  0x30   :  { %481 = vmatpush.bf16.msrb.mxu2 %v4374_v21 }
  0x3a   :  { %3792 = vmatmul.msk.bf16.gmra.mxu0 %vm189_vm1, %v139_v13 }
  0x4a   :  { %3793 = vmatmul.msk.bf16.gmra.mxu0 %vm189_vm1, %v140_v16 }
  0x5a   :  { %3794 = vmatmul.msk.bf16.gmra.mxu0 %vm189_vm1, %v141_v20 }
  0x6a   :  { %3795 = vmatmul.msk.bf16.gmra.mxu0 %vm189_vm1, %v142_v23  ;;  %v4373_v23 = vld [vmem:[%s6016_s3 + $0x8] sm:$0xff] }
  0x6b   :  { %482 = vmatpush.bf16.msrb.mxu2 %v4373_v23 }
  0x6f   :  { %483 = vmatpush.bf16.msrb.mxu2 %v4372_v24 }
  0x7a   :  { %3796 = vmatmul.msk.bf16.gmra.mxu0 %vm189_vm1, %v143_v26 }
  0x8a   :  { %3797 = vmatmul.msk.bf16.gmra.mxu0 %vm189_vm1, %v144_v29 }
  0x9a   :  { %3798 = vmatmul.msk.bf16.gmra.mxu0 %vm189_vm1, %v145_v33  ;;  %v4507_v33 = vld [vmem:[%s6022_s9 + $0x1] ss:$0 sm:$0xff] }
  0xa7   :  { %v227_v34 = vpop.f32.mrf.mxu0 }
  0xa8   :  { %v228_v36 = vadd.f32 %v4914_v35, %v227_v34 }
  0xaa   :  { %v267_v39 = vmax.f32 %v228_v36, 0.0 }
  0xaf   :  { %v229_v37 = vpop.f32.mrf.mxu0 }
  0xb0   :  { %v230_v38 = vadd.f32 %v4914_v35, %v229_v37 }
  0xb2   :  { %v268_v40 = vmax.f32 %v230_v38, 0.0 }
  0xb4   :  { %v283_v41 = vpack.c.bf16 %v268_v40, %v267_v39 }
  0xb6   :  { %3807 = vmatmul.msk.bf16.vlgmr.msrb.gmra.mxu0 %vm311_vm2, %v283_v41 }
  0xb7   :  { %v232_v42 = vpop.f32.mrf.mxu0 }
  0xb8   :  { %v233_v43 = vadd.f32 %v4914_v35, %v232_v42 }
  0xba   :  { %v269_v46 = vmax.f32 %v233_v43, 0.0 }
  0xbf   :  { %v234_v44 = vpop.f32.mrf.mxu0 }
  0xc0   :  { %v235_v45 = vadd.f32 %v4914_v35, %v234_v44 }
  0xc2   :  { %v270_v47 = vmax.f32 %v235_v45, 0.0 }
  0xc4   :  { %v284_v48 = vpack.c.bf16 %v270_v47, %v269_v46 }
  0xc6   :  { %3808 = vmatmul.msk.bf16.vlgmr.msra.gmra.mxu1 %vm311_vm2, %v284_v48 }
  0xc7   :  { %v237_v49 = vpop.f32.mrf.mxu0 }
  0xc8   :  { %v238_v50 = vadd.f32 %v4914_v35, %v237_v49 }
  0xca   :  { %v271_v53 = vmax.f32 %v238_v50, 0.0 }
  0xcf   :  { %v239_v51 = vpop.f32.mrf.mxu0 }
  0xd0   :  { %v240_v52 = vadd.f32 %v4914_v35, %v239_v51 }
  0xd2   :  { %v272_v54 = vmax.f32 %v240_v52, 0.0 }
  0xd4   :  { %v285_v55 = vpack.c.bf16 %v272_v54, %v271_v53 }
  0xd6   :  { %3809 = vmatmul.msk.bf16.gmra.mxu1 %vm311_vm2, %v285_v55 }
  0xd7   :  { %v242_v56 = vpop.f32.mrf.mxu0 }
  0xd8   :  { %v243_v57 = vadd.f32 %v4914_v35, %v242_v56 }
  0xda   :  { %v273_v60 = vmax.f32 %v243_v57, 0.0 }
  0xdf   :  { %v244_v58 = vpop.f32.mrf.mxu0 }
  0xe0   :  { %v245_v59 = vadd.f32 %v4914_v35, %v244_v58 }
  0xe2   :  { %v274_v61 = vmax.f32 %v245_v59, 0.0 }
  0xe4   :  { %v286_v62 = vpack.c.bf16 %v274_v61, %v273_v60 }
  0xe6   :  { %3810 = vmatmul.msk.bf16.gmra.mxu1 %vm311_vm2, %v286_v62 }
  0xe7   :  { %v247_v63 = vpop.f32.mrf.mxu0 }
  0xe8   :  { %v248_v0 = vadd.f32 %v4914_v35, %v247_v63 }
  0xea   :  { %v275_v3 = vmax.f32 %v248_v0, 0.0 }
  0xef   :  { %v249_v1 = vpop.f32.mrf.mxu0 }
  0xf0   :  { %v250_v2 = vadd.f32 %v4914_v35, %v249_v1 }
  0xf2   :  { %v276_v4 = vmax.f32 %v250_v2, 0.0 }
  0xf4   :  { %v287_v5 = vpack.c.bf16 %v276_v4, %v275_v3 }
  0xf6   :  { %3811 = vmatmul.msk.bf16.gmra.mxu1 %vm311_vm2, %v287_v5 }
  0xf7   :  { %v252_v6 = vpop.f32.mrf.mxu0 }
  0xf8   :  { %v253_v7 = vadd.f32 %v4914_v35, %v252_v6 }
  0xfa   :  { %v277_v10 = vmax.f32 %v253_v7, 0.0 }
  0xff   :  { %v254_v8 = vpop.f32.mrf.mxu0 }
 0x100   :  { %v255_v9 = vadd.f32 %v4914_v35, %v254_v8 }
 0x102   :  { %v278_v11 = vmax.f32 %v255_v9, 0.0 }
 0x104   :  { %v288_v12 = vpack.c.bf16 %v278_v11, %v277_v10 }
 0x106   :  { %3812 = vmatmul.msk.bf16.gmra.mxu1 %vm311_vm2, %v288_v12 }
 0x107   :  { %v257_v13 = vpop.f32.mrf.mxu0 }
 0x108   :  { %v258_v14 = vadd.f32 %v4914_v35, %v257_v13 }
 0x10a   :  { %v279_v18 = vmax.f32 %v258_v14, 0.0 }
 0x10f   :  { %v259_v15 = vpop.f32.mrf.mxu0 }
 0x110   :  { %v260_v16 = vadd.f32 %v4914_v35, %v259_v15 }
 0x112   :  { %v280_v19 = vmax.f32 %v260_v16, 0.0 }
 0x114   :  { %v289_v20 = vpack.c.bf16 %v280_v19, %v279_v18 }
 0x116   :  { %3813 = vmatmul.msk.bf16.gmra.mxu1 %vm311_vm2, %v289_v20 }
 0x117   :  { %v262_v22 = vpop.f32.mrf.mxu0 }
 0x118   :  { %v263_v25 = vadd.f32 %v4914_v35, %v262_v22 }
 0x11a   :  { %v281_v28 = vmax.f32 %v263_v25, 0.0 }
 0x11f   :  { %v264_v26 = vpop.f32.mrf.mxu0 }
 0x120   :  { %v265_v27 = vadd.f32 %v4914_v35, %v264_v26  ;;  %v5017_v26 = vpop.permute.xlu0 %543 }
 0x122   :  { %v282_v29 = vmax.f32 %v265_v27, 0.0 }
 0x124   :  { %v290_v30 = vpack.c.bf16 %v282_v29, %v281_v28 }
 0x126   :  { %3814 = vmatmul.msk.bf16.vlgmr.msra.gmra.mxu2 %vm311_vm2, %v290_v30 }
 0x133   :  { %v345_v32 = vpop.f32.mrf.mxu0 }
 0x134   :  { %v346_v34 = vadd.f32 %v4507_v33, %v345_v32 }
 0x136   :  { %v4959_v35 = vmax.f32 %v346_v34, 0.0 }
 0x13b   :  { %v347_v36 = vpop.f32.mrf.mxu0 }
 0x13c   :  { %v348_v37 = vadd.f32 %v4507_v33, %v347_v36 }
 0x13e   :  { %v4961_v38 = vmax.f32 %v348_v37, 0.0 }
 0x140   :  { %v419_v39 = vpack.c.bf16 %v4961_v38, %v4959_v35 }
 0x142   :  { %3831 = vmatmul.msk.bf16.vlgmr.msrb.gmra.mxu2 %vm451_vm3, %v419_v39 }
 0x143   :  { %v350_v40 = vpop.f32.mrf.mxu1 }
 0x144   :  { %v351_v41 = vadd.f32 %v4507_v33, %v350_v40 }
 0x146   :  { %v4966_v44 = vmax.f32 %v351_v41, 0.0 }
 0x14b   :  { %v352_v42 = vpop.f32.mrf.mxu1 }
 0x14c   :  { %v353_v43 = vadd.f32 %v4507_v33, %v352_v42 }
 0x14e   :  { %v4968_v45 = vmax.f32 %v353_v43, 0.0 }
 0x150   :  { %v420_v46 = vpack.c.bf16 %v4968_v45, %v4966_v44 }
 0x152   :  { %3832 = vmatmul.msk.bf16.gmra.mxu2 %vm451_vm3, %v420_v46 }
 0x153   :  { %v355_v47 = vpop.f32.mrf.mxu1 }
 0x154   :  { %v356_v48 = vadd.f32 %v4507_v33, %v355_v47 }
 0x156   :  { %v4973_v51 = vmax.f32 %v356_v48, 0.0 }
 0x15b   :  { %v357_v49 = vpop.f32.mrf.mxu1 }
 0x15c   :  { %v358_v50 = vadd.f32 %v4507_v33, %v357_v49 }
 0x15e   :  { %v4975_v52 = vmax.f32 %v358_v50, 0.0 }
 0x160   :  { %v421_v53 = vpack.c.bf16 %v4975_v52, %v4973_v51 }
 0x162   :  { %3833 = vmatmul.msk.bf16.gmra.mxu2 %vm451_vm3, %v421_v53 }
 0x163   :  { %v360_v54 = vpop.f32.mrf.mxu1 }
 0x164   :  { %v361_v55 = vadd.f32 %v4507_v33, %v360_v54 }
 0x166   :  { %v4980_v58 = vmax.f32 %v361_v55, 0.0 }
 0x16b   :  { %v362_v56 = vpop.f32.mrf.mxu1 }
 0x16c   :  { %v363_v57 = vadd.f32 %v4507_v33, %v362_v56 }
 0x16e   :  { %v4982_v59 = vmax.f32 %v363_v57, 0.0 }
 0x170   :  { %v422_v60 = vpack.c.bf16 %v4982_v59, %v4980_v58 }
 0x172   :  { %3834 = vmatmul.msk.bf16.gmra.mxu2 %vm451_vm3, %v422_v60 }
 0x173   :  { %v365_v61 = vpop.f32.mrf.mxu1 }
 0x174   :  { %v366_v62 = vadd.f32 %v4507_v33, %v365_v61 }
 0x176   :  { %v4987_v1 = vmax.f32 %v366_v62, 0.0 }
 0x17b   :  { %v367_v63 = vpop.f32.mrf.mxu1 }
 0x17c   :  { %v368_v0 = vadd.f32 %v4507_v33, %v367_v63 }
 0x17e   :  { %v4989_v2 = vmax.f32 %v368_v0, 0.0 }
 0x180   :  { %v423_v3 = vpack.c.bf16 %v4989_v2, %v4987_v1 }
 0x182   :  { %3835 = vmatmul.msk.bf16.gmra.mxu2 %vm451_vm3, %v423_v3 }
 0x183   :  { %v370_v4 = vpop.f32.mrf.mxu1 }
 0x184   :  { %v371_v5 = vadd.f32 %v4507_v33, %v370_v4 }
 0x186   :  { %v4994_v8 = vmax.f32 %v371_v5, 0.0 }
 0x18b   :  { %v372_v6 = vpop.f32.mrf.mxu1 }
 0x18c   :  { %v373_v7 = vadd.f32 %v4507_v33, %v372_v6 }
 0x18e   :  { %v4996_v9 = vmax.f32 %v373_v7, 0.0 }
 0x190   :  { %v424_v10 = vpack.c.bf16 %v4996_v9, %v4994_v8 }
 0x192   :  { %3836 = vmatmul.msk.bf16.gmra.mxu2 %vm451_vm3, %v424_v10 }
 0x193   :  { %v375_v11 = vpop.f32.mrf.mxu1 }
 0x194   :  { %v376_v12 = vadd.f32 %v4507_v33, %v375_v11 }
 0x196   :  { %v5001_v15 = vmax.f32 %v376_v12, 0.0 }
 0x19b   :  { %v377_v13 = vpop.f32.mrf.mxu1 }
 0x19c   :  { %v378_v14 = vadd.f32 %v4507_v33, %v377_v13 }
 0x19e   :  { %v5003_v16 = vmax.f32 %v378_v14, 0.0 }
 0x1a0   :  { %v425_v17 = vpack.c.bf16 %v5003_v16, %v5001_v15 }
 0x1a2   :  { %3837 = vmatmul.msk.bf16.gmra.mxu2 %vm451_vm3, %v425_v17 }
 0x1a9   :  { %v380_v18 = vpop.f32.mrf.mxu2 }
 0x1aa   :  { %v381_v19 = vadd.f32 %v4507_v33, %v380_v18 }
 0x1ac   :  { %v5008_v22 = vmax.f32 %v381_v19, 0.0 }
 0x1b1   :  { %v382_v20 = vpop.f32.mrf.mxu2 }
 0x1b2   :  { %v383_v21 = vadd.f32 %v4507_v33, %v382_v20 }
 0x1b4   :  { %v5010_v23 = vmax.f32 %v383_v21, 0.0 }
 0x1b6   :  { %v426_v24 = vpack.c.bf16 %v5010_v23, %v5008_v22 }
 0x1b8   :  { %3838 = vmatmul.msk.bf16.gmra.mxu2 %vm451_vm3, %v426_v24 }
 0x1c5   :  { %v5015_v25 = vpop.f32.mrf.mxu2 }
 0x1c6   :  { %v546_v27 = vadd.f32 %v5017_v26, %v5015_v25 }
 0x1c8   :  { %v562_v29 = vpack.c.bf16 %v546_v27, %v546_v27 }
 0x1ca   :  { %v766_v32 = vunpack.c.l.b16 %v562_v29 }
 0x1cd   :  { %v5021_v28 = vpop.f32.mrf.mxu2 }
 0x1ce   :  { %v547_v30 = vadd.f32 %v5017_v26, %v5021_v28 }
 0x1d0   :  { %v563_v31 = vpack.c.bf16 %v547_v30, %v547_v30 }
 0x1d2   :  { %v767_v33 = vunpack.c.l.b16 %v563_v31 }
 0x1d4   :  { %v774_v34 = vpack.c.b16 %v767_v33, %v766_v32 }
 0x1d5   :  { %v490_v36 = vpop.f32.mrf.mxu2 }
 0x1d6   :  { %778 = vrot.lane.b32.xlu2 %v774_v34, %s4801_s21  ;;  %v548_v48 = vadd.f32 %v5017_v26, %v490_v36  ;;  %v527_v30 = vpack.c.bf16 %v490_v36, %v490_v36 }
 0x1d8   :  { %v564_v56 = vpack.c.bf16 %v548_v48, %v548_v48 }
 0x1da   :  { %v768_v60 = vunpack.c.l.b16 %v564_v56 }
 0x1dd   :  { %v492_v37 = vpop.f32.mrf.mxu2 }
 0x1de   :  { %v549_v46 = vadd.f32 %v5017_v26, %v492_v37  ;;  %v528_v27 = vpack.c.bf16 %v492_v37, %v492_v37 }
 0x1e0   :  { %v565_v54 = vpack.c.bf16 %v549_v46, %v549_v46  ;;  %v589_v31 = vunpack.c.l.b16 %v528_v27 }
 0x1e2   :  { %v769_v57 = vunpack.c.l.b16 %v565_v54 }
 0x1e4   :  { %v775_v63 = vpack.c.b16 %v769_v57, %v768_v60 }
 0x1e5   :  { %v495_v39 = vpop.f32.mrf.mxu2 }
 0x1e6   :  { %v550_v40 = vadd.f32 %v5017_v26, %v495_v39  ;;  %v529_v12 = vpack.c.bf16 %v495_v39, %v495_v39  ;;  %v588_v39 = vunpack.c.l.b16 %v527_v30 }
 0x1e8   :  { %v566_v42 = vpack.c.bf16 %v550_v40, %v550_v40  ;;  %v590_v24 = vunpack.c.l.b16 %v529_v12  ;;  %v595_v46 = vpack.c.b16 %v589_v31, %v588_v39 }
 0x1ea   :  { %v770_v49 = vunpack.c.l.b16 %v566_v42  ;;  %v602_v48 = vsel %vm451_vm3, %v595_v46, 0 }
 0x1ed   :  { %v497_v41 = vpop.f32.mrf.mxu2 }
 0x1ee   :  { %v551_v43 = vadd.f32 %v5017_v26, %v497_v41  ;;  %v530_v6 = vpack.c.bf16 %v497_v41, %v497_v41  ;;  %v526_v41 = vpack.c.bf16 %v5021_v28, %v5021_v28 }
 0x1f0   :  { %v567_v47 = vpack.c.bf16 %v551_v43, %v551_v43  ;;  %v591_v18 = vunpack.c.l.b16 %v530_v6  ;;  %v587_v36 = vunpack.c.l.b16 %v526_v41 }
 0x1f2   :  { %v771_v50 = vunpack.c.l.b16 %v567_v47  ;;  %v596_v29 = vpack.c.b16 %v591_v18, %v590_v24  ;;  %v525_v47 = vpack.c.bf16 %v5015_v25, %v5015_v25 }
 0x1f4   :  { %v776_v53 = vpack.c.b16 %v771_v50, %v770_v49  ;;  %v605_v33 = vsel %vm451_vm3, %v596_v29, 0  ;;  %v586_v50 = vunpack.c.l.b16 %v525_v47 }
 0x1f5   :  { %v500_v55 = vpop.f32.mrf.mxu2 }
 0x1f6   :  { %782 = vrot.lane.b32.xlu1 %v776_v53, %s4801_s21  ;;  %v552_v61 = vadd.f32 %v5017_v26, %v500_v55  ;;  %v531_v62 = vpack.c.bf16 %v500_v55, %v500_v55  ;;  %v594_v53 = vpack.c.b16 %v587_v36, %v586_v50 }
 0x1f8   :  { %v568_v3 = vpack.c.bf16 %v552_v61, %v552_v61  ;;  %v592_v7 = vunpack.c.l.b16 %v531_v62  ;;  %v599_v55 = vsel %vm451_vm3, %v594_v53, 0 }
 0x1fa   :  { %v772_v13 = vunpack.c.l.b16 %v568_v3 }
 0x1fd   :  { %v502_v0 = vpop.f32.mrf.mxu2 }
 0x1fe   :  { %v532_v4 = vpack.c.bf16 %v502_v0, %v502_v0  ;;  %v553_v5 = vadd.f32 %v5017_v26, %v502_v0  ;;  %780 = vrot.lane.b32.xlu1 %v775_v63, %s4801_s21 }
 0x200   :  { %v593_v10 = vunpack.c.l.b16 %v532_v4  ;;  %v569_v11 = vpack.c.bf16 %v553_v5, %v553_v5 }
 0x202   :  { %v5034_v14 = vpack.c.b16 %v593_v10, %v592_v7  ;;  %v773_v17 = vunpack.c.l.b16 %v569_v11 }
 0x204   :  { %v608_v19 = vsel %vm451_vm3, %v5034_v14, 0  ;;  %v777_v20 = vpack.c.b16 %v773_v17, %v772_v13 }
 0x205   :  { %v505_v21 = vpop.f32.mrf.mxu2  ;;  %614 = vmatpush.bf16.xpose.msra.mxu3 %v608_v19 }
 0x206   :  { %784 = vrot.lane.b32.xlu0 %v777_v20, %s4801_s21  ;;  %v533_v32 = vpack.c.bf16 %v505_v21, %v505_v21  ;;  %v554_v39 = vadd.f32 %v5017_v26, %v505_v21 }
 0x208   :  { %v847_v42 = vunpack.c.l.b16 %v533_v32  ;;  %v570_v50 = vpack.c.bf16 %v554_v39, %v554_v39 }
 0x20d   :  { %v507_v34 = vpop.f32.mrf.mxu2  ;;  %615 = vmatpush.bf16.xpose.msra.mxu3 %v605_v33 }
 0x20e   :  { %v534_v40 = vpack.c.bf16 %v507_v34, %v507_v34  ;;  %v555_v27 = vadd.f32 %v5017_v26, %v507_v34 }
 0x210   :  { %v848_v43 = vunpack.c.l.b16 %v534_v40 }
 0x212   :  { %v5044_v37 = vpack.c.b16 %v848_v43, %v847_v42 }
 0x215   :  { %v510_v49 = vpop.f32.mrf.mxu2  ;;  %616 = vmatpush.bf16.xpose.msra.mxu3 %v602_v48 }
 0x216   :  { %v556_v54 = vadd.f32 %v5017_v26, %v510_v49 }
 0x218   :  { %v572_v56 = vpack.c.bf16 %v556_v54, %v556_v54 }
 0x21a   :  { %v1029_v25 = vunpack.c.l.b16 %v572_v56  ;;  %v535_v56 = vpack.c.bf16 %v510_v49, %v510_v49 }
 0x21d   :  { %v512_v28 = vpop.f32.mrf.mxu2  ;;  %617 = vmatpush.bf16.xpose.msra.mxu3 %v599_v55  ;;  %v1027_v55 = vunpack.c.l.b16 %v570_v50 }
 0x21e   :  { %v557_v57 = vadd.f32 %v5017_v26, %v512_v28 }
 0x220   :  { %v573_v60 = vpack.c.bf16 %v557_v57, %v557_v57 }
 0x222   :  { %v1030_v61 = vunpack.c.l.b16 %v573_v60  ;;  %v849_v60 = vunpack.c.l.b16 %v535_v56 }
 0x224   :  { %3839 = vmatmul.msk.bf16.vlgmr.msra.gmra.mxu3 %vm451_vm3, %v594_v53  ;;  %v1036_v62 = vpack.c.b16 %v1030_v61, %v1029_v25  ;;  %v536_v53 = vpack.c.bf16 %v512_v28, %v512_v28  ;;  %v860_v28 = vsel %vm451_vm3, %v5044_v37, 0 }
 0x225   :  { %v515_v63 = vpop.f32.mrf.mxu2 }
 0x226   :  { %1041 = vrot.lane.b32.xlu1 %v1036_v62, %s4801_s21  ;;  %v558_v0 = vadd.f32 %v5017_v26, %v515_v63  ;;  %v537_v40 = vpack.c.bf16 %v515_v63, %v515_v63 }
 0x228   :  { %v574_v4 = vpack.c.bf16 %v558_v0, %v558_v0 }
 0x22a   :  { %v1031_v7 = vunpack.c.l.b16 %v574_v4 }
 0x22d   :  { %v517_v3 = vpop.f32.mrf.mxu2 }
 0x22e   :  { %v559_v5 = vadd.f32 %v5017_v26, %v517_v3  ;;  %v538_v30 = vpack.c.bf16 %v517_v3, %v517_v3 }
 0x230   :  { %v575_v6 = vpack.c.bf16 %v559_v5, %v559_v5  ;;  %v852_v47 = vunpack.c.l.b16 %v538_v30  ;;  %v779_v63 = vpop.permute.xlu2 %778 }
 0x232   :  { %v1032_v10 = vunpack.c.l.b16 %v575_v6 }
 0x234   :  { %3840 = vmatmul.msk.bf16.gmra.mxu3 %vm451_vm3, %v595_v46  ;;  %v1037_v11 = vpack.c.b16 %v1032_v10, %v1031_v7  ;;  %v571_v46 = vpack.c.bf16 %v555_v27, %v555_v27 }
 0x236   :  { %1043 = vrot.lane.b32.xlu0 %v1037_v11, %s4801_s21  ;;  %v1028_v34 = vunpack.c.l.b16 %v571_v46 }
 0x238   :  { %v1035_v57 = vpack.c.b16 %v1028_v34, %v1027_v55 }
 0x23b   :  { %v520_v12 = vpop.f32.mrf.mxu2 }
 0x23c   :  { %v560_v13 = vadd.f32 %v5017_v26, %v520_v12  ;;  %v539_v17 = vpack.c.bf16 %v520_v12, %v520_v12 }
 0x23e   :  { %v576_v19 = vpack.c.bf16 %v560_v13, %v560_v13  ;;  %v853_v31 = vunpack.c.l.b16 %v539_v17 }
 0x240   :  { %v1033_v41 = vunpack.c.l.b16 %v576_v19 }
 0x243   :  { %v522_v18 = vpop.f32.mrf.mxu2 }
 0x244   :  { %v540_v20 = vpack.c.bf16 %v522_v18, %v522_v18  ;;  %v561_v24 = vadd.f32 %v5017_v26, %v522_v18  ;;  %3841 = vmatmul.msk.bf16.gmra.mxu3 %vm451_vm3, %v596_v29  ;;  %v851_v29 = vunpack.c.l.b16 %v537_v40  ;;  %v850_v26 = vunpack.c.l.b16 %v536_v53 }
 0x246   :  { %v577_v32 = vpack.c.bf16 %v561_v24, %v561_v24  ;;  %v854_v33 = vunpack.c.l.b16 %v540_v20  ;;  %v857_v54 = vpack.c.b16 %v852_v47, %v851_v29  ;;  %v856_v25 = vpack.c.b16 %v850_v26, %v849_v60 }
 0x248   :  { %v1034_v42 = vunpack.c.l.b16 %v577_v32  ;;  %v858_v43 = vpack.c.b16 %v854_v33, %v853_v31  ;;  %v866_v21 = vsel %vm451_vm3, %v857_v54, 0  ;;  %v863_v61 = vsel %vm451_vm3, %v856_v25, 0 }
 0x24a   :  { %v869_v36 = vsel %vm451_vm3, %v858_v43, 0  ;;  %v1038_v48 = vpack.c.b16 %v1034_v42, %v1033_v41 }
 0x24b   :  { %875 = vmatpush.bf16.xpose.msrb.mxu1 %v869_v36 }
 0x24c   :  { %1045 = vrot.lane.b32.xlu2 %v1038_v48, %s4801_s21 }
 0x253   :  { %876 = vmatpush.bf16.xpose.msrb.mxu1 %v866_v21 }
 0x254   :  { %3842 = vmatmul.msk.bf16.gmra.mxu3 %vm451_vm3, %v5034_v14  ;;  %1039 = vrot.lane.b32.xlu2 %v1035_v57, %s4801_s21 }
 0x25b   :  { %877 = vmatpush.bf16.xpose.msrb.mxu1 %v863_v61 }
 0x263   :  { %878 = vmatpush.bf16.xpose.msrb.mxu1 %v860_v28 }
 0x268   :  { %v783_v49 = vpop.permute.xlu1 %782 }
 0x26a   :  { %3847 = vmatmul.msk.bf16.vlgmr.msrb.gmra.mxu1 %vm451_vm3, %v5044_v37 }
 0x270   :  { %v781_v14 = vpop.permute.xlu1 %780 }
 0x278   :  { %v785_v62 = vpop.permute.xlu0 %784 }
 0x279   :  { %806 = vmatpush.bf16.msrb.mxu3 %v785_v62 }
 0x27a   :  { %3848 = vmatmul.msk.bf16.gmra.mxu1 %vm451_vm3, %v856_v25 }
 0x27d   :  { %807 = vmatpush.bf16.msrb.mxu3 %v783_v49 }
 0x281   :  { %808 = vmatpush.bf16.msrb.mxu3 %v781_v14 }
 0x285   :  { %809 = vmatpush.bf16.msrb.mxu3 %v779_v63 }
 0x28a   :  { %3849 = vmatmul.msk.bf16.gmra.mxu1 %vm451_vm3, %v857_v54 }
 0x298   :  { %v1042_v37 = vpop.permute.xlu1 %1041 }
 0x29a   :  { %3850 = vmatmul.msk.bf16.gmra.mxu1 %vm451_vm3, %v858_v43 }
 0x2a6   :  { %v1046_v0 = vpop.permute.xlu2 %1045 }
 0x2a7   :  { %v619_v3 = vpop.f32.mrf.mxu3  ;;  %1067 = vmatpush.bf16.msra.mxu2 %v1046_v0 }
 0x2a8   :  { %v1044_v4 = vpop.permute.xlu0 %1043  ;;  %v639_v30 = vsel %vm451_vm3, %v619_v3, -inf }
 0x2ab   :  { %1068 = vmatpush.bf16.msra.mxu2 %v1044_v4 }
 0x2ae   :  { %v1040_v6 = vpop.permute.xlu2 %1039 }
 0x2af   :  { %v621_v5 = vpop.f32.mrf.mxu3  ;;  %1069 = vmatpush.bf16.msra.mxu2 %v1042_v37 }
 0x2b0   :  { %v640_v18 = vsel %vm451_vm3, %v621_v5, -inf }
 0x2b3   :  { %1070 = vmatpush.bf16.msra.mxu2 %v1040_v6 }
 0x2b7   :  { %v624_v7 = vpop.f32.mrf.mxu3 }
 0x2b8   :  { %v641_v31 = vsel %vm451_vm3, %v624_v7, -inf }
 0x2bf   :  { %v626_v10 = vpop.f32.mrf.mxu3 }
 0x2c0   :  { %v642_v32 = vsel %vm451_vm3, %v626_v10, -inf }
 0x2c7   :  { %v629_v11 = vpop.f32.mrf.mxu3 }
 0x2c8   :  { %v643_v19 = vsel %vm451_vm3, %v629_v11, -inf }
 0x2c9   :  { %v644_v39 = vmax.f32 %v639_v30, %v643_v19 }
 0x2cf   :  { %v631_v12 = vpop.f32.mrf.mxu3 }
 0x2d0   :  { %v645_v17 = vsel %vm451_vm3, %v631_v12, -inf }
 0x2d1   :  { %v646_v24 = vmax.f32 %v640_v18, %v645_v17 }
 0x2d3   :  { %v651_v42 = vmax.f32 %v644_v39, %v646_v24 }
 0x2d7   :  { %v634_v13 = vpop.f32.mrf.mxu3 }
 0x2d8   :  { %v647_v20 = vsel %vm451_vm3, %v634_v13, -inf }
 0x2d9   :  { %v648_v40 = vmax.f32 %v641_v31, %v647_v20 }
 0x2df   :  { %v636_v27 = vpop.f32.mrf.mxu3 }
 0x2e0   :  { %v649_v33 = vsel %vm451_vm3, %v636_v27, -inf }
 0x2e1   :  { %v650_v41 = vmax.f32 %v642_v32, %v649_v33 }
 0x2e3   :  { %v652_v43 = vmax.f32 %v648_v40, %v650_v41 }
 0x2e5   :  { %v653_v46 = vmax.f32 %v651_v42, %v652_v43 }
 0x2e7   :  { %v654_v47 = vrot.slane %v653_v46, 4  ;;  %v5083_v36 = vpop.f32.mrf.mxu1 }
 0x2e9   :  { %v655_v48 = vmax.f32 %v653_v46, %v654_v47 }
 0x2eb   :  { %v656_v50 = vrot.slane %v655_v48, 2 }
 0x2ed   :  { %v657_v29 = vmax.f32 %v655_v48, %v656_v50 }
 0x2ef   :  { %v658_v34 = vrot.slane %v657_v29, 1  ;;  %v5085_v53 = vpop.f32.mrf.mxu1 }
 0x2f1   :  { %v659_v54 = vmax.f32 %v657_v29, %v658_v34 }
 0x2f3   :  { %v660_v55 = vsub.f32 %v619_v3, %v659_v54  ;;  %v661_v56 = vsub.f32 %v621_v5, %v659_v54  ;;  %v662_v26 = vsub.f32 %v624_v7, %v659_v54  ;;  %v663_v21 = vsub.f32 %v626_v10, %v659_v54 }
 0x2f4   :  { %v664_v57 = vsub.f32 %v629_v11, %v659_v54  ;;  %v665_v49 = vsub.f32 %v631_v12, %v659_v54  ;;  %v666_v14 = vsub.f32 %v634_v13, %v659_v54  ;;  %v667_v0 = vsub.f32 %v636_v27, %v659_v54 }
 0x2f5   :  { %v668_v60 = vmul.f32 1.442695, %v660_v55  ;;  %v670_v25 = vmul.f32 1.442695, %v661_v56  ;;  %v672_v61 = vmul.f32 1.442695, %v662_v26 }
 0x2f6   :  { %v674_v62 = vmul.f32 1.442695, %v663_v21  ;;  %v676_v63 = vmul.f32 1.442695, %v664_v57  ;;  %v678_v4 = vmul.f32 1.442695, %v665_v49 }
 0x2f7   :  { %v5087_v28 = vpop.f32.mrf.mxu1  ;;  %4510 = vpow2.f32 %v668_v60  ;;  %v680_v3 = vmul.f32 1.442695, %v666_v14  ;;  %v682_v6 = vmul.f32 1.442695, %v667_v0  ;;  %v901_v60 = vsel %vm451_vm3, %v5085_v53, -inf }
 0x2f8   :  { %4512 = vpow2.f32 %v670_v25  ;;  %v900_v14 = vsel %vm451_vm3, %v5083_v36, -inf }
 0x2f9   :  { %4514 = vpow2.f32 %v672_v61 }
 0x2fa   :  { %4516 = vpow2.f32 %v674_v62 }
 0x2fb   :  { %4518 = vpow2.f32 %v676_v63  ;;  %v902_v63 = vsel %vm451_vm3, %v5087_v28, -inf }
 0x2fc   :  { %4520 = vpow2.f32 %v678_v4 }
 0x2fd   :  { %v4511_v37 = vpop.eup %4510  ;;  %4522 = vpow2.f32 %v680_v3 }
 0x2fe   :  { %v4513_v5 = vpop.eup %4512  ;;  %v684_v10 = vsel %vm451_vm3, %v4511_v37, 0.0  ;;  %4524 = vpow2.f32 %v682_v6 }
 0x2ff   :  { %v5089_v7 = vpop.f32.mrf.mxu1  ;;  %v4515_v11 = vpop.eup %4514  ;;  %v685_v12 = vsel %vm451_vm3, %v4513_v5, 0.0 }
 0x300   :  { %v4517_v13 = vpop.eup %4516  ;;  %v686_v17 = vadd.f32 %v685_v12, %v684_v10  ;;  %v687_v18 = vsel %vm451_vm3, %v4515_v11, 0.0  ;;  %v903_v0 = vsel %vm451_vm3, %v5089_v7, -inf }
 0x301   :  { %v4519_v19 = vpop.eup %4518  ;;  %v689_v24 = vsel %vm451_vm3, %v4517_v13, 0.0 }
 0x302   :  { %v688_v20 = vadd.f32 %v687_v18, %v686_v17  ;;  %v4521_v27 = vpop.eup %4520  ;;  %v691_v31 = vsel %vm451_vm3, %v4519_v19, 0.0 }
 0x303   :  { %v5096_v32 = vpop.eup %4522  ;;  %v693_v40 = vsel %vm451_vm3, %v4521_v27, 0.0 }
 0x304   :  { %v690_v30 = vadd.f32 %v689_v24, %v688_v20  ;;  %v4525_v41 = vpop.eup %4524  ;;  %v695_v43 = vsel %vm451_vm3, %v5096_v32, 0.0 }
 0x305   :  { %v697_v47 = vsel %vm451_vm3, %v4525_v41, 0.0 }
 0x306   :  { %v692_v39 = vadd.f32 %v691_v31, %v690_v30 }
 0x307   :  { %v5098_v33 = vpop.f32.mrf.mxu1 }
 0x308   :  { %v694_v42 = vadd.f32 %v693_v40, %v692_v39  ;;  %v904_v25 = vsel %vm451_vm3, %v5098_v33, -inf }
 0x309   :  { %v905_v6 = vmax.f32 %v900_v14, %v904_v25 }
 0x30a   :  { %v696_v46 = vadd.f32 %v695_v43, %v694_v42 }
 0x30c   :  { %v698_v48 = vadd.f32 %v697_v47, %v696_v46 }
 0x30e   :  { %v699_v29 = vrot.slane %v698_v48, 4 }
 0x30f   :  { %v5104_v50 = vpop.f32.mrf.mxu1 }
 0x310   :  { %v700_v34 = vadd.f32 %v699_v29, %v698_v48  ;;  %v906_v57 = vsel %vm451_vm3, %v5104_v50, -inf }
 0x311   :  { %v907_v49 = vmax.f32 %v901_v60, %v906_v57 }
 0x312   :  { %v701_v54 = vrot.slane %v700_v34, 2 }
 0x313   :  { %v912_v24 = vmax.f32 %v905_v6, %v907_v49 }
 0x314   :  { %v702_v55 = vadd.f32 %v701_v54, %v700_v34 }
 0x316   :  { %v703_v26 = vrot.slane %v702_v55, 1 }
 0x317   :  { %v5106_v56 = vpop.f32.mrf.mxu1 }
 0x318   :  { %v704_v21 = vadd.f32 %v703_v26, %v702_v55  ;;  %v908_v61 = vsel %vm451_vm3, %v5106_v56, -inf }
 0x319   :  { %v909_v10 = vmax.f32 %v902_v63, %v908_v61 }
 0x31a   :  { %4526 = vrcp.f32 %v704_v21 }
 0x31f   :  { %v5116_v62 = vpop.f32.mrf.mxu1 }
 0x320   :  { %v910_v4 = vsel %vm451_vm3, %v5116_v62, -inf  ;;  %v4527_v3 = vpop.eup %4526 }
 0x321   :  { %v911_v12 = vmax.f32 %v903_v0, %v910_v4  ;;  %v707_v17 = vmul.f32 %v4527_v3, %v4513_v5  ;;  %v706_v18 = vmul.f32 %v4527_v3, %v4511_v37  ;;  %v708_v20 = vmul.f32 %v4527_v3, %v4515_v11 }
 0x322   :  { %v711_v47 = vmul.f32 %v4527_v3, %v4521_v27  ;;  %v710_v5 = vmul.f32 %v4527_v3, %v4519_v19  ;;  %v709_v11 = vmul.f32 %v4527_v3, %v4517_v13  ;;  %v5133_v21 = vmul.f32 %v4527_v3, %v4525_v41 }
 0x323   :  { %v913_v30 = vmax.f32 %v909_v10, %v911_v12  ;;  %v717_v31 = vsel %vm451_vm3, %v707_v17, 0.0  ;;  %v714_v39 = vsel %vm451_vm3, %v706_v18, 0.0  ;;  %v754_v40 = vpack.c.bf16 %v707_v17, %v706_v18 }
 0x324   :  { %v720_v42 = vsel %vm451_vm3, %v708_v20, 0.0  ;;  %718 = vadd.xlane.f32.xlu1 %v717_v31  ;;  %715 = vadd.xlane.f32.xlu0 %v714_v39  ;;  %v729_v29 = vsel %vm451_vm3, %v711_v47, 0.0  ;;  %v726_v34 = vsel %vm451_vm3, %v710_v5, 0.0  ;;  %v723_v55 = vsel %vm451_vm3, %v709_v11, 0.0 }
 0x325   :  { %v914_v43 = vmax.f32 %v912_v24, %v913_v30  ;;  %721 = vadd.xlane.f32.xlu2 %v720_v42  ;;  %3843 = vmatmul.msk.bf16.vlgmr.msrb.gmra.mxu3 %vm451_vm3, %v754_v40  ;;  %v712_v27 = vmul.f32 %v4527_v3, %v5096_v32  ;;  %v735_v25 = vsel %vm451_vm3, %v5133_v21, 0.0  ;;  %v755_v61 = vpack.c.bf16 %v709_v11, %v708_v20 }
 0x326   :  { %v756_v31 = vpack.c.bf16 %v711_v47, %v710_v5 }
 0x327   :  { %v915_v46 = vrot.slane %v914_v43, 4  ;;  %v732_v14 = vsel %vm451_vm3, %v712_v27, 0.0 }
 0x329   :  { %v916_v37 = vmax.f32 %v914_v43, %v915_v46 }
 0x32b   :  { %v917_v48 = vrot.slane %v916_v37, 2 }
 0x32c   :  { %730 = vadd.xlane.f32.xlu1 %v729_v29  ;;  %727 = vadd.xlane.f32.xlu0 %v726_v34 }
 0x32d   :  { %v918_v54 = vmax.f32 %v916_v37, %v917_v48  ;;  %724 = vadd.xlane.f32.xlu2 %v723_v55 }
 0x32f   :  { %v919_v26 = vrot.slane %v918_v54, 1 }
 0x331   :  { %v920_v57 = vmax.f32 %v918_v54, %v919_v26 }
 0x333   :  { %v921_v19 = vsub.f32 %v5083_v36, %v920_v57  ;;  %v922_v13 = vsub.f32 %v5085_v53, %v920_v57  ;;  %v923_v60 = vsub.f32 %v5087_v28, %v920_v57  ;;  %v924_v49 = vsub.f32 %v5089_v7, %v920_v57 }
 0x334   :  { %736 = vadd.xlane.f32.xlu0 %v735_v25  ;;  %v925_v41 = vsub.f32 %v5098_v33, %v920_v57  ;;  %v926_v53 = vsub.f32 %v5104_v50, %v920_v57  ;;  %v927_v32 = vsub.f32 %v5106_v56, %v920_v57  ;;  %v928_v7 = vsub.f32 %v5116_v62, %v920_v57 }
 0x335   :  { %v929_v63 = vmul.f32 1.442695, %v921_v19  ;;  %v931_v0 = vmul.f32 1.442695, %v922_v13  ;;  %733 = vadd.xlane.f32.xlu2 %v732_v14  ;;  %3844 = vmatmul.msk.bf16.gmra.mxu3 %vm451_vm3, %v755_v61  ;;  %v933_v36 = vmul.f32 1.442695, %v923_v60  ;;  %v757_v19 = vpack.c.bf16 %v5133_v21, %v712_v27 }
 0x336   :  { %v935_v28 = vmul.f32 1.442695, %v924_v49  ;;  %v937_v4 = vmul.f32 1.442695, %v925_v41  ;;  %v939_v3 = vmul.f32 1.442695, %v926_v53 }
 0x337   :  { %4528 = vpow2.f32 %v929_v63  ;;  %v941_v33 = vmul.f32 1.442695, %v927_v32  ;;  %v943_v12 = vmul.f32 1.442695, %v928_v7 }
 0x338   :  { %4530 = vpow2.f32 %v931_v0 }
 0x339   :  { %4532 = vpow2.f32 %v933_v36 }
 0x33a   :  { %4534 = vpow2.f32 %v935_v28 }
 0x33b   :  { %4536 = vpow2.f32 %v937_v4 }
 0x33c   :  { %4538 = vpow2.f32 %v939_v3 }
 0x33d   :  { %v4529_v6 = vpop.eup %4528  ;;  %4540 = vpow2.f32 %v941_v33 }
 0x33e   :  { %v4531_v10 = vpop.eup %4530  ;;  %v945_v17 = vsel %vm451_vm3, %v4529_v6, 0.0  ;;  %4542 = vpow2.f32 %v943_v12 }
 0x33f   :  { %v4533_v50 = vpop.eup %4532  ;;  %v946_v18 = vsel %vm451_vm3, %v4531_v10, 0.0 }
 0x340   :  { %v4535_v20 = vpop.eup %4534  ;;  %v947_v56 = vadd.f32 %v946_v18, %v945_v17  ;;  %v948_v24 = vsel %vm451_vm3, %v4533_v50, 0.0  ;;  %v4378_v18 = vld [vmem:[#allocation7 + $0x10] sm:$0xff] }
 0x341   :  { %v4537_v30 = vpop.eup %4536  ;;  %v950_v39 = vsel %vm451_vm3, %v4535_v20, 0.0 }
 0x342   :  { %v949_v62 = vadd.f32 %v948_v24, %v947_v56  ;;  %v4539_v40 = vpop.eup %4538  ;;  %v952_v43 = vsel %vm451_vm3, %v4537_v30, 0.0  ;;  %v4377_v56 = vld [vmem:[#allocation7 + $0x8] sm:$0xff]  ;;  %v4376_v24 = vld [vmem:[#allocation7] sm:$0xff] }
 0x343   :  { %v4541_v46 = vpop.eup %4540  ;;  %v954_v11 = vsel %vm451_vm3, %v4539_v40, 0.0 }
 0x344   :  { %v951_v42 = vadd.f32 %v950_v39, %v949_v62  ;;  %v4543_v48 = vpop.eup %4542  ;;  %v956_v34 = vsel %vm451_vm3, %v4541_v46, 0.0 }
 0x345   :  { %3845 = vmatmul.msk.bf16.gmra.mxu3 %vm451_vm3, %v756_v31  ;;  %v958_v55 = vsel %vm451_vm3, %v4543_v48, 0.0 }
 0x346   :  { %v953_v37 = vadd.f32 %v952_v43, %v951_v42 }
 0x348   :  { %v955_v29 = vadd.f32 %v954_v11, %v953_v37 }
 0x34a   :  { %v957_v54 = vadd.f32 %v956_v34, %v955_v29 }
 0x34c   :  { %v959_v47 = vadd.f32 %v958_v55, %v957_v54 }
 0x34e   :  { %v960_v5 = vrot.slane %v959_v47, 4 }
 0x350   :  { %v961_v26 = vadd.f32 %v960_v5, %v959_v47 }
 0x352   :  { %v962_v57 = vrot.slane %v961_v26, 2 }
 0x354   :  { %v963_v13 = vadd.f32 %v962_v57, %v961_v26 }
 0x355   :  { %3846 = vmatmul.msk.bf16.gmra.mxu3 %vm451_vm3, %v757_v19 }
 0x356   :  { %v964_v60 = vrot.slane %v963_v13, 1 }
 0x358   :  { %v965_v25 = vadd.f32 %v964_v60, %v963_v13 }
 0x35a   :  { %4544 = vrcp.f32 %v965_v25 }
 0x360   :  { %v4545_v61 = vpop.eup %4544 }
 0x361   :  { %v969_v49 = vmul.f32 %v4545_v61, %v4533_v50  ;;  %v968_v14 = vmul.f32 %v4545_v61, %v4531_v10  ;;  %v967_v41 = vmul.f32 %v4545_v61, %v4529_v6  ;;  %v972_v21 = vmul.f32 %v4545_v61, %v4539_v40  ;;  %v4379_v50 = vld [vmem:[#allocation7 + $0x18] sm:$0xff] }
 0x362   :  { %v971_v27 = vmul.f32 %v4545_v61, %v4537_v30  ;;  %v970_v28 = vmul.f32 %v4545_v61, %v4535_v20  ;;  %v974_v3 = vmul.f32 %v4545_v61, %v4543_v48  ;;  %v973_v33 = vmul.f32 %v4545_v61, %v4541_v46  ;;  %1179 = vmatpush.bf16.msra.mxu0 %v4379_v50 }
 0x363   :  { %v981_v63 = vsel %vm451_vm3, %v969_v49, 0.0  ;;  %v978_v0 = vsel %vm451_vm3, %v968_v14, 0.0  ;;  %v975_v36 = vsel %vm451_vm3, %v967_v41, 0.0  ;;  %v1015_v53 = vpack.c.bf16 %v968_v14, %v967_v41 }
 0x364   :  { %982 = vadd.xlane.f32.xlu0 %v981_v63  ;;  %979 = vadd.xlane.f32.xlu2 %v978_v0  ;;  %v990_v32 = vsel %vm451_vm3, %v972_v21, 0.0  ;;  %v987_v4 = vsel %vm451_vm3, %v971_v27, 0.0  ;;  %v984_v7 = vsel %vm451_vm3, %v970_v28, 0.0  ;;  %v996_v6 = vsel %vm451_vm3, %v974_v3, 0.0 }
 0x365   :  { %976 = vadd.xlane.f32.xlu1 %v975_v36  ;;  %3851 = vmatmul.msk.bf16.vlgmr.msra.gmra.mxu2 %vm451_vm3, %v1015_v53  ;;  %v1016_v10 = vpack.c.bf16 %v970_v28, %v969_v49  ;;  %v993_v12 = vsel %vm451_vm3, %v973_v33, 0.0  ;;  %v1017_v17 = vpack.c.bf16 %v972_v21, %v971_v27  ;;  %v1018_v20 = vpack.c.bf16 %v974_v3, %v973_v33 }
 0x366   :  { %1180 = vmatpush.bf16.msra.mxu0 %v4378_v18 }
 0x36a   :  { %1181 = vmatpush.bf16.msra.mxu0 %v4377_v56 }
 0x36c   :  { %991 = vadd.xlane.f32.xlu0 %v990_v32  ;;  %988 = vadd.xlane.f32.xlu2 %v987_v4 }
 0x36d   :  { %985 = vadd.xlane.f32.xlu1 %v984_v7 }
 0x36e   :  { %1182 = vmatpush.bf16.msra.mxu0 %v4376_v24 }
 0x374   :  { %997 = vadd.xlane.f32.xlu2 %v996_v6 }
 0x375   :  { %994 = vadd.xlane.f32.xlu1 %v993_v12  ;;  %3852 = vmatmul.msk.bf16.gmra.mxu2 %vm451_vm3, %v1016_v10 }
 0x385   :  { %3853 = vmatmul.msk.bf16.gmra.mxu2 %vm451_vm3, %v1017_v17 }
 0x395   :  { %3854 = vmatmul.msk.bf16.gmra.mxu2 %vm451_vm3, %v1018_v20 }
 0x397   :  { %v716_v30 = vpop.xlane.xlu0 %715  ;;  %v719_v62 = vpop.xlane.xlu1 %718 }
 0x398   :  { %v738_v31 = vadd.f32 1e-09, %v716_v30  ;;  %v739_v39 = vadd.f32 1e-09, %v719_v62  ;;  %v722_v42 = vpop.xlane.xlu2 %721 }
 0x399   :  { %v740_v55 = vadd.f32 1e-09, %v722_v42 }
 0x39a   :  { %4546 = vrcp.f32 %v738_v31 }
 0x39b   :  { %4548 = vrcp.f32 %v739_v39 }
 0x39c   :  { %4550 = vrcp.f32 %v740_v55 }
 0x39f   :  { %v728_v25 = vpop.xlane.xlu0 %727  ;;  %v731_v49 = vpop.xlane.xlu1 %730 }
 0x3a0   :  { %v4547_v43 = vpop.eup %4546  ;;  %v725_v29 = vpop.xlane.xlu2 %724  ;;  %v742_v63 = vadd.f32 1e-09, %v728_v25  ;;  %v743_v36 = vadd.f32 1e-09, %v731_v49 }
 0x3a1   :  { %v4549_v37 = vpop.eup %4548  ;;  %v741_v5 = vadd.f32 1e-09, %v725_v29 }
 0x3a2   :  { %v4551_v57 = vpop.eup %4550 }
 0x3a3   :  { %4552 = vrcp.f32 %v741_v5 }
 0x3a4   :  { %4554 = vrcp.f32 %v742_v63 }
 0x3a5   :  { %4556 = vrcp.f32 %v743_v36 }
 0x3a7   :  { %v737_v3 = vpop.xlane.xlu0 %736 }
 0x3a8   :  { %v811_v40 = vpop.f32.mrf.mxu3  ;;  %v734_v4 = vpop.xlane.xlu2 %733  ;;  %v745_v17 = vadd.f32 1e-09, %v737_v3 }
 0x3a9   :  { %v831_v46 = vmul.f32 %v4547_v43, %v811_v40  ;;  %v4553_v13 = vpop.eup %4552  ;;  %v744_v10 = vadd.f32 1e-09, %v734_v4 }
 0x3aa   :  { %v4555_v21 = vpop.eup %4554 }
 0x3ab   :  { %v1100_v34 = vsub.f32 %v4959_v35, %v831_v46  ;;  %v4557_v28 = vpop.eup %4556  ;;  %4558 = vrcp.f32 %v744_v10 }
 0x3ac   :  { %4560 = vrcp.f32 %v745_v17 }
 0x3b0   :  { %v813_v11 = vpop.f32.mrf.mxu3 }
 0x3b1   :  { %v832_v48 = vmul.f32 %v4549_v37, %v813_v11  ;;  %v4559_v18 = vpop.eup %4558 }
 0x3b2   :  { %v4561_v56 = vpop.eup %4560 }
 0x3b3   :  { %v1101_v54 = vsub.f32 %v4961_v38, %v832_v48 }
 0x3b5   :  { %v1116_v47 = vpack.c.bf16 %v1101_v54, %v1100_v34 }
 0x3b7   :  { %3871 = vmatmul.msk.bf16.vlgmr.msra.gmra.mxu0 %vm451_vm3, %v1116_v47 }
 0x3b8   :  { %v816_v26 = vpop.f32.mrf.mxu3 }
 0x3b9   :  { %v833_v19 = vmul.f32 %v4551_v57, %v816_v26 }
 0x3bb   :  { %v1102_v14 = vsub.f32 %v4966_v44, %v833_v19 }
 0x3c0   :  { %v818_v60 = vpop.f32.mrf.mxu3 }
 0x3c1   :  { %v834_v61 = vmul.f32 %v4553_v13, %v818_v60 }
 0x3c3   :  { %v1103_v41 = vsub.f32 %v4968_v45, %v834_v61 }
 0x3c5   :  { %v1117_v0 = vpack.c.bf16 %v1103_v41, %v1102_v14 }
 0x3c7   :  { %3872 = vmatmul.msk.bf16.gmra.mxu0 %vm451_vm3, %v1117_v0 }
 0x3c8   :  { %v821_v53 = vpop.f32.mrf.mxu3 }
 0x3c9   :  { %v835_v27 = vmul.f32 %v4555_v21, %v821_v53 }
 0x3cb   :  { %v1104_v33 = vsub.f32 %v4973_v51, %v835_v27 }
 0x3d0   :  { %v823_v32 = vpop.f32.mrf.mxu3 }
 0x3d1   :  { %v836_v7 = vmul.f32 %v4557_v28, %v823_v32 }
 0x3d3   :  { %v1105_v6 = vsub.f32 %v4975_v52, %v836_v7 }
 0x3d5   :  { %v1118_v12 = vpack.c.bf16 %v1105_v6, %v1104_v33 }
 0x3d7   :  { %3873 = vmatmul.msk.bf16.gmra.mxu0 %vm451_vm3, %v1118_v12  ;;  %v980_v31 = vpop.xlane.xlu2 %979  ;;  %v983_v54 = vpop.xlane.xlu0 %982 }
 0x3d8   :  { %v826_v50 = vpop.f32.mrf.mxu3  ;;  %v977_v30 = vpop.xlane.xlu1 %976  ;;  %v1000_v46 = vadd.f32 1e-09, %v980_v31  ;;  %v1001_v57 = vadd.f32 1e-09, %v983_v54  ;;  %v4386_v31 = vld [vmem:[#allocation9 + $0x34] sm:$0xf] }
 0x3d9   :  { %v837_v20 = vmul.f32 %v4559_v18, %v826_v50  ;;  %v999_v42 = vadd.f32 1e-09, %v977_v30  ;;  %v3905_v30 = vld [vmem:[#allocation9 + $0x30] sm:$0xf] }
 0x3db   :  { %v1106_v39 = vsub.f32 %v4980_v58, %v837_v20  ;;  %4562 = vrcp.f32 %v999_v42 }
 0x3dc   :  { %4564 = vrcp.f32 %v1000_v46  ;;  %v4385_v46 = vld [vmem:[#allocation9 + $0x24] sm:$0xf0] }
 0x3dd   :  { %4566 = vrcp.f32 %v1001_v57  ;;  %v4382_v57 = vld [vmem:[#allocation9 + $0x14] sm:$0xf] }
 0x3df   :  { %v989_v41 = vpop.xlane.xlu2 %988  ;;  %v992_v0 = vpop.xlane.xlu0 %991 }
 0x3e0   :  { %v828_v24 = vpop.f32.mrf.mxu3  ;;  %v986_v47 = vpop.xlane.xlu1 %985  ;;  %v1003_v21 = vadd.f32 1e-09, %v989_v41  ;;  %v1004_v28 = vadd.f32 1e-09, %v992_v0  ;;  %v4381_v41 = vld [vmem:[#allocation9 + $0x4] sm:$0xf0] }
 0x3e1   :  { %v838_v62 = vmul.f32 %v4561_v56, %v828_v24  ;;  %v4563_v11 = vpop.eup %4562  ;;  %v1002_v13 = vadd.f32 1e-09, %v986_v47 }
 0x3e2   :  { %v4565_v29 = vpop.eup %4564 }
 0x3e3   :  { %v1107_v40 = vsub.f32 %v4982_v59, %v838_v62  ;;  %4568 = vrcp.f32 %v1002_v13  ;;  %v4567_v25 = vpop.eup %4566  ;;  %v4387_v62 = vld [vmem:[#allocation9 + $0x34] sm:$0xf0] }
 0x3e4   :  { %4570 = vrcp.f32 %v1003_v21 }
 0x3e5   :  { %v1119_v43 = vpack.c.bf16 %v1107_v40, %v1106_v39  ;;  %4572 = vrcp.f32 %v1004_v28  ;;  %v3906_v39 = vor.u32 %v4387_v62, %v3905_v30  ;;  %v3907_v40 = vld [vmem:[#allocation9 + $0x38] sm:$0xf0]  ;;  %v5198_v28 = vld [vmem:[%s6022_s9 + $0x3] ss:$0 sm:$0xff] }
 0x3e6   :  { %v3910_v42 = vor.u32 %v4386_v31, %v3907_v40  ;;  %v4395_v40 = vld [vmem:[#allocation10 + $0x34] sm:$0xf0] }
 0x3e7   :  { %3874 = vmatmul.msk.bf16.gmra.mxu0 %vm451_vm3, %v1119_v43  ;;  %v998_v12 = vpop.xlane.xlu2 %997  ;;  %1340 = vmatpush.bf16.msra.mxu3 %v3906_v39  ;;  %v3897_v43 = vld [vmem:[#allocation9 + $0x20] sm:$0xf]  ;;  %v3953_v39 = vld [vmem:[#allocation10 + $0x30] sm:$0xf] }
 0x3e8   :  { %v1072_v37 = vpop.f32.mrf.mxu2  ;;  %v995_v6 = vpop.xlane.xlu1 %994  ;;  %v1006_v56 = vadd.f32 1e-09, %v998_v12  ;;  %1389 = vmatpush.bf16.msra.mxu1 %v3910_v42 }
 0x3e9   :  { %v1092_v48 = vmul.f32 %v4563_v11, %v1072_v37  ;;  %v4569_v49 = vpop.eup %4568  ;;  %v1005_v18 = vadd.f32 1e-09, %v995_v6  ;;  %v4384_v37 = vld [vmem:[#allocation9 + $0x24] sm:$0xf]  ;;  %v3898_v11 = vor.u32 %v4385_v46, %v3897_v43  ;;  %v5213_v43 = vor.u32 %v4395_v40, %v3953_v39 }
 0x3ea   :  { %v4571_v4 = vpop.eup %4570 }
 0x3eb   :  { %v1108_v5 = vsub.f32 %v4987_v1, %v1092_v48  ;;  %v4573_v3 = vpop.eup %4572  ;;  %4574 = vrcp.f32 %v1005_v18  ;;  %v3899_v48 = vld [vmem:[#allocation9 + $0x28] sm:$0xf0]  ;;  %1341 = vmatpush.bf16.msra.mxu3 %v3898_v11  ;;  %1517 = vmatpush.bf16.msrb.mxu2 %v5213_v43  ;;  %v4393_v11 = vld [vmem:[#allocation10 + $0x24] sm:$0xf0] }
 0x3ec   :  { %4576 = vrcp.f32 %v1006_v56 }
 0x3f0   :  { %v1074_v34 = vpop.f32.mrf.mxu2 }
 0x3f1   :  { %v1093_v55 = vmul.f32 %v4565_v29, %v1074_v34  ;;  %v3902_v29 = vor.u32 %v4384_v37, %v3899_v48  ;;  %v4575_v34 = vpop.eup %4574 }
 0x3f3   :  { %v1109_v26 = vsub.f32 %v4989_v2, %v1093_v55  ;;  %v4577_v55 = vpop.eup %4576  ;;  %1390 = vmatpush.bf16.msra.mxu1 %v3902_v29 }
 0x3f5   :  { %v1120_v19 = vpack.c.bf16 %v1109_v26, %v1108_v5  ;;  %v3889_v5 = vld [vmem:[#allocation9 + $0x10] sm:$0xf]  ;;  %v4383_v26 = vld [vmem:[#allocation9 + $0x14] sm:$0xf0] }
 0x3f6   :  { %v3890_v13 = vor.u32 %v4383_v26, %v3889_v5 }
 0x3f7   :  { %3875 = vmatmul.msk.bf16.gmra.mxu0 %vm451_vm3, %v1120_v19 }
 0x3f8   :  { %v1077_v60 = vpop.f32.mrf.mxu2  ;;  %1342 = vmatpush.bf16.msra.mxu3 %v3890_v13 }
 0x3f9   :  { %v1094_v61 = vmul.f32 %v4567_v25, %v1077_v60  ;;  %v3891_v60 = vld [vmem:[#allocation9 + $0x18] sm:$0xf0] }
 0x3fa   :  { %v3894_v25 = vor.u32 %v4382_v57, %v3891_v60  ;;  %v4394_v60 = vld [vmem:[#allocation10 + $0x34] sm:$0xf] }
 0x3fb   :  { %v1110_v36 = vsub.f32 %v4994_v8, %v1094_v61 }
 0x3fc   :  { %1391 = vmatpush.bf16.msra.mxu1 %v3894_v25  ;;  %v3955_v25 = vld [vmem:[#allocation10 + $0x38] sm:$0xf0] }
 0x400   :  { %v1079_v14 = vpop.f32.mrf.mxu2 }
 0x401   :  { %v1095_v63 = vmul.f32 %v4569_v49, %v1079_v14  ;;  %v3881_v14 = vld [vmem:[#allocation9] sm:$0xf] }
 0x402   :  { %v3882_v0 = vor.u32 %v4381_v41, %v3881_v14 }
 0x403   :  { %v1111_v53 = vsub.f32 %v4996_v9, %v1095_v63  ;;  %v4380_v63 = vld [vmem:[#allocation9 + $0x4] sm:$0xf] }
 0x404   :  { %1343 = vmatpush.bf16.msra.mxu3 %v3882_v0 }
 0x405   :  { %v1121_v27 = vpack.c.bf16 %v1111_v53, %v1110_v36  ;;  %v3883_v36 = vld [vmem:[#allocation9 + $0x8] sm:$0xf0] }
 0x406   :  { %v3886_v21 = vor.u32 %v4380_v63, %v3883_v36  ;;  %v4392_v36 = vld [vmem:[#allocation10 + $0x24] sm:$0xf] }
 0x407   :  { %3876 = vmatmul.msk.bf16.gmra.mxu0 %vm451_vm3, %v1121_v27 }
 0x408   :  { %v1082_v32 = vpop.f32.mrf.mxu2  ;;  %1392 = vmatpush.bf16.msra.mxu1 %v3886_v21 }
 0x409   :  { %v1096_v7 = vmul.f32 %v4571_v4, %v1082_v32 }
 0x40b   :  { %v1112_v17 = vsub.f32 %v5001_v15, %v1096_v7 }
 0x410   :  { %v1084_v33 = vpop.f32.mrf.mxu2 }
 0x411   :  { %v1097_v10 = vmul.f32 %v4573_v3, %v1084_v33 }
 0x413   :  { %v1113_v50 = vsub.f32 %v5003_v16, %v1097_v10 }
 0x415   :  { %v1122_v20 = vpack.c.bf16 %v1113_v50, %v1112_v17 }
 0x417   :  { %3877 = vmatmul.msk.bf16.gmra.mxu0 %vm451_vm3, %v1122_v20 }
 0x418   :  { %v1087_v24 = vpop.f32.mrf.mxu2 }
 0x419   :  { %v1098_v54 = vmul.f32 %v4575_v34, %v1087_v24 }
 0x41b   :  { %v1114_v61 = vsub.f32 %v5008_v22, %v1098_v54 }
 0x420   :  { %v1089_v47 = vpop.f32.mrf.mxu2 }
 0x421   :  { %v1099_v19 = vmul.f32 %v4577_v55, %v1089_v47  ;;  %v3937_v55 = vld [vmem:[#allocation10 + $0x10] sm:$0xf]  ;;  %v4391_v47 = vld [vmem:[#allocation10 + $0x14] sm:$0xf0] }
 0x422   :  { %v5222_v26 = vor.u32 %v4391_v47, %v3937_v55 }
 0x423   :  { %v1115_v49 = vsub.f32 %v5010_v23, %v1099_v19  ;;  %v3929_v19 = vld [vmem:[#allocation10] sm:$0xf] }
 0x425   :  { %v1123_v53 = vpack.c.bf16 %v1115_v49, %v1114_v61  ;;  %v5231_v49 = vor.u32 %v4394_v60, %v3955_v25 }
 0x427   :  { %3878 = vmatmul.msk.bf16.gmra.mxu0 %vm451_vm3, %v1123_v53  ;;  %v3947_v53 = vld [vmem:[#allocation10 + $0x28] sm:$0xf0] }
 0x428   :  { %v5237_v21 = vor.u32 %v4392_v36, %v3947_v53 }
 0x434   :  { %v1184_v27 = vpop.f32.mrf.mxu0 }
 0x435   :  { %v1185_v32 = vadd.f32 %v5198_v28, %v1184_v27 }
 0x437   :  { %v1224_v7 = vmax.f32 %v1185_v32, 0.0 }
 0x439   :  { %v1240_v6 = vadd.f32 %v1224_v7, %v4959_v35 }
 0x43c   :  { %v1186_v4 = vpop.f32.mrf.mxu0 }
 0x43d   :  { %v1187_v3 = vadd.f32 %v5198_v28, %v1186_v4 }
 0x43f   :  { %v1225_v33 = vmax.f32 %v1187_v3, 0.0 }
 0x441   :  { %v1241_v10 = vadd.f32 %v1225_v33, %v4961_v38 }
 0x443   :  { %v1256_v12 = vpack.c.bf16 %v1241_v10, %v1240_v6  ;;  %v1444_v27 = vsel %vm451_vm3, %v1241_v10, -inf  ;;  %v3939_v10 = vld [vmem:[#allocation10 + $0x18] sm:$0xf0] }
 0x444   :  { %v1189_v17 = vpop.f32.mrf.mxu0 }
 0x445   :  { %3911 = vmatmul.msk.bf16.vlgmr.msra.gmra.mxu3 %vm451_vm3, %v1256_v12  ;;  %3919 = vmatmul.msk.bf16.vlgmr.msra.gmra.mxu1 %vm451_vm3, %v1256_v12  ;;  %v1190_v50 = vadd.f32 %v5198_v28, %v1189_v17 }
 0x447   :  { %v1226_v20 = vmax.f32 %v1190_v50, 0.0 }
 0x449   :  { %v1242_v30 = vadd.f32 %v1226_v20, %v4966_v44 }
 0x44b   :  { %v1445_v3 = vsel %vm451_vm3, %v1242_v30, -inf }
 0x44c   :  { %v1191_v18 = vpop.f32.mrf.mxu0 }
 0x44d   :  { %v1192_v56 = vadd.f32 %v5198_v28, %v1191_v18  ;;  %v4390_v18 = vld [vmem:[#allocation10 + $0x14] sm:$0xf] }
 0x44f   :  { %v1227_v24 = vmax.f32 %v1192_v56, 0.0 }
 0x451   :  { %v1243_v62 = vadd.f32 %v1227_v24, %v4968_v45  ;;  %v3945_v45 = vld [vmem:[#allocation10 + $0x20] sm:$0xf] }
 0x452   :  { %v5217_v48 = vor.u32 %v4393_v11, %v3945_v45 }
 0x453   :  { %v1257_v35 = vpack.c.bf16 %v1243_v62, %v1242_v30  ;;  %v1446_v12 = vsel %vm451_vm3, %v1243_v62, -inf  ;;  %v4388_v30 = vld [vmem:[#allocation10 + $0x4] sm:$0xf] }
 0x454   :  { %v1194_v31 = vpop.f32.mrf.mxu0  ;;  %1518 = vmatpush.bf16.msrb.mxu2 %v5217_v48 }
 0x455   :  { %3912 = vmatmul.msk.bf16.gmra.mxu3 %vm451_vm3, %v1257_v35  ;;  %3920 = vmatmul.msk.bf16.gmra.mxu1 %vm451_vm3, %v1257_v35  ;;  %v1195_v38 = vadd.f32 %v5198_v28, %v1194_v31  ;;  %v3942_v31 = vor.u32 %v4390_v18, %v3939_v10 }
 0x457   :  { %v1228_v46 = vmax.f32 %v1195_v38, 0.0  ;;  %v3931_v38 = vld [vmem:[#allocation10 + $0x8] sm:$0xf0] }
 0x458   :  { %1519 = vmatpush.bf16.msrb.mxu2 %v5222_v26  ;;  %v3934_v39 = vor.u32 %v4388_v30, %v3931_v38 }
 0x459   :  { %v1244_v29 = vadd.f32 %v1228_v46, %v4973_v51  ;;  %v4389_v51 = vld [vmem:[#allocation10 + $0x4] sm:$0xf0] }
 0x45a   :  { %v5228_v13 = vor.u32 %v4389_v51, %v3929_v19 }
 0x45b   :  { %v1447_v32 = vsel %vm451_vm3, %v1244_v29, -inf }
 0x45c   :  { %v1196_v42 = vpop.f32.mrf.mxu0  ;;  %1520 = vmatpush.bf16.msrb.mxu2 %v5228_v13 }
 0x45d   :  { %v1197_v37 = vadd.f32 %v5198_v28, %v1196_v42 }
 0x45f   :  { %v1229_v44 = vmax.f32 %v1197_v37, 0.0 }
 0x460   :  { %1530 = vmatpush.bf16.msra.mxu2 %v5231_v49 }
 0x461   :  { %v1245_v34 = vadd.f32 %v1229_v44, %v4975_v52 }
 0x463   :  { %v1258_v54 = vpack.c.bf16 %v1245_v34, %v1244_v29  ;;  %v1449_v63 = vsel %vm451_vm3, %v1245_v34, -inf }
 0x464   :  { %v1199_v5 = vpop.f32.mrf.mxu0  ;;  %v1450_v33 = vmax.f32 %v1444_v27, %v1449_v63  ;;  %1531 = vmatpush.bf16.msra.mxu2 %v5237_v21 }
 0x465   :  { %v1200_v57 = vadd.f32 %v5198_v28, %v1199_v5  ;;  %3913 = vmatmul.msk.bf16.gmra.mxu3 %vm451_vm3, %v1258_v54  ;;  %3921 = vmatmul.msk.bf16.gmra.mxu1 %vm451_vm3, %v1258_v54 }
 0x467   :  { %v1230_v52 = vmax.f32 %v1200_v57, 0.0 }
 0x468   :  { %1532 = vmatpush.bf16.msra.mxu2 %v3942_v31 }
 0x469   :  { %v1246_v14 = vadd.f32 %v1230_v52, %v4980_v58  ;;  %v1443_v58 = vsel %vm451_vm3, %v1240_v6, -inf }
 0x46a   :  { %v1448_v20 = vmax.f32 %v1443_v58, %v1447_v32 }
 0x46b   :  { %v1451_v4 = vsel %vm451_vm3, %v1246_v14, -inf }
 0x46c   :  { %v1201_v61 = vpop.f32.mrf.mxu0  ;;  %v1452_v56 = vmax.f32 %v1445_v3, %v1451_v4  ;;  %1533 = vmatpush.bf16.msra.mxu2 %v3934_v39 }
 0x46d   :  { %v1202_v41 = vadd.f32 %v5198_v28, %v1201_v61 }
 0x46f   :  { %v1231_v0 = vmax.f32 %v1202_v41, 0.0 }
 0x471   :  { %v1247_v7 = vadd.f32 %v1231_v0, %v4982_v59  ;;  %v1455_v59 = vmax.f32 %v1448_v20, %v1450_v33 }
 0x473   :  { %v1453_v17 = vsel %vm451_vm3, %v1247_v7, -inf  ;;  %v1259_v50 = vpack.c.bf16 %v1247_v7, %v1246_v14 }
 0x474   :  { %v1454_v24 = vmax.f32 %v1446_v12, %v1453_v17  ;;  %v1204_v35 = vpop.f32.mrf.mxu0 }
 0x475   :  { %3914 = vmatmul.msk.bf16.gmra.mxu3 %vm451_vm3, %v1259_v50  ;;  %3922 = vmatmul.msk.bf16.gmra.mxu1 %vm451_vm3, %v1259_v50  ;;  %v1205_v40 = vadd.f32 %v5198_v28, %v1204_v35 }
 0x476   :  { %v1456_v6 = vmax.f32 %v1452_v56, %v1454_v24 }
 0x477   :  { %v1232_v44 = vmax.f32 %v1205_v40, 0.0 }
 0x478   :  { %v1457_v62 = vmax.f32 %v1455_v59, %v1456_v6 }
 0x479   :  { %v1248_v54 = vadd.f32 %v1232_v44, %v4987_v1 }
 0x47a   :  { %v1458_v42 = vrot.slane %v1457_v62, 4 }
 0x47b   :  { %v1573_v12 = vsel %vm451_vm3, %v1248_v54, -inf }
 0x47c   :  { %v1459_v46 = vmax.f32 %v1457_v62, %v1458_v42  ;;  %v1206_v37 = vpop.f32.mrf.mxu0 }
 0x47d   :  { %v1207_v45 = vadd.f32 %v5198_v28, %v1206_v37 }
 0x47e   :  { %v1460_v11 = vrot.slane %v1459_v46, 2 }
 0x47f   :  { %v1233_v29 = vmax.f32 %v1207_v45, 0.0 }
 0x480   :  { %v1461_v34 = vmax.f32 %v1459_v46, %v1460_v11 }
 0x481   :  { %v1249_v55 = vadd.f32 %v1233_v29, %v4989_v2 }
 0x482   :  { %v1462_v47 = vrot.slane %v1461_v34, 1 }
 0x483   :  { %v1260_v5 = vpack.c.bf16 %v1249_v55, %v1248_v54 }
 0x484   :  { %v1463_v57 = vmax.f32 %v1461_v34, %v1462_v47  ;;  %v1209_v19 = vpop.f32.mrf.mxu0 }
 0x485   :  { %3915 = vmatmul.msk.bf16.gmra.mxu3 %vm451_vm3, %v1260_v5  ;;  %3923 = vmatmul.msk.bf16.gmra.mxu1 %vm451_vm3, %v1260_v5  ;;  %v1210_v52 = vadd.f32 %v5198_v28, %v1209_v19  ;;  %v5301_v19 = vld [vmem:[%s6022_s9 + $0x4] sm:$0x3] }
 0x486   :  { %v1464_v51 = vpack.c.bf16 %v1463_v57, %v1463_v57 }
 0x487   :  { %v1234_v25 = vmax.f32 %v1210_v52, 0.0  ;;  %v1506_v52 = vperm.slane %v5301_v19, 0 }
 0x488   :  { %3959 = vmatmul.msk.bf16.vlgmr.msrb.gmra.mxu2 %vm451_vm3, %v1464_v51 }
 0x489   :  { %1602 = vmatpush.bf16.msrb.mxu2 %v5213_v43  ;;  %v1250_v61 = vadd.f32 %v1234_v25, %v4994_v8 }
 0x48b   :  { %v1575_v50 = vsel %vm451_vm3, %v1250_v61, -inf }
 0x48c   :  { %v1211_v60 = vpop.f32.mrf.mxu0 }
 0x48d   :  { %v1212_v1 = vadd.f32 %v5198_v28, %v1211_v60  ;;  %1603 = vmatpush.bf16.msrb.mxu2 %v5217_v48 }
 0x48f   :  { %v1235_v2 = vmax.f32 %v1212_v1, 0.0 }
 0x491   :  { %v1251_v14 = vadd.f32 %v1235_v2, %v4996_v9  ;;  %1604 = vmatpush.bf16.msrb.mxu2 %v5222_v26 }
 0x493   :  { %v1261_v41 = vpack.c.bf16 %v1251_v14, %v1250_v61 }
 0x494   :  { %v1214_v63 = vpop.f32.mrf.mxu0 }
 0x495   :  { %3916 = vmatmul.msk.bf16.gmra.mxu3 %vm451_vm3, %v1261_v41  ;;  %3924 = vmatmul.msk.bf16.gmra.mxu1 %vm451_vm3, %v1261_v41  ;;  %v1215_v43 = vadd.f32 %v5198_v28, %v1214_v63 }
 0x496   :  { %1605 = vmatpush.bf16.msrb.mxu2 %v5228_v13 }
 0x497   :  { %v1236_v8 = vmax.f32 %v1215_v43, 0.0 }
 0x498   :  { %3960 = vmatmul.msk.bf16.vlgmr.msra.gmra.mxu2 %vm451_vm3, %v1464_v51 }
 0x499   :  { %v1252_v0 = vadd.f32 %v1236_v8, %v5001_v15 }
 0x49a   :  { %1615 = vmatpush.bf16.msra.mxu2 %v5231_v49 }
 0x49b   :  { %v1577_v58 = vsel %vm451_vm3, %v1252_v0, -inf }
 0x49c   :  { %v1216_v48 = vpop.f32.mrf.mxu0  ;;  %v1578_v10 = vmax.f32 %v1573_v12, %v1577_v58 }
 0x49d   :  { %v1217_v9 = vadd.f32 %v5198_v28, %v1216_v48 }
 0x49e   :  { %1616 = vmatpush.bf16.msra.mxu2 %v5237_v21 }
 0x49f   :  { %v1237_v26 = vmax.f32 %v1217_v9, 0.0 }
 0x4a1   :  { %v1253_v36 = vadd.f32 %v1237_v26, %v5003_v16  ;;  %v1574_v16 = vsel %vm451_vm3, %v1249_v55, -inf }
 0x4a2   :  { %1617 = vmatpush.bf16.msra.mxu2 %v3942_v31 }
 0x4a3   :  { %v1262_v53 = vpack.c.bf16 %v1253_v36, %v1252_v0  ;;  %v1579_v15 = vsel %vm451_vm3, %v1253_v36, -inf }
 0x4a4   :  { %v1219_v13 = vpop.f32.mrf.mxu0  ;;  %v1580_v17 = vmax.f32 %v1574_v16, %v1579_v15 }
 0x4a5   :  { %v1220_v27 = vadd.f32 %v5198_v28, %v1219_v13  ;;  %3917 = vmatmul.msk.bf16.gmra.mxu3 %vm451_vm3, %v1262_v53  ;;  %3925 = vmatmul.msk.bf16.gmra.mxu1 %vm451_vm3, %v1262_v53 }
 0x4a6   :  { %1618 = vmatpush.bf16.msra.mxu2 %v3934_v39  ;;  %v1585_v24 = vmax.f32 %v1578_v10, %v1580_v17 }
 0x4a7   :  { %v1238_v49 = vmax.f32 %v1220_v27, 0.0 }
 0x4a9   :  { %v1254_v4 = vadd.f32 %v1238_v49, %v5008_v22  ;;  %v1576_v22 = vsel %vm451_vm3, %v1251_v14, -inf }
 0x4ab   :  { %v1581_v3 = vsel %vm451_vm3, %v1254_v4, -inf }
 0x4ac   :  { %v1221_v32 = vpop.f32.mrf.mxu0  ;;  %v1582_v20 = vmax.f32 %v1575_v50, %v1581_v3 }
 0x4ad   :  { %v1222_v21 = vadd.f32 %v5198_v28, %v1221_v32 }
 0x4af   :  { %v1239_v7 = vmax.f32 %v1222_v21, 0.0 }
 0x4b1   :  { %v1255_v33 = vadd.f32 %v1239_v7, %v5010_v23  ;;  %v1507_v7 = vperm.slane %v5301_v19, 1 }
 0x4b3   :  { %v1263_v18 = vpack.c.bf16 %v1255_v33, %v1254_v4  ;;  %v1583_v28 = vsel %vm451_vm3, %v1255_v33, -inf }
 0x4b4   :  { %v1584_v56 = vmax.f32 %v1576_v22, %v1583_v28 }
 0x4b5   :  { %3918 = vmatmul.msk.bf16.gmra.mxu3 %vm451_vm3, %v1263_v18  ;;  %3926 = vmatmul.msk.bf16.gmra.mxu1 %vm451_vm3, %v1263_v18 }
 0x4b6   :  { %v1586_v35 = vmax.f32 %v1582_v20, %v1584_v56 }
 0x4b8   :  { %v1587_v23 = vmax.f32 %v1585_v24, %v1586_v35 }
 0x4ba   :  { %v1588_v31 = vrot.slane %v1587_v23, 4 }
 0x4bc   :  { %v1589_v59 = vmax.f32 %v1587_v23, %v1588_v31 }
 0x4be   :  { %v1590_v6 = vrot.slane %v1589_v59, 2 }
 0x4c0   :  { %v1591_v30 = vmax.f32 %v1589_v59, %v1590_v6 }
 0x4c2   :  { %v1592_v38 = vrot.slane %v1591_v30, 1  ;;  %v1394_v42 = vpop.f32.mrf.mxu1 }
 0x4c4   :  { %v1593_v62 = vmax.f32 %v1591_v30, %v1592_v38 }
 0x4c6   :  { %v1594_v39 = vpack.c.bf16 %v1593_v62, %v1593_v62 }
 0x4c8   :  { %v1345_v40 = vpop.f32.mrf.mxu3  ;;  %3961 = vmatmul.msk.bf16.vlgmr.msrb.gmra.mxu2 %vm451_vm3, %v1594_v39 }
 0x4ca   :  { %v1396_v37 = vpop.f32.mrf.mxu1 }
 0x4d0   :  { %v1347_v46 = vpop.f32.mrf.mxu3 }
 0x4d2   :  { %v1399_v45 = vpop.f32.mrf.mxu1 }
 0x4d8   :  { %v1350_v44 = vpop.f32.mrf.mxu3  ;;  %3962 = vmatmul.msk.bf16.vlgmr.msra.gmra.mxu2 %vm451_vm3, %v1594_v39 }
 0x4da   :  { %v1401_v29 = vpop.f32.mrf.mxu1 }
 0x4e0   :  { %v1352_v11 = vpop.f32.mrf.mxu3 }
 0x4e2   :  { %v1404_v55 = vpop.f32.mrf.mxu1 }
 0x4e8   :  { %v1355_v34 = vpop.f32.mrf.mxu3 }
 0x4ea   :  { %v1406_v5 = vpop.f32.mrf.mxu1 }
 0x4f0   :  { %v1357_v54 = vpop.f32.mrf.mxu3 }
 0x4f2   :  { %v1409_v51 = vpop.f32.mrf.mxu1 }
 0x4f8   :  { %v1360_v47 = vpop.f32.mrf.mxu3 }
 0x4fa   :  { %v1411_v61 = vpop.f32.mrf.mxu1 }
 0x500   :  { %v1362_v57 = vpop.f32.mrf.mxu3 }
 0x502   :  { %v1414_v16 = vpop.f32.mrf.mxu1 }
 0x508   :  { %v1365_v60 = vpop.f32.mrf.mxu3 }
 0x50a   :  { %v1416_v39 = vpop.f32.mrf.mxu1 }
 0x50b   :  { %v1522_v25 = vpop.f32.mrf.mxu2 }
 0x50c   :  { %v1523_v1 = vadd.f32 %v1522_v25, %v1506_v52 }
 0x50e   :  { %v1539_v2 = vperm.slane %v1523_v1, 0 }
 0x510   :  { %v1541_v14 = vadd.f32 %v1539_v2, %v1345_v40  ;;  %v1543_v41 = vadd.f32 %v1539_v2, %v1347_v46  ;;  %v1545_v63 = vadd.f32 %v1539_v2, %v1350_v44  ;;  %v1547_v43 = vadd.f32 %v1539_v2, %v1352_v11  ;;  %v1367_v15 = vpop.f32.mrf.mxu3 }
 0x511   :  { %v1549_v48 = vadd.f32 %v1539_v2, %v1355_v34  ;;  %v1551_v8 = vadd.f32 %v1539_v2, %v1357_v54  ;;  %v1553_v9 = vadd.f32 %v1539_v2, %v1360_v47  ;;  %v1555_v26 = vadd.f32 %v1539_v2, %v1362_v57 }
 0x512   :  { %v5304_v0 = vmax.f32 %v1541_v14, 0.0  ;;  %v5306_v36 = vmax.f32 %v1543_v41, 0.0  ;;  %v5308_v53 = vmax.f32 %v1545_v63, 0.0  ;;  %v5310_v13 = vmax.f32 %v1547_v43, 0.0 }
 0x513   :  { %v5312_v27 = vmax.f32 %v1549_v48, 0.0  ;;  %v5314_v49 = vmax.f32 %v1551_v8, 0.0  ;;  %v5316_v32 = vmax.f32 %v1553_v9, 0.0  ;;  %v5318_v4 = vmax.f32 %v1555_v26, 0.0  ;;  %v1524_v21 = vpop.f32.mrf.mxu2 }
 0x515   :  { %6062 = vst [vmem:[#allocation23_spill] sm:$0xff] %v5316_v32 }
 0x516   :  { %6063 = vst [vmem:[#allocation24_spill] sm:$0xff] %v5318_v4 }
 0x518   :  { %v1370_v33 = vpop.f32.mrf.mxu3 }
 0x51b   :  { %v1535_v58 = vpop.f32.mrf.mxu2 }
 0x51c   :  { %v1536_v3 = vadd.f32 %v1535_v58, %v1507_v7 }
 0x51e   :  { %v1540_v12 = vperm.slane %v1536_v3, 0 }
 0x520   :  { %v1542_v17 = vadd.f32 %v1540_v12, %v1394_v42  ;;  %v1544_v50 = vadd.f32 %v1540_v12, %v1396_v37  ;;  %v1546_v22 = vadd.f32 %v1540_v12, %v1399_v45  ;;  %v1548_v18 = vadd.f32 %v1540_v12, %v1401_v29  ;;  %v1372_v40 = vpop.f32.mrf.mxu3  ;;  %v1419_v42 = vpop.f32.mrf.mxu1 }
 0x521   :  { %v1550_v28 = vadd.f32 %v1540_v12, %v1404_v55  ;;  %v1552_v10 = vadd.f32 %v1540_v12, %v1406_v5  ;;  %v1554_v20 = vadd.f32 %v1540_v12, %v1409_v51  ;;  %v1556_v56 = vadd.f32 %v1540_v12, %v1411_v61 }
 0x522   :  { %v5321_v24 = vmax.f32 %v1542_v17, 0.0  ;;  %v5323_v35 = vmax.f32 %v1544_v50, 0.0  ;;  %v5325_v23 = vmax.f32 %v1546_v22, 0.0  ;;  %v5327_v31 = vmax.f32 %v1548_v18, 0.0 }
 0x523   :  { %v5329_v59 = vmax.f32 %v1550_v28, 0.0  ;;  %v5331_v6 = vmax.f32 %v1552_v10, 0.0  ;;  %v5333_v30 = vmax.f32 %v1554_v20, 0.0  ;;  %v5335_v38 = vmax.f32 %v1556_v56, 0.0  ;;  %v1537_v62 = vpop.f32.mrf.mxu2 }
 0x525   :  { %6064 = vst [vmem:[#allocation25_spill] sm:$0xff] %v5335_v38 }
 0x528   :  { %v1375_v46 = vpop.f32.mrf.mxu3  ;;  %v1421_v37 = vpop.f32.mrf.mxu1 }
 0x530   :  { %v1377_v44 = vpop.f32.mrf.mxu3  ;;  %v1424_v45 = vpop.f32.mrf.mxu1 }
 0x538   :  { %v1380_v11 = vpop.f32.mrf.mxu3  ;;  %v1426_v34 = vpop.f32.mrf.mxu1 }
 0x540   :  { %v1382_v47 = vpop.f32.mrf.mxu3  ;;  %v1429_v26 = vpop.f32.mrf.mxu1 }
 0x548   :  { %v1431_v3 = vpop.f32.mrf.mxu1 }
 0x54b   :  { %v1607_v29 = vpop.f32.mrf.mxu2 }
 0x54c   :  { %v1608_v54 = vadd.f32 %v1607_v29, %v1506_v52 }
 0x54e   :  { %v1624_v55 = vperm.slane %v1608_v54, 0 }
 0x550   :  { %v1626_v5 = vadd.f32 %v1624_v55, %v1365_v60  ;;  %v1628_v57 = vadd.f32 %v1624_v55, %v1367_v15  ;;  %v1630_v19 = vadd.f32 %v1624_v55, %v1370_v33  ;;  %v1632_v51 = vadd.f32 %v1624_v55, %v1372_v40 }
 0x551   :  { %v1634_v25 = vadd.f32 %v1624_v55, %v1375_v46  ;;  %v1636_v1 = vadd.f32 %v1624_v55, %v1377_v44  ;;  %v1638_v2 = vadd.f32 %v1624_v55, %v1380_v11  ;;  %v1640_v61 = vadd.f32 %v1624_v55, %v1382_v47 }
 0x552   :  { %v5337_v14 = vmax.f32 %v1626_v5, 0.0  ;;  %v5339_v41 = vmax.f32 %v1628_v57, 0.0  ;;  %v5341_v63 = vmax.f32 %v1630_v19, 0.0  ;;  %v5343_v43 = vmax.f32 %v1632_v51, 0.0 }
 0x553   :  { %v5345_v48 = vmax.f32 %v1634_v25, 0.0  ;;  %v5347_v52 = vmax.f32 %v1636_v1, 0.0  ;;  %v5349_v60 = vmax.f32 %v1638_v2, 0.0  ;;  %v5351_v8 = vmax.f32 %v1640_v61, 0.0  ;;  %v1609_v9 = vpop.f32.mrf.mxu2 }
 0x554   :  { %6065 = vst [vmem:[#allocation26_spill] sm:$0xff] %v5337_v14 }
 0x555   :  { %6066 = vst [vmem:[#allocation27_spill] sm:$0xff] %v5339_v41 }
 0x556   :  { %6067 = vst [vmem:[#allocation28_spill] sm:$0xff] %v5341_v63 }
 0x557   :  { %6068 = vst [vmem:[#allocation29_spill] sm:$0xff] %v5343_v43 }
 0x558   :  { %6069 = vst [vmem:[#allocation30_spill] sm:$0xff] %v5345_v48 }
 0x559   :  { %6070 = vst [vmem:[#allocation31_spill] sm:$0xff] %v5347_v52 }
 0x55a   :  { %6071 = vst [vmem:[#allocation32_spill] sm:$0xff] %v5349_v60 }
 0x55b   :  { %6072 = vst [vmem:[#allocation33_spill] sm:$0xff] %v5351_v8  ;;  %v1620_v21 = vpop.f32.mrf.mxu2 }
 0x55c   :  { %v1621_v15 = vadd.f32 %v1620_v21, %v1507_v7 }
 0x55e   :  { %v1625_v58 = vperm.slane %v1621_v15, 0 }
 0x560   :  { %v1627_v33 = vadd.f32 %v1625_v58, %v1414_v16  ;;  %v1629_v12 = vadd.f32 %v1625_v58, %v1416_v39  ;;  %v1631_v17 = vadd.f32 %v1625_v58, %v1419_v42  ;;  %v1633_v50 = vadd.f32 %v1625_v58, %v1421_v37 }
 0x561   :  { %v1635_v22 = vadd.f32 %v1625_v58, %v1424_v45  ;;  %v1637_v18 = vadd.f32 %v1625_v58, %v1426_v34  ;;  %v1639_v28 = vadd.f32 %v1625_v58, %v1429_v26  ;;  %v1641_v10 = vadd.f32 %v1625_v58, %v1431_v3 }
 0x562   :  { %v5353_v20 = vmax.f32 %v1627_v33, 0.0  ;;  %v5355_v56 = vmax.f32 %v1629_v12, 0.0  ;;  %v5357_v62 = vmax.f32 %v1631_v17, 0.0  ;;  %v5359_v40 = vmax.f32 %v1633_v50, 0.0 }
 0x563   :  { %v5361_v46 = vmax.f32 %v1635_v22, 0.0  ;;  %v5363_v7 = vmax.f32 %v1637_v18, 0.0  ;;  %v5365_v16 = vmax.f32 %v1639_v28, 0.0  ;;  %v5367_v39 = vmax.f32 %v1641_v10, 0.0  ;;  %v1622_v42 = vpop.f32.mrf.mxu2 }
 0x564   :  { %6073 = vst [vmem:[#allocation34_spill] sm:$0xff] %v5353_v20 }
 0x565   :  { %6074 = vst [vmem:[#allocation35_spill] sm:$0xff] %v5355_v56 }
 0x566   :  { %6075 = vst [vmem:[#allocation36_spill] sm:$0xff] %v5357_v62 }
 0x567   :  { %6076 = vst [vmem:[#allocation37_spill] sm:$0xff] %v5359_v40 }
 0x568   :  { %6077 = vst [vmem:[#allocation38_spill] sm:$0xff] %v5361_v46 }
 0x569   :  { %6078 = vst [vmem:[#allocation39_spill] sm:$0xff] %v5363_v7 }
 0x56a   :  { %6079 = vst [vmem:[#allocation40_spill] sm:$0xff] %v5365_v16 }
 0x56b   :  { %6080 = vst [vmem:[#allocation41_spill] sm:$0xff] %v5367_v39 }
 0x56c   :  { %4796 = dma.done.wait [#allocation4], 8192 }
 0x56d   :  { %4797 = vsyncadd [#allocation4], 4294959104 }
 0x56e   :  { %4798 = dma.done.wait [#allocation4 + $0x1], 4096 }
 0x56f   :  { %4799 = vsyncadd [#allocation4 + $0x1], 4294963200  ;;  %v4077_v37 = vld [vmem:[#allocation2 + $0xe0] sm:$0xf]  ;;  %v4426_v44 = vld [vmem:[#allocation2 + $0xec] sm:$0xf0] }
 0x570   :  { %v4205_v45 = vld [vmem:[#allocation2 + $0x1e0] sm:$0xf]  ;;  %v4078_v11 = vor.u32 %v4426_v44, %v4077_v37  ;;  %v4458_v29 = vld [vmem:[#allocation2 + $0x1ec] sm:$0xf0]  ;;  %v4424_v34 = vld [vmem:[#allocation2 + $0xe4] sm:$0xf] }
 0x571   :  { %v4079_v54 = vld [vmem:[#allocation2 + $0xf0] sm:$0xf0]  ;;  %v4206_v55 = vor.u32 %v4458_v29, %v4205_v45  ;;  %v4456_v5 = vld [vmem:[#allocation2 + $0x1e4] sm:$0xf]  ;;  %v4061_v19 = vld [vmem:[#allocation2 + $0xc0] sm:$0xf] }
 0x572   :  { %v4082_v47 = vor.u32 %v4424_v34, %v4079_v54  ;;  %v4207_v57 = vld [vmem:[#allocation2 + $0x1f0] sm:$0xf0]  ;;  %2099 = vmatpush.bf16.msrb.mxu0 %v4078_v11  ;;  %v4422_v25 = vld [vmem:[#allocation2 + $0xcc] sm:$0xf0]  ;;  %v4189_v1 = vld [vmem:[#allocation2 + $0x1c0] sm:$0xf] }
 0x573   :  { %v4210_v51 = vor.u32 %v4456_v5, %v4207_v57  ;;  %v4454_v2 = vld [vmem:[#allocation2 + $0x1cc] sm:$0xf0]  ;;  %2148 = vmatpush.bf16.msrb.mxu2 %v4206_v55  ;;  %v4062_v61 = vor.u32 %v4422_v25, %v4061_v19  ;;  %v4420_v26 = vld [vmem:[#allocation2 + $0xc4] sm:$0xf]  ;;  %v4063_v21 = vld [vmem:[#allocation2 + $0xd0] sm:$0xf0] }
 0x574   :  { %2197 = vmatpush.bf16.msrb.mxu3 %v4082_v47  ;;  %v4190_v9 = vor.u32 %v4454_v2, %v4189_v1  ;;  %v4452_v15 = vld [vmem:[#allocation2 + $0x1c4] sm:$0xf]  ;;  %v4066_v58 = vor.u32 %v4420_v26, %v4063_v21  ;;  %v4191_v3 = vld [vmem:[#allocation2 + $0x1d0] sm:$0xf0]  ;;  %v4045_v33 = vld [vmem:[#allocation2 + $0xa0] sm:$0xf] }
 0x575   :  { %2246 = vmatpush.bf16.msrb.mxu1 %v4210_v51  ;;  %v4418_v12 = vld [vmem:[#allocation2 + $0xac] sm:$0xf0]  ;;  %v4194_v17 = vor.u32 %v4452_v15, %v4191_v3  ;;  %v4173_v50 = vld [vmem:[#allocation2 + $0x1a0] sm:$0xf]  ;;  %v4416_v18 = vld [vmem:[#allocation2 + $0xa4] sm:$0xf] }
 0x576   :  { %v4450_v22 = vld [vmem:[#allocation2 + $0x1ac] sm:$0xf0]  ;;  %2100 = vmatpush.bf16.msrb.mxu0 %v4062_v61  ;;  %v4046_v28 = vor.u32 %v4418_v12, %v4045_v33  ;;  %v4047_v10 = vld [vmem:[#allocation2 + $0xb0] sm:$0xf0]  ;;  %v4448_v42 = vld [vmem:[#allocation2 + $0x1a4] sm:$0xf] }
 0x577   :  { %v4175_v37 = vld [vmem:[#allocation2 + $0x1b0] sm:$0xf0]  ;;  %2149 = vmatpush.bf16.msrb.mxu2 %v4190_v9  ;;  %v4174_v44 = vor.u32 %v4450_v22, %v4173_v50  ;;  %v4050_v45 = vor.u32 %v4416_v18, %v4047_v10  ;;  %v4029_v11 = vld [vmem:[#allocation2 + $0x80] sm:$0xf]  ;;  %v4414_v29 = vld [vmem:[#allocation2 + $0x8c] sm:$0xf0] }
 0x578   :  { %2198 = vmatpush.bf16.msrb.mxu3 %v4066_v58  ;;  %v4157_v34 = vld [vmem:[#allocation2 + $0x180] sm:$0xf]  ;;  %v4178_v54 = vor.u32 %v4448_v42, %v4175_v37  ;;  %v4446_v55 = vld [vmem:[#allocation2 + $0x18c] sm:$0xf0]  ;;  %v4412_v47 = vld [vmem:[#allocation2 + $0x84] sm:$0xf]  ;;  %v4030_v51 = vor.u32 %v4414_v29, %v4029_v11 }
 0x579   :  { %2247 = vmatpush.bf16.msrb.mxu1 %v4194_v17  ;;  %v4031_v5 = vld [vmem:[#allocation2 + $0x90] sm:$0xf0]  ;;  %v4444_v57 = vld [vmem:[#allocation2 + $0x184] sm:$0xf]  ;;  %v4158_v25 = vor.u32 %v4446_v55, %v4157_v34  ;;  %v4013_v2 = vld [vmem:[#allocation2 + $0x60] sm:$0xf] }
 0x57a   :  { %v4159_v19 = vld [vmem:[#allocation2 + $0x190] sm:$0xf0]  ;;  %2101 = vmatpush.bf16.msrb.mxu0 %v4046_v28  ;;  %v4034_v1 = vor.u32 %v4412_v47, %v4031_v5  ;;  %v4410_v61 = vld [vmem:[#allocation2 + $0x6c] sm:$0xf0]  ;;  %v4141_v9 = vld [vmem:[#allocation2 + $0x160] sm:$0xf] }
 0x57b   :  { %2150 = vmatpush.bf16.msrb.mxu2 %v4174_v44  ;;  %v4162_v26 = vor.u32 %v4444_v57, %v4159_v19  ;;  %v4442_v21 = vld [vmem:[#allocation2 + $0x16c] sm:$0xf0]  ;;  %v4408_v15 = vld [vmem:[#allocation2 + $0x64] sm:$0xf]  ;;  %v4015_v58 = vld [vmem:[#allocation2 + $0x70] sm:$0xf0]  ;;  %v4014_v12 = vor.u32 %v4410_v61, %v4013_v2 }
 0x57c   :  { %2199 = vmatpush.bf16.msrb.mxu3 %v4050_v45  ;;  %v4440_v3 = vld [vmem:[#allocation2 + $0x164] sm:$0xf]  ;;  %v4143_v33 = vld [vmem:[#allocation2 + $0x170] sm:$0xf0]  ;;  %v4142_v17 = vor.u32 %v4442_v21, %v4141_v9  ;;  %v4018_v50 = vor.u32 %v4408_v15, %v4015_v58  ;;  %v3997_v22 = vld [vmem:[#allocation2 + $0x40] sm:$0xf] }
 0x57d   :  { %2248 = vmatpush.bf16.msrb.mxu1 %v4178_v54  ;;  %v4406_v18 = vld [vmem:[#allocation2 + $0x4c] sm:$0xf0]  ;;  %v4125_v28 = vld [vmem:[#allocation2 + $0x140] sm:$0xf]  ;;  %v4146_v10 = vor.u32 %v4440_v3, %v4143_v33  ;;  %v4404_v37 = vld [vmem:[#allocation2 + $0x44] sm:$0xf] }
 0x57e   :  { %2102 = vmatpush.bf16.msrb.mxu0 %v4030_v51  ;;  %v4438_v42 = vld [vmem:[#allocation2 + $0x14c] sm:$0xf0]  ;;  %v3999_v44 = vld [vmem:[#allocation2 + $0x50] sm:$0xf0]  ;;  %v4436_v45 = vld [vmem:[#allocation2 + $0x144] sm:$0xf]  ;;  %v3998_v29 = vor.u32 %v4406_v18, %v3997_v22 }
 0x57f   :  { %2151 = vmatpush.bf16.msrb.mxu2 %v4158_v25  ;;  %v4127_v11 = vld [vmem:[#allocation2 + $0x150] sm:$0xf0]  ;;  %v4126_v34 = vor.u32 %v4438_v42, %v4125_v28  ;;  %v4002_v54 = vor.u32 %v4404_v37, %v3999_v44  ;;  %v3981_v55 = vld [vmem:[#allocation2 + $0x20] sm:$0xf]  ;;  %v4402_v47 = vld [vmem:[#allocation2 + $0x2c] sm:$0xf0]  ;;  %v5371_v37 = vpack.c.bf16 %v5306_v36, %v5304_v0  ;;  %v5375_v44 = vpack.c.bf16 %v5323_v35, %v5321_v24 }
 0x580   :  { %2200 = vmatpush.bf16.msrb.mxu3 %v4034_v1  ;;  %v4109_v5 = vld [vmem:[#allocation2 + $0x120] sm:$0xf]  ;;  %v4130_v57 = vor.u32 %v4436_v45, %v4127_v11  ;;  %v4434_v19 = vld [vmem:[#allocation2 + $0x12c] sm:$0xf0]  ;;  %v4400_v51 = vld [vmem:[#allocation2 + $0x24] sm:$0xf]  ;;  %v3982_v61 = vor.u32 %v4402_v47, %v3981_v55  ;;  %v5383_v45 = vpack.c.bf16 %v5310_v13, %v5308_v53  ;;  %v5387_v11 = vpack.c.bf16 %v5327_v31, %v5325_v23 }
 0x581   :  { %2249 = vmatpush.bf16.msrb.mxu1 %v4162_v26  ;;  %v3983_v25 = vld [vmem:[#allocation2 + $0x30] sm:$0xf0]  ;;  %v4432_v1 = vld [vmem:[#allocation2 + $0x124] sm:$0xf]  ;;  %v4110_v9 = vor.u32 %v4434_v19, %v4109_v5  ;;  %v3965_v21 = vld [vmem:[#allocation2] sm:$0xf] }
 0x582   :  { %2103 = vmatpush.bf16.msrb.mxu0 %v4014_v12  ;;  %v4111_v2 = vld [vmem:[#allocation2 + $0x130] sm:$0xf0]  ;;  %v3986_v26 = vor.u32 %v4400_v51, %v3983_v25  ;;  %v4398_v15 = vld [vmem:[#allocation2 + $0xc] sm:$0xf0]  ;;  %v4093_v58 = vld [vmem:[#allocation2 + $0x100] sm:$0xf]  ;;  %v5407_v51 = vpack.c.bf16 %v5318_v4, %v5316_v32  ;;  %v5411_v25 = vpack.c.bf16 %v5335_v38, %v5333_v30 }
 0x583   :  { %2152 = vmatpush.bf16.msrb.mxu2 %v4142_v17  ;;  %v4114_v3 = vor.u32 %v4432_v1, %v4111_v2  ;;  %v4430_v33 = vld [vmem:[#allocation2 + $0x10c] sm:$0xf0]  ;;  %v4396_v12 = vld [vmem:[#allocation2 + $0x4] sm:$0xf]  ;;  %v3967_v17 = vld [vmem:[#allocation2 + $0x10] sm:$0xf0]  ;;  %v3966_v18 = vor.u32 %v4398_v15, %v3965_v21  ;;  %v5419_v15 = vpack.c.bf16 %v5339_v41, %v5337_v14 }
 0x584   :  { %2201 = vmatpush.bf16.msrb.mxu3 %v4018_v50  ;;  %v4428_v50 = vld [vmem:[#allocation2 + $0x104] sm:$0xf]  ;;  %v4095_v22 = vld [vmem:[#allocation2 + $0x110] sm:$0xf0]  ;;  %v4094_v28 = vor.u32 %v4430_v33, %v4093_v58  ;;  %v4459_v55 = vld [vmem:[#allocation2 + $0x1f4] sm:$0xf0]  ;;  %v5423_v58 = vpack.c.bf16 %v5355_v56, %v5353_v20 }
 0x585   :  { %2250 = vmatpush.bf16.msrb.mxu1 %v4146_v10  ;;  %v3970_v10 = vor.u32 %v4396_v12, %v3967_v17  ;;  %v4098_v42 = vor.u32 %v4428_v50, %v4095_v22  ;;  %v4085_v5 = vld [vmem:[#allocation2 + $0xe8] sm:$0xf]  ;;  %v4455_v2 = vld [vmem:[#allocation2 + $0x1d4] sm:$0xf0]  ;;  %v4087_v33 = vld [vmem:[#allocation2 + $0xf8] sm:$0xf0] }
 0x586   :  { %2104 = vmatpush.bf16.msrb.mxu0 %v3998_v29  ;;  %v5395_v29 = vpack.c.bf16 %v5314_v49, %v5312_v27  ;;  %v4197_v1 = vld [vmem:[#allocation2 + $0x1c8] sm:$0xf]  ;;  %v4451_v50 = vld [vmem:[#allocation2 + $0x1b4] sm:$0xf0]  ;;  %v4421_v22 = vld [vmem:[#allocation2 + $0xcc] sm:$0xf] }
 0x587   :  { %2153 = vmatpush.bf16.msrb.mxu2 %v4126_v34  ;;  %v5399_v34 = vpack.c.bf16 %v5331_v6, %v5329_v59  ;;  %v4181_v17 = vld [vmem:[#allocation2 + $0x1a8] sm:$0xf] }
 0x588   :  { %2202 = vmatpush.bf16.msrb.mxu3 %v4002_v54  ;;  %v4213_v54 = vld [vmem:[#allocation2 + $0x1e8] sm:$0xf] }
 0x589   :  { %2251 = vmatpush.bf16.msrb.mxu1 %v4130_v57  ;;  %v4214_v47 = vor.u32 %v4459_v55, %v4213_v54  ;;  %v4427_v57 = vld [vmem:[#allocation2 + $0xf4] sm:$0xf0] }
 0x58a   :  { %2105 = vmatpush.bf16.msrb.mxu0 %v3982_v61  ;;  %v4086_v19 = vor.u32 %v4427_v57, %v4085_v5  ;;  %v4198_v61 = vor.u32 %v4455_v2, %v4197_v1  ;;  %v4419_v5 = vld [vmem:[#allocation2 + $0xb4] sm:$0xf0]  ;;  %v4417_v57 = vld [vmem:[#allocation2 + $0xac] sm:$0xf]  ;;  %v4055_v1 = vld [vmem:[#allocation2 + $0xb8] sm:$0xf0] }
 0x58b   :  { %2154 = vmatpush.bf16.msrb.mxu2 %v4110_v9  ;;  %v4069_v9 = vld [vmem:[#allocation2 + $0xc8] sm:$0xf]  ;;  %v4453_v2 = vld [vmem:[#allocation2 + $0x1cc] sm:$0xf] }
 0x58c   :  { %2203 = vmatpush.bf16.msrb.mxu3 %v3986_v26  ;;  %v4423_v26 = vld [vmem:[#allocation2 + $0xd4] sm:$0xf0] }
 0x58d   :  { %2252 = vmatpush.bf16.msrb.mxu1 %v4114_v3  ;;  %v4070_v21 = vor.u32 %v4423_v26, %v4069_v9  ;;  %v4425_v3 = vld [vmem:[#allocation2 + $0xec] sm:$0xf]  ;;  %v4037_v26 = vld [vmem:[#allocation2 + $0x88] sm:$0xf] }
 0x58e   :  { %2106 = vmatpush.bf16.msrb.mxu0 %v3966_v18  ;;  %v4090_v12 = vor.u32 %v4425_v3, %v4087_v33  ;;  %v4182_v18 = vor.u32 %v4451_v50, %v4181_v17  ;;  %v4165_v3 = vld [vmem:[#allocation2 + $0x188] sm:$0xf]  ;;  %v4058_v33 = vor.u32 %v4417_v57, %v4055_v1  ;;  %v4447_v17 = vld [vmem:[#allocation2 + $0x194] sm:$0xf0]  ;;  %v4413_v50 = vld [vmem:[#allocation2 + $0x8c] sm:$0xf] }
 0x58f   :  { %2155 = vmatpush.bf16.msrb.mxu2 %v4094_v28  ;;  %v4071_v28 = vld [vmem:[#allocation2 + $0xd8] sm:$0xf0]  ;;  %v4411_v57 = vld [vmem:[#allocation2 + $0x74] sm:$0xf0] }
 0x590   :  { %2204 = vmatpush.bf16.msrb.mxu3 %v3970_v10  ;;  %v4457_v10 = vld [vmem:[#allocation2 + $0x1ec] sm:$0xf]  ;;  %v4074_v54 = vor.u32 %v4421_v22, %v4071_v28  ;;  %v4166_v22 = vor.u32 %v4447_v17, %v4165_v3  ;;  %v4039_v28 = vld [vmem:[#allocation2 + $0x98] sm:$0xf0] }
 0x591   :  { %2253 = vmatpush.bf16.msrb.mxu1 %v4098_v42  ;;  %2107 = vmatmul.bf16.vlgmr.msrb.gmra.mxu0 %v5371_v37  ;;  %v4215_v42 = vld [vmem:[#allocation2 + $0x1f8] sm:$0xf0]  ;;  %v4445_v3 = vld [vmem:[#allocation2 + $0x18c] sm:$0xf] }
 0x592   :  { %2156 = vmatmul.bf16.vlgmr.msrb.gmra.mxu2 %v5375_v44  ;;  %2295 = vmatpush.bf16.msra.mxu0 %v4086_v19  ;;  %v4218_v55 = vor.u32 %v4457_v10, %v4215_v42  ;;  %v4449_v10 = vld [vmem:[#allocation2 + $0x1ac] sm:$0xf]  ;;  %v4183_v42 = vld [vmem:[#allocation2 + $0x1b8] sm:$0xf0] }
 0x593   :  { %2205 = vmatmul.bf16.vlgmr.msrb.gmra.mxu3 %v5371_v37  ;;  %2344 = vmatpush.bf16.msra.mxu2 %v4214_v47  ;;  %v4053_v47 = vld [vmem:[#allocation2 + $0xa8] sm:$0xf] }
 0x594   :  { %2254 = vmatmul.bf16.vlgmr.msrb.gmra.mxu1 %v5375_v44  ;;  %2393 = vmatpush.bf16.msra.mxu3 %v4090_v12  ;;  %v4054_v19 = vor.u32 %v4419_v5, %v4053_v47  ;;  %v5431_v47 = vpack.c.bf16 %v5343_v43, %v5341_v63  ;;  %v4021_v5 = vld [vmem:[#allocation2 + $0x68] sm:$0xf]  ;;  %v4435_v63 = vld [vmem:[#allocation2 + $0x134] sm:$0xf0] }
 0x595   :  { %2442 = vmatpush.bf16.msra.mxu1 %v4218_v55  ;;  %v4042_v55 = vor.u32 %v4413_v50, %v4039_v28  ;;  %v4022_v1 = vor.u32 %v4411_v57, %v4021_v5  ;;  %v4407_v50 = vld [vmem:[#allocation2 + $0x54] sm:$0xf0]  ;;  %v4441_v5 = vld [vmem:[#allocation2 + $0x16c] sm:$0xf]  ;;  %v4117_v43 = vld [vmem:[#allocation2 + $0x128] sm:$0xf] }
 0x596   :  { %2296 = vmatpush.bf16.msra.mxu0 %v4070_v21  ;;  %v4415_v21 = vld [vmem:[#allocation2 + $0x94] sm:$0xf0] }
 0x597   :  { %2345 = vmatpush.bf16.msra.mxu2 %v4198_v61  ;;  %v4199_v61 = vld [vmem:[#allocation2 + $0x1d8] sm:$0xf0]  ;;  %v4038_v12 = vor.u32 %v4415_v21, %v4037_v26  ;;  %v4439_v28 = vld [vmem:[#allocation2 + $0x154] sm:$0xf0] }
 0x598   :  { %v4202_v9 = vor.u32 %v4453_v2, %v4199_v61  ;;  %2394 = vmatpush.bf16.msra.mxu3 %v4074_v54  ;;  %v5435_v54 = vpack.c.bf16 %v5359_v40, %v5357_v62  ;;  %v4443_v2 = vld [vmem:[#allocation2 + $0x174] sm:$0xf0]  ;;  %v4409_v61 = vld [vmem:[#allocation2 + $0x6c] sm:$0xf] }
 0x599   :  { %v4437_v40 = vld [vmem:[#allocation2 + $0x14c] sm:$0xf] }
 0x59a   :  { %2297 = vmatpush.bf16.msra.mxu0 %v4054_v19  ;;  %2443 = vmatpush.bf16.msra.mxu1 %v4202_v9  ;;  %v4149_v19 = vld [vmem:[#allocation2 + $0x168] sm:$0xf]  ;;  %v4023_v9 = vld [vmem:[#allocation2 + $0x78] sm:$0xf0] }
 0x59b   :  { %2346 = vmatpush.bf16.msra.mxu2 %v4182_v18  ;;  %v4186_v18 = vor.u32 %v4449_v10, %v4183_v42  ;;  %v4150_v26 = vor.u32 %v4443_v2, %v4149_v19  ;;  %v4026_v21 = vor.u32 %v4409_v61, %v4023_v9  ;;  %v4151_v19 = vld [vmem:[#allocation2 + $0x178] sm:$0xf0]  ;;  %v3989_v2 = vld [vmem:[#allocation2 + $0x28] sm:$0xf]  ;;  %v4403_v61 = vld [vmem:[#allocation2 + $0x34] sm:$0xf0] }
 0x59c   :  { %2395 = vmatpush.bf16.msra.mxu3 %v4058_v33  ;;  %v4167_v33 = vld [vmem:[#allocation2 + $0x198] sm:$0xf0]  ;;  %v4154_v9 = vor.u32 %v4441_v5, %v4151_v19  ;;  %v4397_v5 = vld [vmem:[#allocation2 + $0xc] sm:$0xf] }
 0x59d   :  { %v4170_v17 = vor.u32 %v4445_v3, %v4167_v33  ;;  %v3990_v3 = vor.u32 %v4403_v61, %v3989_v2  ;;  %v3991_v33 = vld [vmem:[#allocation2 + $0x38] sm:$0xf0]  ;;  %v4429_v61 = vld [vmem:[#allocation2 + $0x10c] sm:$0xf] }
 0x59e   :  { %2298 = vmatpush.bf16.msra.mxu0 %v4038_v12  ;;  %2444 = vmatpush.bf16.msra.mxu1 %v4186_v18  ;;  %v4005_v12 = vld [vmem:[#allocation2 + $0x48] sm:$0xf]  ;;  %v4405_v18 = vld [vmem:[#allocation2 + $0x4c] sm:$0xf]  ;;  %v4119_v19 = vld [vmem:[#allocation2 + $0x138] sm:$0xf0] }
 0x59f   :  { %2347 = vmatpush.bf16.msra.mxu2 %v4166_v22  ;;  %v4133_v22 = vld [vmem:[#allocation2 + $0x148] sm:$0xf]  ;;  %v4006_v10 = vor.u32 %v4407_v50, %v4005_v12 }
 0x5a0   :  { %2396 = vmatpush.bf16.msra.mxu3 %v4042_v55  ;;  %v4134_v42 = vor.u32 %v4439_v28, %v4133_v22  ;;  %v4007_v55 = vld [vmem:[#allocation2 + $0x58] sm:$0xf0]  ;;  %v4399_v22 = vld [vmem:[#allocation2 + $0x14] sm:$0xf0]  ;;  %v4101_v28 = vld [vmem:[#allocation2 + $0x108] sm:$0xf] }
 0x5a1   :  { %2112 = vmatmul.bf16.gmra.mxu0 %v5383_v45  ;;  %v4010_v57 = vor.u32 %v4405_v18, %v4007_v55  ;;  %v5443_v18 = vpack.c.bf16 %v5347_v52, %v5345_v48  ;;  %v4431_v55 = vld [vmem:[#allocation2 + $0x114] sm:$0xf0] }
 0x5a2   :  { %2161 = vmatmul.bf16.gmra.mxu2 %v5387_v11  ;;  %2299 = vmatpush.bf16.msra.mxu0 %v4022_v1  ;;  %v4401_v1 = vld [vmem:[#allocation2 + $0x2c] sm:$0xf] }
 0x5a3   :  { %2210 = vmatmul.bf16.gmra.mxu3 %v5383_v45  ;;  %2348 = vmatpush.bf16.msra.mxu2 %v4150_v26  ;;  %v4135_v26 = vld [vmem:[#allocation2 + $0x158] sm:$0xf0]  ;;  %v3994_v12 = vor.u32 %v4401_v1, %v3991_v33  ;;  %v5459_v33 = vpack.c.bf16 %v5367_v39, %v5365_v16 }
 0x5a4   :  { %2259 = vmatmul.bf16.gmra.mxu1 %v5387_v11  ;;  %2397 = vmatpush.bf16.msra.mxu3 %v4026_v21  ;;  %v4118_v21 = vor.u32 %v4435_v63, %v4117_v43  ;;  %v4138_v50 = vor.u32 %v4437_v40, %v4135_v26  ;;  %v5447_v63 = vpack.c.bf16 %v5363_v7, %v5361_v46 }
 0x5a5   :  { %2445 = vmatpush.bf16.msra.mxu1 %v4170_v17  ;;  %v3973_v17 = vld [vmem:[#allocation2 + $0x8] sm:$0xf]  ;;  %v4102_v43 = vor.u32 %v4431_v55, %v4101_v28 }
 0x5a6   :  { %2300 = vmatpush.bf16.msra.mxu0 %v4006_v10  ;;  %v3974_v10 = vor.u32 %v4399_v22, %v3973_v17 }
 0x5a7   :  { %2349 = vmatpush.bf16.msra.mxu2 %v4134_v42  ;;  %v3975_v42 = vld [vmem:[#allocation2 + $0x18] sm:$0xf0] }
 0x5a8   :  { %2398 = vmatpush.bf16.msra.mxu3 %v4010_v57  ;;  %v3978_v40 = vor.u32 %v4397_v5, %v3975_v42  ;;  %v4433_v57 = vld [vmem:[#allocation2 + $0x12c] sm:$0xf] }
 0x5a9   :  { %2446 = vmatpush.bf16.msra.mxu1 %v4154_v9  ;;  %v4122_v2 = vor.u32 %v4433_v57, %v4119_v19  ;;  %v4103_v9 = vld [vmem:[#allocation2 + $0x118] sm:$0xf0] }
 0x5aa   :  { %2301 = vmatpush.bf16.msra.mxu0 %v3990_v3  ;;  %v4106_v1 = vor.u32 %v4429_v61, %v4103_v9  ;;  %v5455_v3 = vpack.c.bf16 %v5351_v8, %v5349_v60 }
 0x5ab   :  { %2350 = vmatpush.bf16.msra.mxu2 %v4118_v21 }
 0x5ac   :  { %2399 = vmatpush.bf16.msra.mxu3 %v3994_v12 }
 0x5ad   :  { %2447 = vmatpush.bf16.msra.mxu1 %v4138_v50 }
 0x5ae   :  { %2302 = vmatpush.bf16.msra.mxu0 %v3974_v10 }
 0x5af   :  { %2351 = vmatpush.bf16.msra.mxu2 %v4102_v43 }
 0x5b0   :  { %2400 = vmatpush.bf16.msra.mxu3 %v3978_v40 }
 0x5b1   :  { %2117 = vmatmul.bf16.gmra.mxu0 %v5395_v29  ;;  %2448 = vmatpush.bf16.msra.mxu1 %v4122_v2 }
 0x5b2   :  { %2166 = vmatmul.bf16.gmra.mxu2 %v5399_v34 }
 0x5b3   :  { %2215 = vmatmul.bf16.gmra.mxu3 %v5395_v29 }
 0x5b4   :  { %2264 = vmatmul.bf16.gmra.mxu1 %v5399_v34 }
 0x5b5   :  { %2449 = vmatpush.bf16.msra.mxu1 %v4106_v1 }
 0x5c1   :  { %2122 = vmatmul.bf16.gmra.mxu0 %v5407_v51 }
 0x5c2   :  { %2171 = vmatmul.bf16.gmra.mxu2 %v5411_v25 }
 0x5c3   :  { %2220 = vmatmul.bf16.gmra.mxu3 %v5407_v51 }
 0x5c4   :  { %2269 = vmatmul.bf16.gmra.mxu1 %v5411_v25 }
 0x5d1   :  { %2127 = vmatmul.bf16.gmra.mxu0 %v5419_v15 }
 0x5d2   :  { %2176 = vmatmul.bf16.gmra.mxu2 %v5423_v58 }
 0x5d3   :  { %2225 = vmatmul.bf16.gmra.mxu3 %v5419_v15 }
 0x5d4   :  { %2274 = vmatmul.bf16.gmra.mxu1 %v5423_v58 }
 0x5e1   :  { %2132 = vmatmul.bf16.gmra.mxu0 %v5431_v47 }
 0x5e2   :  { %2181 = vmatmul.bf16.gmra.mxu2 %v5435_v54 }
 0x5e3   :  { %2230 = vmatmul.bf16.gmra.mxu3 %v5431_v47 }
 0x5e4   :  { %2279 = vmatmul.bf16.gmra.mxu1 %v5435_v54 }
 0x5f1   :  { %2137 = vmatmul.bf16.gmra.mxu0 %v5443_v18 }
 0x5f2   :  { %2186 = vmatmul.bf16.gmra.mxu2 %v5447_v63 }
 0x5f3   :  { %2235 = vmatmul.bf16.gmra.mxu3 %v5443_v18 }
 0x5f4   :  { %2284 = vmatmul.bf16.gmra.mxu1 %v5447_v63 }
 0x601   :  { %2142 = vmatmul.bf16.gmra.mxu0 %v5455_v3 }
 0x602   :  { %2191 = vmatmul.bf16.gmra.mxu2 %v5459_v33 }
 0x603   :  { %2240 = vmatmul.bf16.gmra.mxu3 %v5455_v3 }
 0x604   :  { %2289 = vmatmul.bf16.gmra.mxu1 %v5459_v33 }
 0x60e   :  { %v2108_v26 = vpop.f32.mrf.mxu0 }
 0x611   :  { %v2255_v21 = vpop.f32.mrf.mxu1  ;;  %2303 = vmatmul.bf16.vlgmr.msra.gmra.mxu0 %v5371_v37 }
 0x612   :  { %2352 = vmatmul.bf16.vlgmr.msra.gmra.mxu2 %v5375_v44 }
 0x613   :  { %2401 = vmatmul.bf16.vlgmr.msra.gmra.mxu3 %v5371_v37 }
 0x614   :  { %2450 = vmatmul.bf16.vlgmr.msra.gmra.mxu1 %v5375_v44 }
 0x615   :  { %v2157_v12 = vpop.f32.mrf.mxu2 }
 0x616   :  { %v2206_v50 = vpop.f32.mrf.mxu3  ;;  %v2158_v17 = vadd.f32 %v2157_v12, %v2108_v26  ;;  %v2110_v28 = vpop.f32.mrf.mxu0 }
 0x617   :  { %v2256_v22 = vadd.f32 %v2255_v21, %v2206_v50 }
 0x619   :  { %v2491_v10 = vpack.c.bf16 %v2256_v22, %v2158_v17  ;;  %v2257_v55 = vpop.f32.mrf.mxu1 }
 0x61b   :  { %v2568_v37 = vunpack.c.l.b16 %v2491_v10  ;;  %v2569_v44 = vunpack.c.h.b16 %v2491_v10 }
 0x61d   :  { %v2159_v5 = vpop.f32.mrf.mxu2 }
 0x61e   :  { %v2208_v42 = vpop.f32.mrf.mxu3  ;;  %v2160_v43 = vadd.f32 %v2159_v5, %v2110_v28  ;;  %v5469_v57 = vpop.f32.mrf.mxu0 }
 0x61f   :  { %v2258_v40 = vadd.f32 %v2257_v55, %v2208_v42 }
 0x621   :  { %v2492_v19 = vpack.c.bf16 %v2258_v40, %v2160_v43  ;;  %v5471_v2 = vpop.f32.mrf.mxu1  ;;  %2308 = vmatmul.bf16.gmra.mxu0 %v5383_v45 }
 0x622   :  { %2357 = vmatmul.bf16.gmra.mxu2 %v5387_v11 }
 0x623   :  { %v2570_v61 = vunpack.c.l.b16 %v2492_v19  ;;  %v2571_v9 = vunpack.c.h.b16 %v2492_v19  ;;  %2406 = vmatmul.bf16.gmra.mxu3 %v5383_v45 }
 0x624   :  { %2455 = vmatmul.bf16.gmra.mxu1 %v5387_v11 }
 0x625   :  { %v5477_v1 = vpack.c.b16 %v2570_v61, %v2568_v37  ;;  %v5479_v26 = vpack.c.b16 %v2571_v9, %v2569_v44  ;;  %v5481_v21 = vpop.f32.mrf.mxu2 }
 0x626   :  { %v5483_v12 = vpop.f32.mrf.mxu3  ;;  %v2115_v50 = vpop.f32.mrf.mxu0 }
 0x629   :  { %v2262_v17 = vpop.f32.mrf.mxu1 }
 0x62d   :  { %v2164_v22 = vpop.f32.mrf.mxu2 }
 0x62e   :  { %v2213_v28 = vpop.f32.mrf.mxu3  ;;  %v2118_v10 = vpop.f32.mrf.mxu0 }
 0x631   :  { %v2265_v55 = vpop.f32.mrf.mxu1  ;;  %2313 = vmatmul.bf16.gmra.mxu0 %v5395_v29 }
 0x632   :  { %2362 = vmatmul.bf16.gmra.mxu2 %v5399_v34 }
 0x633   :  { %2411 = vmatmul.bf16.gmra.mxu3 %v5395_v29 }
 0x634   :  { %2460 = vmatmul.bf16.gmra.mxu1 %v5399_v34 }
 0x635   :  { %v2167_v45 = vpop.f32.mrf.mxu2 }
 0x636   :  { %v2216_v11 = vpop.f32.mrf.mxu3  ;;  %v2120_v5 = vpop.f32.mrf.mxu0  ;;  %v2168_v56 = vadd.f32 %v2167_v45, %v2118_v10 }
 0x639   :  { %v2267_v42 = vpop.f32.mrf.mxu1 }
 0x63d   :  { %v2169_v43 = vpop.f32.mrf.mxu2 }
 0x63e   :  { %v2218_v40 = vpop.f32.mrf.mxu3  ;;  %v2123_v19 = vpop.f32.mrf.mxu0  ;;  %v2170_v46 = vadd.f32 %v2169_v43, %v2120_v5 }
 0x63f   :  { %v2268_v62 = vadd.f32 %v2267_v42, %v2218_v40 }
 0x641   :  { %v2270_v37 = vpop.f32.mrf.mxu1  ;;  %2318 = vmatmul.bf16.gmra.mxu0 %v5407_v51 }
 0x642   :  { %2367 = vmatmul.bf16.gmra.mxu2 %v5411_v25 }
 0x643   :  { %2416 = vmatmul.bf16.gmra.mxu3 %v5407_v51  ;;  %v2266_v51 = vadd.f32 %v2265_v55, %v2216_v11  ;;  %v2263_v11 = vadd.f32 %v2262_v17, %v2213_v28 }
 0x644   :  { %2465 = vmatmul.bf16.gmra.mxu1 %v5411_v25 }
 0x645   :  { %v2172_v44 = vpop.f32.mrf.mxu2  ;;  %v2495_v10 = vpack.c.bf16 %v2266_v51, %v2168_v56 }
 0x646   :  { %v2221_v29 = vpop.f32.mrf.mxu3  ;;  %v2125_v61 = vpop.f32.mrf.mxu0  ;;  %v2173_v9 = vadd.f32 %v2172_v44, %v2123_v19 }
 0x647   :  { %v2271_v8 = vadd.f32 %v2270_v37, %v2221_v29  ;;  %v2577_v56 = vunpack.c.h.b16 %v2495_v10 }
 0x649   :  { %v2272_v34 = vpop.f32.mrf.mxu1  ;;  %v2497_v16 = vpack.c.bf16 %v2271_v8, %v2173_v9 }
 0x64b   :  { %v2580_v25 = vunpack.c.l.b16 %v2497_v16  ;;  %v2581_v20 = vunpack.c.h.b16 %v2497_v16  ;;  %v2165_v16 = vadd.f32 %v2164_v22, %v2115_v50 }
 0x64d   :  { %v2174_v60 = vpop.f32.mrf.mxu2 }
 0x64e   :  { %v2223_v39 = vpop.f32.mrf.mxu3  ;;  %v2175_v52 = vadd.f32 %v2174_v60, %v2125_v61  ;;  %v2128_v7 = vpop.f32.mrf.mxu0  ;;  %v2496_v60 = vpack.c.bf16 %v2268_v62, %v2170_v46 }
 0x64f   :  { %v2273_v48 = vadd.f32 %v2272_v34, %v2223_v39 }
 0x650   :  { %v2579_v5 = vunpack.c.h.b16 %v2496_v60 }
 0x651   :  { %v2498_v41 = vpack.c.bf16 %v2273_v48, %v2175_v52  ;;  %v2275_v14 = vpop.f32.mrf.mxu1  ;;  %2323 = vmatmul.bf16.gmra.mxu0 %v5419_v15 }
 0x652   :  { %2372 = vmatmul.bf16.gmra.mxu2 %v5423_v58 }
 0x653   :  { %v2582_v4 = vunpack.c.l.b16 %v2498_v41  ;;  %v2583_v32 = vunpack.c.h.b16 %v2498_v41  ;;  %2421 = vmatmul.bf16.gmra.mxu3 %v5419_v15  ;;  %v2578_v15 = vunpack.c.l.b16 %v2496_v60 }
 0x654   :  { %2470 = vmatmul.bf16.gmra.mxu1 %v5423_v58 }
 0x655   :  { %v5497_v8 = vpack.c.b16 %v2582_v4, %v2580_v25  ;;  %v5499_v39 = vpack.c.b16 %v2583_v32, %v2581_v20  ;;  %v2177_v48 = vpop.f32.mrf.mxu2  ;;  %v2163_v32 = vadd.f32 %v5481_v21, %v5469_v57  ;;  %v2261_v4 = vadd.f32 %v5471_v2, %v5483_v12 }
 0x656   :  { %v2226_v52 = vpop.f32.mrf.mxu3  ;;  %v2178_v55 = vadd.f32 %v2177_v48, %v2128_v7  ;;  %v2130_v41 = vpop.f32.mrf.mxu0  ;;  %v2576_v20 = vunpack.c.l.b16 %v2495_v10  ;;  %v5509_v7 = vpack.c.b16 %v2579_v5, %v2577_v56 }
 0x657   :  { %v2276_v45 = vadd.f32 %v2275_v14, %v2226_v52  ;;  %2604 = vmatpush.bf16.xpose.msrb.mxu0 %v5497_v8  ;;  %2633 = vmatpush.bf16.xpose.msrb.mxu2 %v5499_v39  ;;  %v2494_v14 = vpack.c.bf16 %v2263_v11, %v2165_v16  ;;  %v2493_v42 = vpack.c.bf16 %v2261_v4, %v2163_v32 }
 0x658   :  { %v5507_v46 = vpack.c.b16 %v2578_v15, %v2576_v20 }
 0x659   :  { %v2499_v58 = vpack.c.bf16 %v2276_v45, %v2178_v55  ;;  %v2277_v62 = vpop.f32.mrf.mxu1  ;;  %v2574_v21 = vunpack.c.l.b16 %v2494_v14  ;;  %v2575_v2 = vunpack.c.h.b16 %v2494_v14  ;;  %v2572_v40 = vunpack.c.l.b16 %v2493_v42 }
 0x65a   :  { %v2573_v19 = vunpack.c.h.b16 %v2493_v42 }
 0x65b   :  { %v2911_v37 = vunpack.c.l.b16 %v2499_v58  ;;  %v2912_v44 = vunpack.c.h.b16 %v2499_v58  ;;  %v5521_v34 = vpack.c.b16 %v2574_v21, %v2572_v40 }
 0x65c   :  { %v5523_v9 = vpack.c.b16 %v2575_v2, %v2573_v19 }
 0x65d   :  { %v2179_v50 = vpop.f32.mrf.mxu2 }
 0x65e   :  { %v2228_v17 = vpop.f32.mrf.mxu3  ;;  %v2180_v22 = vadd.f32 %v2179_v50, %v2130_v41  ;;  %v5513_v57 = vpop.f32.mrf.mxu0 }
 0x65f   :  { %v2278_v28 = vadd.f32 %v2277_v62, %v2228_v17  ;;  %2605 = vmatpush.bf16.xpose.msrb.mxu0 %v5507_v46  ;;  %2634 = vmatpush.bf16.xpose.msrb.mxu2 %v5509_v7 }
 0x661   :  { %v2500_v12 = vpack.c.bf16 %v2278_v28, %v2180_v22  ;;  %v5515_v43 = vpop.f32.mrf.mxu1  ;;  %2328 = vmatmul.bf16.gmra.mxu0 %v5431_v47 }
 0x662   :  { %2377 = vmatmul.bf16.gmra.mxu2 %v5435_v54 }
 0x663   :  { %v2913_v29 = vunpack.c.l.b16 %v2500_v12  ;;  %v2914_v61 = vunpack.c.h.b16 %v2500_v12  ;;  %2426 = vmatmul.bf16.gmra.mxu3 %v5431_v47 }
 0x664   :  { %2475 = vmatmul.bf16.gmra.mxu1 %v5435_v54 }
 0x665   :  { %v5525_v51 = vpack.c.b16 %v2913_v29, %v2911_v37  ;;  %v5527_v25 = vpack.c.b16 %v2914_v61, %v2912_v44  ;;  %v5529_v60 = vpop.f32.mrf.mxu2 }
 0x666   :  { %v5531_v48 = vpop.f32.mrf.mxu3  ;;  %v2135_v52 = vpop.f32.mrf.mxu0 }
 0x667   :  { %2606 = vmatpush.bf16.xpose.msrb.mxu0 %v5521_v34  ;;  %2635 = vmatpush.bf16.xpose.msrb.mxu2 %v5523_v9 }
 0x669   :  { %v2282_v47 = vpop.f32.mrf.mxu1 }
 0x66d   :  { %v2184_v10 = vpop.f32.mrf.mxu2 }
 0x66e   :  { %v2233_v54 = vpop.f32.mrf.mxu3  ;;  %v2138_v55 = vpop.f32.mrf.mxu0 }
 0x66f   :  { %2607 = vmatpush.bf16.xpose.msrb.mxu0 %v5477_v1  ;;  %2636 = vmatpush.bf16.xpose.msrb.mxu2 %v5479_v26 }
 0x671   :  { %v2285_v45 = vpop.f32.mrf.mxu1  ;;  %2333 = vmatmul.bf16.gmra.mxu0 %v5443_v18 }
 0x672   :  { %2382 = vmatmul.bf16.gmra.mxu2 %v5447_v63 }
 0x673   :  { %2431 = vmatmul.bf16.gmra.mxu3 %v5443_v18 }
 0x674   :  { %2480 = vmatmul.bf16.gmra.mxu1 %v5447_v63 }
 0x675   :  { %v2187_v41 = vpop.f32.mrf.mxu2 }
 0x676   :  { %v2236_v16 = vpop.f32.mrf.mxu3  ;;  %v2140_v11 = vpop.f32.mrf.mxu0  ;;  %v2188_v19 = vadd.f32 %v2187_v41, %v2138_v55 }
 0x677   :  { %v2286_v37 = vadd.f32 %v2285_v45, %v2236_v16 }
 0x679   :  { %v2287_v15 = vpop.f32.mrf.mxu1  ;;  %v2503_v45 = vpack.c.bf16 %v2286_v37, %v2188_v19 }
 0x67d   :  { %v2189_v5 = vpop.f32.mrf.mxu2 }
 0x67e   :  { %v2238_v58 = vpop.f32.mrf.mxu3  ;;  %v2143_v62 = vpop.f32.mrf.mxu0  ;;  %v2190_v2 = vadd.f32 %v2189_v5, %v2140_v11 }
 0x67f   :  { %v2288_v12 = vadd.f32 %v2287_v15, %v2238_v58 }
 0x681   :  { %v2290_v32 = vpop.f32.mrf.mxu1  ;;  %2338 = vmatmul.bf16.gmra.mxu0 %v5455_v3  ;;  %v2504_v11 = vpack.c.bf16 %v2288_v12, %v2190_v2 }
 0x682   :  { %2387 = vmatmul.bf16.gmra.mxu2 %v5459_v33 }
 0x683   :  { %2436 = vmatmul.bf16.gmra.mxu3 %v5455_v3  ;;  %v1761_v3 = vld [vmem:[%s6022_s9 + $0x6] sm:$0x3] }
 0x684   :  { %2485 = vmatmul.bf16.gmra.mxu1 %v5459_v33  ;;  %v5552_v15 = vperm.slane %v1761_v3, 1 }
 0x685   :  { %v2192_v4 = vpop.f32.mrf.mxu2 }
 0x686   :  { %v2241_v18 = vpop.f32.mrf.mxu3  ;;  %v2145_v20 = vpop.f32.mrf.mxu0  ;;  %v2193_v56 = vadd.f32 %v2192_v4, %v2143_v62 }
 0x687   :  { %v2291_v14 = vadd.f32 %v2290_v32, %v2241_v18  ;;  %v5550_v32 = vperm.slane %v1761_v3, 0  ;;  %v2283_v18 = vadd.f32 %v2282_v47, %v2233_v54 }
 0x689   :  { %v2292_v63 = vpop.f32.mrf.mxu1  ;;  %v2505_v17 = vpack.c.bf16 %v2291_v14, %v2193_v56 }
 0x68b   :  { %v2923_v44 = vunpack.c.l.b16 %v2505_v17  ;;  %v2924_v29 = vunpack.c.h.b16 %v2505_v17  ;;  %v2281_v17 = vadd.f32 %v5515_v43, %v5531_v48 }
 0x68d   :  { %v2194_v42 = vpop.f32.mrf.mxu2 }
 0x68e   :  { %v2243_v50 = vpop.f32.mrf.mxu3  ;;  %v2195_v22 = vadd.f32 %v2194_v42, %v2145_v20  ;;  %v2304_v21 = vpop.f32.mrf.mxu0  ;;  %v2921_v20 = vunpack.c.l.b16 %v2504_v11 }
 0x68f   :  { %v2293_v28 = vadd.f32 %v2292_v63, %v2243_v50  ;;  %v2922_v63 = vunpack.c.h.b16 %v2504_v11  ;;  %v2183_v50 = vadd.f32 %v5529_v60, %v5513_v57 }
 0x691   :  { %v2506_v40 = vpack.c.bf16 %v2293_v28, %v2195_v22  ;;  %v2451_v33 = vpop.f32.mrf.mxu1  ;;  %2608 = vmatmul.bf16.vlgmr.msrb.gmra.mxu0 %v5477_v1  ;;  %v2919_v22 = vunpack.c.l.b16 %v2503_v45  ;;  %v2920_v28 = vunpack.c.h.b16 %v2503_v45  ;;  %v2501_v12 = vpack.c.bf16 %v2281_v17, %v2183_v50 }
 0x692   :  { %2637 = vmatmul.bf16.vlgmr.msrb.gmra.mxu2 %v5479_v26  ;;  %v2185_v26 = vadd.f32 %v2184_v10, %v2135_v52 }
 0x693   :  { %v2925_v61 = vunpack.c.l.b16 %v2506_v40  ;;  %v2926_v62 = vunpack.c.h.b16 %v2506_v40  ;;  %v5572_v47 = vpack.c.b16 %v2921_v20, %v2919_v22  ;;  %v5574_v10 = vpack.c.b16 %v2922_v63, %v2920_v28 }
 0x694   :  { %v2502_v52 = vpack.c.bf16 %v2283_v18, %v2185_v26  ;;  %v2915_v40 = vunpack.c.l.b16 %v2501_v12  ;;  %v2916_v3 = vunpack.c.h.b16 %v2501_v12 }
 0x695   :  { %v5554_v5 = vpack.c.b16 %v2925_v61, %v2923_v44  ;;  %v5556_v58 = vpack.c.b16 %v2926_v62, %v2924_v29  ;;  %v2353_v4 = vpop.f32.mrf.mxu2 }
 0x696   :  { %v2402_v55 = vpop.f32.mrf.mxu3  ;;  %v2354_v41 = vadd.f32 %v2353_v4, %v2304_v21  ;;  %v5560_v16 = vpop.f32.mrf.mxu0  ;;  %v2917_v60 = vunpack.c.l.b16 %v2502_v52  ;;  %v2918_v43 = vunpack.c.h.b16 %v2502_v52 }
 0x697   :  { %v2452_v1 = vadd.f32 %v2451_v33, %v2402_v55  ;;  %2947 = vmatpush.bf16.xpose.msra.mxu0 %v5554_v5  ;;  %2976 = vmatpush.bf16.xpose.msra.mxu2 %v5556_v58 }
 0x698   :  { %v2512_v56 = vadd.f32 %v5550_v32, %v2354_v41  ;;  %v5582_v33 = vpack.c.b16 %v2917_v60, %v2915_v40  ;;  %v5584_v19 = vpack.c.b16 %v2918_v43, %v2916_v3 }
 0x699   :  { %v2513_v14 = vadd.f32 %v5552_v15, %v2452_v1  ;;  %v5564_v42 = vpop.f32.mrf.mxu1 }
 0x69b   :  { %v5570_v21 = vpack.c.bf16 %v2513_v14, %v2512_v56 }
 0x69d   :  { %v2355_v54 = vpop.f32.mrf.mxu2 }
 0x69e   :  { %v5576_v2 = vpop.f32.mrf.mxu3  ;;  %v2309_v57 = vpop.f32.mrf.mxu0 }
 0x69f   :  { %2948 = vmatpush.bf16.xpose.msra.mxu0 %v5572_v47  ;;  %2977 = vmatpush.bf16.xpose.msra.mxu2 %v5574_v10 }
 0x6a1   :  { %v2456_v48 = vpop.f32.mrf.mxu1  ;;  %2613 = vmatmul.bf16.gmra.mxu0 %v5521_v34 }
 0x6a2   :  { %2642 = vmatmul.bf16.gmra.mxu2 %v5523_v9 }
 0x6a5   :  { %v2358_v37 = vpop.f32.mrf.mxu2 }
 0x6a6   :  { %v2407_v44 = vpop.f32.mrf.mxu3  ;;  %v2311_v29 = vpop.f32.mrf.mxu0 }
 0x6a7   :  { %2949 = vmatpush.bf16.xpose.msra.mxu0 %v5582_v33  ;;  %2978 = vmatpush.bf16.xpose.msra.mxu2 %v5584_v19 }
 0x6a9   :  { %v2458_v61 = vpop.f32.mrf.mxu1 }
 0x6ad   :  { %v2360_v62 = vpop.f32.mrf.mxu2 }
 0x6ae   :  { %v2409_v11 = vpop.f32.mrf.mxu3  ;;  %v2314_v34 = vpop.f32.mrf.mxu0  ;;  %v2361_v43 = vadd.f32 %v2360_v62, %v2311_v29 }
 0x6af   :  { %2950 = vmatpush.bf16.xpose.msra.mxu0 %v5525_v51  ;;  %2979 = vmatpush.bf16.xpose.msra.mxu2 %v5527_v25  ;;  %v2459_v40 = vadd.f32 %v2458_v61, %v2409_v11  ;;  %v2454_v11 = vadd.f32 %v5564_v42, %v5576_v2 }
 0x6b1   :  { %v2461_v9 = vpop.f32.mrf.mxu1  ;;  %2618 = vmatmul.bf16.gmra.mxu0 %v5507_v46 }
 0x6b2   :  { %2647 = vmatmul.bf16.gmra.mxu2 %v5509_v7 }
 0x6b5   :  { %v2363_v4 = vpop.f32.mrf.mxu2 }
 0x6b6   :  { %v2412_v55 = vpop.f32.mrf.mxu3  ;;  %v2316_v45 = vpop.f32.mrf.mxu0  ;;  %v2364_v28 = vadd.f32 %v2363_v4, %v2314_v34  ;;  %v2457_v34 = vadd.f32 %v2456_v48, %v2407_v44 }
 0x6b7   :  { %v2462_v52 = vadd.f32 %v2461_v9, %v2412_v55 }
 0x6b8   :  { %v2520_v9 = vadd.f32 %v5550_v32, %v2364_v28  ;;  %v2517_v44 = vadd.f32 %v5552_v15, %v2457_v34 }
 0x6b9   :  { %v2463_v41 = vpop.f32.mrf.mxu1  ;;  %v2521_v4 = vadd.f32 %v5552_v15, %v2462_v52 }
 0x6bd   :  { %v2365_v1 = vpop.f32.mrf.mxu2 }
 0x6be   :  { %v2414_v26 = vpop.f32.mrf.mxu3  ;;  %v2319_v18 = vpop.f32.mrf.mxu0  ;;  %v2366_v22 = vadd.f32 %v2365_v1, %v2316_v45  ;;  %v2548_v1 = vpack.c.bf16 %v2521_v4, %v2520_v9 }
 0x6bf   :  { %v2464_v7 = vadd.f32 %v2463_v41, %v2414_v26  ;;  %v2359_v41 = vadd.f32 %v2358_v37, %v2309_v57 }
 0x6c1   :  { %v2466_v20 = vpop.f32.mrf.mxu1  ;;  %2623 = vmatmul.bf16.gmra.mxu0 %v5497_v8  ;;  %v2522_v8 = vadd.f32 %v5550_v32, %v2366_v22  ;;  %v2516_v37 = vadd.f32 %v5550_v32, %v2359_v41 }
 0x6c2   :  { %2652 = vmatmul.bf16.gmra.mxu2 %v5499_v39  ;;  %v2523_v39 = vadd.f32 %v5552_v15, %v2464_v7 }
 0x6c5   :  { %v2368_v63 = vpop.f32.mrf.mxu2 }
 0x6c6   :  { %v2417_v56 = vpop.f32.mrf.mxu3  ;;  %v2321_v14 = vpop.f32.mrf.mxu0  ;;  %v2369_v50 = vadd.f32 %v2368_v63, %v2319_v18  ;;  %v2356_v18 = vadd.f32 %v2355_v54, %v5560_v16  ;;  %v2518_v16 = vadd.f32 %v5550_v32, %v2361_v43  ;;  %v2549_v54 = vpack.c.bf16 %v2523_v39, %v2522_v8 }
 0x6c7   :  { %v2467_v17 = vadd.f32 %v2466_v20, %v2417_v56  ;;  %v2793_v8 = vunpack.c.l.b16 %v2548_v1  ;;  %v2794_v39 = vunpack.c.h.b16 %v2548_v1 }
 0x6c8   :  { %v2524_v12 = vadd.f32 %v5550_v32, %v2369_v50  ;;  %v2514_v48 = vadd.f32 %v5550_v32, %v2356_v18  ;;  %v2796_v22 = vunpack.c.h.b16 %v2549_v54 }
 0x6c9   :  { %v2468_v46 = vpop.f32.mrf.mxu1  ;;  %v2525_v60 = vadd.f32 %v5552_v15, %v2467_v17 }
 0x6ca   :  { %v2806_v41 = vpack.c.b16 %v2796_v22, %v2794_v39 }
 0x6cb   :  { %v2550_v55 = vpack.c.bf16 %v2525_v60, %v2524_v12  ;;  %v2546_v60 = vpack.c.bf16 %v2517_v44, %v2516_v37 }
 0x6cd   :  { %v2370_v3 = vpop.f32.mrf.mxu2  ;;  %v2797_v26 = vunpack.c.l.b16 %v2550_v55  ;;  %v2798_v56 = vunpack.c.h.b16 %v2550_v55  ;;  %v2789_v9 = vunpack.c.l.b16 %v2546_v60  ;;  %v2790_v4 = vunpack.c.h.b16 %v2546_v60 }
 0x6ce   :  { %v2419_v38 = vpop.f32.mrf.mxu3  ;;  %v2371_v20 = vadd.f32 %v2370_v3, %v2321_v14  ;;  %v2324_v45 = vpop.f32.mrf.mxu0  ;;  %v2515_v14 = vadd.f32 %v5552_v15, %v2454_v11 }
 0x6cf   :  { %v2469_v63 = vadd.f32 %v2468_v46, %v2419_v38  ;;  %v2519_v38 = vadd.f32 %v5552_v15, %v2459_v40 }
 0x6d0   :  { %v2526_v29 = vadd.f32 %v5550_v32, %v2371_v20  ;;  %v2545_v18 = vpack.c.bf16 %v2515_v14, %v2514_v48 }
 0x6d1   :  { %v2527_v61 = vadd.f32 %v5552_v15, %v2469_v63  ;;  %v2471_v62 = vpop.f32.mrf.mxu1  ;;  %2951 = vmatmul.bf16.vlgmr.msra.gmra.mxu0 %v5525_v51  ;;  %v2547_v50 = vpack.c.bf16 %v2519_v38, %v2518_v16  ;;  %v2795_v51 = vunpack.c.l.b16 %v2549_v54  ;;  %v2785_v54 = vunpack.c.l.b16 %v5570_v21 }
 0x6d2   :  { %2980 = vmatmul.bf16.vlgmr.msra.gmra.mxu2 %v5527_v25  ;;  %v2787_v16 = vunpack.c.l.b16 %v2545_v18  ;;  %v2788_v38 = vunpack.c.h.b16 %v2545_v18 }
 0x6d3   :  { %v2551_v57 = vpack.c.bf16 %v2527_v61, %v2526_v29  ;;  %v2791_v20 = vunpack.c.l.b16 %v2547_v50  ;;  %v2792_v34 = vunpack.c.h.b16 %v2547_v50 }
 0x6d4   :  { %v2801_v37 = vpack.c.b16 %v2787_v16, %v2785_v54 }
 0x6d5   :  { %v2799_v42 = vunpack.c.l.b16 %v2551_v57  ;;  %v2800_v2 = vunpack.c.h.b16 %v2551_v57  ;;  %v2373_v17 = vpop.f32.mrf.mxu2  ;;  %v2804_v11 = vpack.c.b16 %v2792_v34, %v2790_v4  ;;  %v2786_v57 = vunpack.c.h.b16 %v5570_v21 }
 0x6d6   :  { %v2422_v46 = vpop.f32.mrf.mxu3  ;;  %v2374_v7 = vadd.f32 %v2373_v17, %v2324_v45  ;;  %v5613_v28 = vpop.f32.mrf.mxu0  ;;  %v2805_v45 = vpack.c.b16 %v2795_v51, %v2793_v8 }
 0x6d7   :  { %v2472_v25 = vadd.f32 %v2471_v62, %v2422_v46  ;;  %v2807_v52 = vpack.c.b16 %v2799_v42, %v2797_v26  ;;  %v2808_v12 = vpack.c.b16 %v2800_v2, %v2798_v56  ;;  %v2803_v62 = vpack.c.b16 %v2791_v20, %v2789_v9 }
 0x6d8   :  { %v2528_v43 = vadd.f32 %v5550_v32, %v2374_v7  ;;  %v2802_v44 = vpack.c.b16 %v2788_v38, %v2786_v57 }
 0x6d9   :  { %v2529_v40 = vadd.f32 %v5552_v15, %v2472_v25  ;;  %2833 = vmatpush.bf16.msrb.mxu3 %v2807_v52  ;;  %2862 = vmatpush.bf16.msrb.mxu1 %v2808_v12  ;;  %v5617_v3 = vpop.f32.mrf.mxu1 }
 0x6db   :  { %v5619_v63 = vpack.c.bf16 %v2529_v40, %v2528_v43 }
 0x6dd   :  { %2834 = vmatpush.bf16.msrb.mxu3 %v2805_v45  ;;  %2863 = vmatpush.bf16.msrb.mxu1 %v2806_v41  ;;  %v5621_v55 = vpop.f32.mrf.mxu2 }
 0x6de   :  { %v5623_v29 = vpop.f32.mrf.mxu3  ;;  %v2329_v61 = vpop.f32.mrf.mxu0 }
 0x6e1   :  { %2835 = vmatpush.bf16.msrb.mxu3 %v2803_v62  ;;  %2864 = vmatpush.bf16.msrb.mxu1 %v2804_v11  ;;  %v2476_v48 = vpop.f32.mrf.mxu1 }
 0x6e2   :  { %2956 = vmatmul.bf16.gmra.mxu0 %v5582_v33  ;;  %2985 = vmatmul.bf16.gmra.mxu2 %v5584_v19 }
 0x6e5   :  { %2836 = vmatpush.bf16.msrb.mxu3 %v2801_v37  ;;  %2865 = vmatpush.bf16.msrb.mxu1 %v2802_v44  ;;  %v2378_v1 = vpop.f32.mrf.mxu2 }
 0x6e6   :  { %v2427_v26 = vpop.f32.mrf.mxu3  ;;  %v2331_v56 = vpop.f32.mrf.mxu0  ;;  %v2379_v38 = vadd.f32 %v2378_v1, %v2329_v61 }
 0x6e7   :  { %v2477_v54 = vadd.f32 %v2476_v48, %v2427_v26 }
 0x6e8   :  { %v2532_v26 = vadd.f32 %v5550_v32, %v2379_v38 }
 0x6e9   :  { %v2478_v42 = vpop.f32.mrf.mxu1 }
 0x6ed   :  { %v2380_v2 = vpop.f32.mrf.mxu2 }
 0x6ee   :  { %v2429_v14 = vpop.f32.mrf.mxu3  ;;  %v2334_v50 = vpop.f32.mrf.mxu0  ;;  %v2381_v41 = vadd.f32 %v2380_v2, %v2331_v56  ;;  %v2376_v2 = vadd.f32 %v5621_v55, %v5613_v28 }
 0x6ef   :  { %v2479_v34 = vadd.f32 %v2478_v42, %v2429_v14  ;;  %v2474_v14 = vadd.f32 %v5617_v3, %v5623_v29 }
 0x6f0   :  { %v2530_v28 = vadd.f32 %v5550_v32, %v2376_v2 }
 0x6f1   :  { %v2481_v17 = vpop.f32.mrf.mxu1  ;;  %v2535_v61 = vadd.f32 %v5552_v15, %v2479_v34  ;;  %v2531_v55 = vadd.f32 %v5552_v15, %v2474_v14 }
 0x6f2   :  { %2961 = vmatmul.bf16.gmra.mxu0 %v5572_v47  ;;  %2990 = vmatmul.bf16.gmra.mxu2 %v5574_v10 }
 0x6f5   :  { %v2383_v21 = vpop.f32.mrf.mxu2 }
 0x6f6   :  { %v2432_v33 = vpop.f32.mrf.mxu3  ;;  %v2336_v46 = vpop.f32.mrf.mxu0  ;;  %v2384_v10 = vadd.f32 %v2383_v21, %v2334_v50  ;;  %v2534_v50 = vadd.f32 %v5550_v32, %v2381_v41 }
 0x6f7   :  { %v2482_v39 = vadd.f32 %v2481_v17, %v2432_v33  ;;  %v2533_v17 = vadd.f32 %v5552_v15, %v2477_v54 }
 0x6f8   :  { %v2536_v57 = vadd.f32 %v5550_v32, %v2384_v10  ;;  %v2555_v3 = vpack.c.bf16 %v2535_v61, %v2534_v50 }
 0x6f9   :  { %v2483_v19 = vpop.f32.mrf.mxu1  ;;  %v2537_v37 = vadd.f32 %v5552_v15, %v2482_v39 }
 0x6fa   :  { %v3134_v39 = vunpack.c.l.b16 %v2555_v3 }
 0x6fb   :  { %v2556_v21 = vpack.c.bf16 %v2537_v37, %v2536_v57 }
 0x6fd   :  { %v2385_v51 = vpop.f32.mrf.mxu2 }
 0x6fe   :  { %v2434_v22 = vpop.f32.mrf.mxu3  ;;  %v2339_v7 = vpop.f32.mrf.mxu0  ;;  %v2386_v47 = vadd.f32 %v2385_v51, %v2336_v46 }
 0x6ff   :  { %v2484_v8 = vadd.f32 %v2483_v19, %v2434_v22 }
 0x701   :  { %v2486_v25 = vpop.f32.mrf.mxu1  ;;  %v2539_v4 = vadd.f32 %v5552_v15, %v2484_v8 }
 0x702   :  { %2966 = vmatmul.bf16.gmra.mxu0 %v5554_v5  ;;  %2995 = vmatmul.bf16.gmra.mxu2 %v5556_v58  ;;  %v2538_v58 = vadd.f32 %v5550_v32, %v2386_v47  ;;  %v2553_v47 = vpack.c.bf16 %v2531_v55, %v2530_v28 }
 0x704   :  { %v2557_v48 = vpack.c.bf16 %v2539_v4, %v2538_v58  ;;  %v3128_v58 = vunpack.c.l.b16 %v5619_v63  ;;  %v3129_v4 = vunpack.c.h.b16 %v5619_v63 }
 0x705   :  { %v2388_v52 = vpop.f32.mrf.mxu2 }
 0x706   :  { %v2437_v12 = vpop.f32.mrf.mxu3  ;;  %v2341_v60 = vpop.f32.mrf.mxu0  ;;  %v2389_v43 = vadd.f32 %v2388_v52, %v2339_v7  ;;  %v3138_v52 = vunpack.c.l.b16 %v2557_v48 }
 0x707   :  { %v2487_v40 = vadd.f32 %v2486_v25, %v2437_v12  ;;  %v3139_v12 = vunpack.c.h.b16 %v2557_v48 }
 0x708   :  { %v2540_v20 = vadd.f32 %v5550_v32, %v2389_v43  ;;  %v3136_v43 = vunpack.c.l.b16 %v2556_v21 }
 0x709   :  { %v2488_v18 = vpop.f32.mrf.mxu1  ;;  %v2541_v45 = vadd.f32 %v5552_v15, %v2487_v40  ;;  %v3137_v40 = vunpack.c.h.b16 %v2556_v21 }
 0x70a   :  { %v3148_v8 = vpack.c.b16 %v3138_v52, %v3136_v43 }
 0x70b   :  { %v2558_v44 = vpack.c.bf16 %v2541_v45, %v2540_v20  ;;  %v3149_v10 = vpack.c.b16 %v3139_v12, %v3137_v40 }
 0x70d   :  { %v2390_v5 = vpop.f32.mrf.mxu2  ;;  %v3140_v33 = vunpack.c.l.b16 %v2558_v44  ;;  %v3141_v46 = vunpack.c.h.b16 %v2558_v44 }
 0x70e   :  { %v2439_v9 = vpop.f32.mrf.mxu3  ;;  %v2391_v62 = vadd.f32 %v2390_v5, %v2341_v60  ;;  %v5637_v16 = vpop.f32.mrf.mxu0  ;;  %v2554_v60 = vpack.c.bf16 %v2533_v17, %v2532_v26  ;;  %v3130_v5 = vunpack.c.l.b16 %v2553_v47 }
 0x70f   :  { %v2489_v11 = vadd.f32 %v2488_v18, %v2439_v9  ;;  %v3135_v18 = vunpack.c.h.b16 %v2555_v3  ;;  %v3131_v9 = vunpack.c.h.b16 %v2553_v47 }
 0x710   :  { %v2542_v56 = vadd.f32 %v5550_v32, %v2391_v62  ;;  %v3132_v32 = vunpack.c.l.b16 %v2554_v60  ;;  %v3144_v62 = vpack.c.b16 %v3130_v5, %v3128_v58 }
 0x711   :  { %v2543_v42 = vadd.f32 %v5552_v15, %v2489_v11  ;;  %v3133_v15 = vunpack.c.h.b16 %v2554_v60  ;;  %v3145_v11 = vpack.c.b16 %v3131_v9, %v3129_v4 }
 0x712   :  { %v3146_v41 = vpack.c.b16 %v3134_v39, %v3132_v32 }
 0x713   :  { %v2559_v1 = vpack.c.bf16 %v2543_v42, %v2542_v56  ;;  %v3147_v34 = vpack.c.b16 %v3135_v18, %v3133_v15 }
 0x715   :  { %v3142_v19 = vunpack.c.l.b16 %v2559_v1  ;;  %v3143_v51 = vunpack.c.h.b16 %v2559_v1  ;;  %v2638_v29 = vpop.f32.mrf.mxu2 }
 0x716   :  { %v2611_v22 = vpop.f32.mrf.mxu0  ;;  %v2639_v63 = vadd.f32 %v2638_v29, %v5637_v16 }
 0x717   :  { %v3150_v7 = vpack.c.b16 %v3142_v19, %v3140_v33  ;;  %v3151_v25 = vpack.c.b16 %v3143_v51, %v3141_v46 }
 0x719   :  { %3176 = vmatpush.bf16.msra.mxu3 %v3150_v7  ;;  %3205 = vmatpush.bf16.msra.mxu1 %v3151_v25 }
 0x71d   :  { %3177 = vmatpush.bf16.msra.mxu3 %v3148_v8  ;;  %3206 = vmatpush.bf16.msra.mxu1 %v3149_v10  ;;  %v2640_v20 = vpop.f32.mrf.mxu2 }
 0x71e   :  { %v2614_v45 = vpop.f32.mrf.mxu0  ;;  %v2641_v48 = vadd.f32 %v2640_v20, %v2611_v22  ;;  %v2658_v22 = vsel %vm451_vm3, %v2639_v63, -inf }
 0x720   :  { %v2659_v19 = vsel %vm451_vm3, %v2641_v48, -inf }
 0x721   :  { %3178 = vmatpush.bf16.msra.mxu3 %v3146_v41  ;;  %3207 = vmatpush.bf16.msra.mxu1 %v3147_v34 }
 0x725   :  { %3179 = vmatpush.bf16.msra.mxu3 %v3144_v62  ;;  %3208 = vmatpush.bf16.msra.mxu1 %v3145_v11  ;;  %v2643_v38 = vpop.f32.mrf.mxu2 }
 0x726   :  { %v2616_v54 = vpop.f32.mrf.mxu0  ;;  %v2644_v17 = vadd.f32 %v2643_v38, %v2614_v45 }
 0x728   :  { %v2660_v25 = vsel %vm451_vm3, %v2644_v17, -inf }
 0x72d   :  { %v2645_v57 = vpop.f32.mrf.mxu2 }
 0x72e   :  { %v2619_v37 = vpop.f32.mrf.mxu0  ;;  %v2646_v21 = vadd.f32 %v2645_v57, %v2616_v54 }
 0x730   :  { %v2661_v16 = vsel %vm451_vm3, %v2646_v21, -inf }
 0x735   :  { %v2648_v44 = vpop.f32.mrf.mxu2 }
 0x736   :  { %v2621_v56 = vpop.f32.mrf.mxu0  ;;  %v2649_v1 = vadd.f32 %v2648_v44, %v2619_v37 }
 0x738   :  { %v2662_v51 = vsel %vm451_vm3, %v2649_v1, -inf }
 0x739   :  { %v2663_v52 = vmax.f32 %v2658_v22, %v2662_v51 }
 0x73d   :  { %v2650_v42 = vpop.f32.mrf.mxu2 }
 0x73e   :  { %v2624_v2 = vpop.f32.mrf.mxu0  ;;  %v2651_v61 = vadd.f32 %v2650_v42, %v2621_v56 }
 0x740   :  { %v2664_v33 = vsel %vm451_vm3, %v2651_v61, -inf }
 0x741   :  { %v2665_v7 = vmax.f32 %v2659_v19, %v2664_v33 }
 0x743   :  { %v2670_v43 = vmax.f32 %v2663_v52, %v2665_v7 }
 0x745   :  { %v2653_v14 = vpop.f32.mrf.mxu2 }
 0x746   :  { %v2626_v50 = vpop.f32.mrf.mxu0  ;;  %v2654_v26 = vadd.f32 %v2653_v14, %v2624_v2 }
 0x748   :  { %v2666_v28 = vsel %vm451_vm3, %v2654_v26, -inf }
 0x749   :  { %v2667_v12 = vmax.f32 %v2660_v25, %v2666_v28 }
 0x74d   :  { %v2655_v46 = vpop.f32.mrf.mxu2 }
 0x74e   :  { %v2656_v55 = vadd.f32 %v2655_v46, %v2626_v50  ;;  %v5660_v3 = vpop.f32.mrf.mxu0 }
 0x750   :  { %v2668_v29 = vsel %vm451_vm3, %v2656_v55, -inf }
 0x751   :  { %v2669_v60 = vmax.f32 %v2661_v16, %v2668_v29 }
 0x753   :  { %v2671_v40 = vmax.f32 %v2667_v12, %v2669_v60 }
 0x755   :  { %v2672_v47 = vmax.f32 %v2670_v43, %v2671_v40  ;;  %v5666_v8 = vpop.f32.mrf.mxu2 }
 0x756   :  { %v5668_v10 = vpop.f32.mrf.mxu0 }
 0x757   :  { %v2673_v39 = vrot.slane %v2672_v47, 4 }
 0x759   :  { %v2674_v18 = vmax.f32 %v2672_v47, %v2673_v39 }
 0x75b   :  { %v2675_v32 = vrot.slane %v2674_v18, 2 }
 0x75d   :  { %v2676_v15 = vmax.f32 %v2674_v18, %v2675_v32  ;;  %v5670_v20 = vpop.f32.mrf.mxu2 }
 0x75f   :  { %v5672_v45 = vpop.f32.mrf.mxu0  ;;  %v2677_v41 = vrot.slane %v2676_v15, 1 }
 0x761   :  { %v2678_v34 = vmax.f32 %v2676_v15, %v2677_v41 }
 0x763   :  { %v2679_v5 = vsub.f32 %v2639_v63, %v2678_v34  ;;  %v2680_v9 = vsub.f32 %v2641_v48, %v2678_v34  ;;  %v2681_v58 = vsub.f32 %v2644_v17, %v2678_v34  ;;  %v2682_v4 = vsub.f32 %v2646_v21, %v2678_v34 }
 0x764   :  { %v2683_v11 = vsub.f32 %v2649_v1, %v2678_v34  ;;  %v2684_v44 = vsub.f32 %v2651_v61, %v2678_v34  ;;  %v2685_v42 = vsub.f32 %v2654_v26, %v2678_v34  ;;  %v2686_v14 = vsub.f32 %v2656_v55, %v2678_v34 }
 0x765   :  { %v5674_v62 = vpop.f32.mrf.mxu2  ;;  %v2687_v38 = vmul.f32 1.442695, %v2679_v5  ;;  %v2689_v54 = vmul.f32 1.442695, %v2680_v9  ;;  %v2691_v37 = vmul.f32 1.442695, %v2681_v58 }
 0x766   :  { %v2693_v56 = vmul.f32 1.442695, %v2682_v4  ;;  %v2695_v2 = vmul.f32 1.442695, %v2683_v11  ;;  %v2697_v50 = vmul.f32 1.442695, %v2684_v44 }
 0x767   :  { %v2959_v57 = vpop.f32.mrf.mxu0  ;;  %4578 = vpow2.f32 %v2687_v38  ;;  %v2699_v63 = vmul.f32 1.442695, %v2685_v42  ;;  %v2701_v21 = vmul.f32 1.442695, %v2686_v14  ;;  %v2982_v14 = vadd.f32 %v5666_v8, %v5660_v3 }
 0x768   :  { %4580 = vpow2.f32 %v2689_v54 }
 0x769   :  { %4582 = vpow2.f32 %v2691_v37 }
 0x76a   :  { %4584 = vpow2.f32 %v2693_v56  ;;  %v5706_v56 = vadd.f32 %v5670_v20, %v5668_v10 }
 0x76b   :  { %4586 = vpow2.f32 %v2695_v2 }
 0x76c   :  { %4588 = vpow2.f32 %v2697_v50  ;;  %v5716_v50 = vadd.f32 %v5674_v62, %v5672_v45  ;;  %v3002_v20 = vsel %vm451_vm3, %v5706_v56, -inf  ;;  %v3001_v62 = vsel %vm451_vm3, %v2982_v14, -inf }
 0x76d   :  { %v2988_v48 = vpop.f32.mrf.mxu2  ;;  %v5676_v17 = vpop.eup %4578  ;;  %4590 = vpow2.f32 %v2699_v63 }
 0x76e   :  { %v5678_v1 = vpop.eup %4580  ;;  %v2703_v61 = vsel %vm451_vm3, %v5676_v17, 0.0  ;;  %4592 = vpow2.f32 %v2701_v21  ;;  %v5718_v63 = vadd.f32 %v2988_v48, %v2959_v57  ;;  %v3003_v57 = vsel %vm451_vm3, %v5716_v50, -inf }
 0x76f   :  { %v2962_v33 = vpop.f32.mrf.mxu0  ;;  %v4583_v26 = vpop.eup %4582  ;;  %v2704_v46 = vsel %vm451_vm3, %v5678_v1, 0.0 }
 0x770   :  { %v5684_v19 = vpop.eup %4584  ;;  %v2705_v51 = vadd.f32 %v2704_v46, %v2703_v61  ;;  %v2706_v28 = vsel %vm451_vm3, %v4583_v26, 0.0  ;;  %v3004_v48 = vsel %vm451_vm3, %v5718_v63, -inf }
 0x771   :  { %v4587_v55 = vpop.eup %4586  ;;  %v2708_v22 = vsel %vm451_vm3, %v5684_v19, 0.0 }
 0x772   :  { %v2707_v7 = vadd.f32 %v2706_v28, %v2705_v51  ;;  %v5689_v25 = vpop.eup %4588  ;;  %v2710_v52 = vsel %vm451_vm3, %v4587_v55, 0.0 }
 0x773   :  { %v5692_v12 = vpop.eup %4590  ;;  %v2712_v43 = vsel %vm451_vm3, %v5689_v25, 0.0 }
 0x774   :  { %v2709_v29 = vadd.f32 %v2708_v22, %v2707_v7  ;;  %v5696_v40 = vpop.eup %4592  ;;  %v2714_v18 = vsel %vm451_vm3, %v5692_v12, 0.0 }
 0x775   :  { %v2991_v16 = vpop.f32.mrf.mxu2  ;;  %v2716_v15 = vsel %vm451_vm3, %v5696_v40, 0.0 }
 0x776   :  { %v2711_v60 = vadd.f32 %v2710_v52, %v2709_v29  ;;  %v5708_v42 = vadd.f32 %v2991_v16, %v2962_v33 }
 0x777   :  { %v2964_v47 = vpop.f32.mrf.mxu0 }
 0x778   :  { %v2713_v39 = vadd.f32 %v2712_v43, %v2711_v60  ;;  %v3005_v33 = vsel %vm451_vm3, %v5708_v42, -inf }
 0x779   :  { %v3006_v28 = vmax.f32 %v3001_v62, %v3005_v33 }
 0x77a   :  { %v2715_v32 = vadd.f32 %v2714_v18, %v2713_v39 }
 0x77c   :  { %v2717_v34 = vadd.f32 %v2716_v15, %v2715_v32 }
 0x77d   :  { %v2993_v41 = vpop.f32.mrf.mxu2 }
 0x77e   :  { %v2718_v5 = vrot.slane %v2717_v34, 4  ;;  %v5702_v37 = vadd.f32 %v2993_v41, %v2964_v47 }
 0x77f   :  { %v2967_v58 = vpop.f32.mrf.mxu0 }
 0x780   :  { %v2719_v9 = vadd.f32 %v2718_v5, %v2717_v34  ;;  %v3007_v21 = vsel %vm451_vm3, %v5702_v37, -inf }
 0x781   :  { %v3008_v45 = vmax.f32 %v3002_v20, %v3007_v21 }
 0x782   :  { %v2720_v4 = vrot.slane %v2719_v9, 2 }
 0x783   :  { %v3013_v43 = vmax.f32 %v3006_v28, %v3008_v45 }
 0x784   :  { %v2721_v38 = vadd.f32 %v2720_v4, %v2719_v9 }
 0x785   :  { %v2996_v11 = vpop.f32.mrf.mxu2 }
 0x786   :  { %v2722_v54 = vrot.slane %v2721_v38, 1  ;;  %v5710_v2 = vadd.f32 %v2996_v11, %v2967_v58 }
 0x787   :  { %v2969_v61 = vpop.f32.mrf.mxu0 }
 0x788   :  { %v2723_v44 = vadd.f32 %v2722_v54, %v2721_v38  ;;  %v3009_v3 = vsel %vm451_vm3, %v5710_v2, -inf }
 0x789   :  { %v3010_v7 = vmax.f32 %v3003_v57, %v3009_v3 }
 0x78a   :  { %4594 = vrcp.f32 %v2723_v44 }
 0x78d   :  { %v2998_v10 = vpop.f32.mrf.mxu2 }
 0x78e   :  { %v5728_v8 = vadd.f32 %v2998_v10, %v2969_v61 }
 0x790   :  { %v3011_v46 = vsel %vm451_vm3, %v5728_v8, -inf  ;;  %v4595_v51 = vpop.eup %4594 }
 0x791   :  { %v3012_v22 = vmax.f32 %v3004_v48, %v3011_v46  ;;  %v5737_v16 = vmul.f32 %v4595_v51, %v4587_v55  ;;  %v2727_v29 = vmul.f32 %v4595_v51, %v4583_v26  ;;  %v2725_v52 = vmul.f32 %v4595_v51, %v5676_v17 }
 0x792   :  { %v2726_v60 = vmul.f32 %v4595_v51, %v5678_v1  ;;  %v2730_v17 = vmul.f32 %v4595_v51, %v5689_v25  ;;  %v2728_v1 = vmul.f32 %v4595_v51, %v5684_v19  ;;  %v5753_v38 = vmul.f32 %v4595_v51, %v5696_v40 }
 0x793   :  { %v3014_v47 = vmax.f32 %v3010_v7, %v3012_v22  ;;  %v2745_v39 = vsel %vm451_vm3, %v5737_v16, 0.0  ;;  %v2739_v18 = vsel %vm451_vm3, %v2727_v29, 0.0  ;;  %v2733_v32 = vsel %vm451_vm3, %v2725_v52, 0.0 }
 0x794   :  { %v2773_v15 = vpack.c.bf16 %v2726_v60, %v2725_v52  ;;  %2746 = vadd.xlane.f32.xlu2 %v2745_v39  ;;  %2740 = vadd.xlane.f32.xlu1 %v2739_v18  ;;  %v2748_v5 = vsel %vm451_vm3, %v2730_v17, 0.0  ;;  %v2742_v9 = vsel %vm451_vm3, %v2728_v1, 0.0  ;;  %v2736_v4 = vsel %vm451_vm3, %v2726_v60, 0.0 }
 0x795   :  { %v3015_v41 = vmax.f32 %v3013_v43, %v3014_v47  ;;  %2734 = vadd.xlane.f32.xlu0 %v2733_v32  ;;  %v2731_v25 = vmul.f32 %v4595_v51, %v5692_v12  ;;  %v2754_v61 = vsel %vm451_vm3, %v5753_v38, 0.0  ;;  %v2774_v10 = vpack.c.bf16 %v2728_v1, %v2727_v29 }
 0x796   :  { %4219 = vmatmul.msk.bf16.vlgmr.msrb.gmra.mxu3 %vm451_vm3, %v2773_v15  ;;  %4223 = vmatmul.msk.bf16.vlgmr.msrb.gmra.mxu1 %vm451_vm3, %v2773_v15  ;;  %v2775_v60 = vpack.c.bf16 %v2730_v17, %v5737_v16 }
 0x797   :  { %v3016_v26 = vrot.slane %v3015_v41, 4  ;;  %v2751_v33 = vsel %vm451_vm3, %v2731_v25, 0.0 }
 0x799   :  { %v3017_v55 = vmax.f32 %v3015_v41, %v3016_v26 }
 0x79b   :  { %v3018_v34 = vrot.slane %v3017_v55, 2 }
 0x79c   :  { %2749 = vadd.xlane.f32.xlu2 %v2748_v5  ;;  %2743 = vadd.xlane.f32.xlu1 %v2742_v9 }
 0x79d   :  { %v3019_v58 = vmax.f32 %v3017_v55, %v3018_v34  ;;  %2737 = vadd.xlane.f32.xlu0 %v2736_v4  ;;  %v2776_v4 = vpack.c.bf16 %v5753_v38, %v2731_v25  ;;  %v4357_v38 = vld [vmem:[#allocation3 + $0xf0] sm:$0xf]  ;;  %v4491_v25 = vld [vmem:[#allocation3 + $0xf4] sm:$0xf0] }
 0x79f   :  { %v3020_v11 = vrot.slane %v3019_v58, 1 }
 0x7a1   :  { %v3021_v54 = vmax.f32 %v3019_v58, %v3020_v11 }
 0x7a3   :  { %v3022_v19 = vsub.f32 %v2982_v14, %v3021_v54  ;;  %v3023_v44 = vsub.f32 %v5706_v56, %v3021_v54  ;;  %v3024_v21 = vsub.f32 %v5716_v50, %v3021_v54  ;;  %v3025_v20 = vsub.f32 %v5718_v63, %v3021_v54 }
 0x7a4   :  { %2755 = vadd.xlane.f32.xlu1 %v2754_v61  ;;  %v3026_v40 = vsub.f32 %v5708_v42, %v3021_v54  ;;  %v3027_v56 = vsub.f32 %v5702_v37, %v3021_v54  ;;  %v3028_v50 = vsub.f32 %v5710_v2, %v3021_v54  ;;  %v3029_v62 = vsub.f32 %v5728_v8, %v3021_v54 }
 0x7a5   :  { %v3030_v3 = vmul.f32 1.442695, %v3022_v19  ;;  %v3032_v45 = vmul.f32 1.442695, %v3023_v44  ;;  %2752 = vadd.xlane.f32.xlu0 %v2751_v33  ;;  %v3034_v12 = vmul.f32 1.442695, %v3024_v21 }
 0x7a6   :  { %4220 = vmatmul.msk.bf16.gmra.mxu3 %vm451_vm3, %v2774_v10  ;;  %4224 = vmatmul.msk.bf16.gmra.mxu1 %vm451_vm3, %v2774_v10  ;;  %v3036_v14 = vmul.f32 1.442695, %v3025_v20  ;;  %v3038_v63 = vmul.f32 1.442695, %v3026_v40  ;;  %v3040_v42 = vmul.f32 1.442695, %v3027_v56 }
 0x7a7   :  { %4596 = vpow2.f32 %v3030_v3  ;;  %v3042_v57 = vmul.f32 1.442695, %v3028_v50  ;;  %v3044_v51 = vmul.f32 1.442695, %v3029_v62  ;;  %v4359_v50 = vld [vmem:[#allocation3 + $0xf8] sm:$0xf0] }
 0x7a8   :  { %4598 = vpow2.f32 %v3032_v45  ;;  %v4490_v45 = vld [vmem:[#allocation3 + $0xf4] sm:$0xf] }
 0x7a9   :  { %4600 = vpow2.f32 %v3034_v12  ;;  %v4362_v62 = vor.u32 %v4490_v45, %v4359_v50  ;;  %v4483_v50 = vld [vmem:[#allocation3 + $0xb4] sm:$0xf0] }
 0x7aa   :  { %4602 = vpow2.f32 %v3036_v14  ;;  %v4358_v14 = vor.u32 %v4491_v25, %v4357_v38  ;;  %v4279_v25 = vld [vmem:[#allocation3 + $0x58] sm:$0xf0] }
 0x7ab   :  { %4604 = vpow2.f32 %v3038_v63  ;;  %3606 = vmatpush.bf16.msrb.mxu1 %v4362_v62 }
 0x7ac   :  { %4606 = vpow2.f32 %v3040_v42  ;;  %3508 = vmatpush.bf16.msrb.mxu2 %v4358_v14  ;;  %v4325_v14 = vld [vmem:[#allocation3 + $0xb0] sm:$0xf] }
 0x7ad   :  { %v4597_v48 = vpop.eup %4596  ;;  %4608 = vpow2.f32 %v3042_v57  ;;  %v4326_v62 = vor.u32 %v4483_v50, %v4325_v14  ;;  %v4237_v14 = vld [vmem:[#allocation3] sm:$0xf]  ;;  %v4461_v50 = vld [vmem:[#allocation3 + $0x4] sm:$0xf0] }
 0x7ae   :  { %v4599_v46 = vpop.eup %4598  ;;  %v3046_v28 = vsel %vm451_vm3, %v4597_v48, 0.0  ;;  %4610 = vpow2.f32 %v3044_v51 }
 0x7af   :  { %v4601_v37 = vpop.eup %4600  ;;  %v3047_v7 = vsel %vm451_vm3, %v4599_v46, 0.0 }
 0x7b0   :  { %v4603_v22 = vpop.eup %4602  ;;  %v3048_v2 = vadd.f32 %v3047_v7, %v3046_v28  ;;  %v3049_v29 = vsel %vm451_vm3, %v4601_v37, 0.0 }
 0x7b1   :  { %v4605_v52 = vpop.eup %4604  ;;  %v3051_v43 = vsel %vm451_vm3, %v4603_v22, 0.0 }
 0x7b2   :  { %v3050_v8 = vadd.f32 %v3049_v29, %v3048_v2  ;;  %v4607_v47 = vpop.eup %4606  ;;  %v3053_v18 = vsel %vm451_vm3, %v4605_v52, 0.0  ;;  %v4489_v2 = vld [vmem:[#allocation3 + $0xe4] sm:$0xf0]  ;;  %v4488_v29 = vld [vmem:[#allocation3 + $0xe4] sm:$0xf] }
 0x7b3   :  { %v4609_v32 = vpop.eup %4608  ;;  %v3055_v41 = vsel %vm451_vm3, %v4607_v47, 0.0 }
 0x7b4   :  { %v3052_v39 = vadd.f32 %v3051_v43, %v3050_v8  ;;  %v4611_v26 = vpop.eup %4610  ;;  %v3057_v55 = vsel %vm451_vm3, %v4609_v32, 0.0  ;;  %v4351_v8 = vld [vmem:[#allocation3 + $0xe8] sm:$0xf0]  ;;  %v4293_v43 = vld [vmem:[#allocation3 + $0x70] sm:$0xf] }
 0x7b5   :  { %v3059_v16 = vsel %vm451_vm3, %v4611_v26, 0.0 }
 0x7b6   :  { %4221 = vmatmul.msk.bf16.gmra.mxu3 %vm451_vm3, %v2775_v60  ;;  %4225 = vmatmul.msk.bf16.gmra.mxu1 %vm451_vm3, %v2775_v60  ;;  %v3054_v15 = vadd.f32 %v3053_v18, %v3052_v39  ;;  %v4354_v60 = vor.u32 %v4488_v29, %v4351_v8  ;;  %v4474_v39 = vld [vmem:[#allocation3 + $0x74] sm:$0xf]  ;;  %v4319_v8 = vld [vmem:[#allocation3 + $0xa8] sm:$0xf0] }
 0x7b8   :  { %v3056_v1 = vadd.f32 %v3055_v41, %v3054_v15  ;;  %3607 = vmatpush.bf16.msrb.mxu1 %v4354_v60  ;;  %v4341_v41 = vld [vmem:[#allocation3 + $0xd0] sm:$0xf] }
 0x7ba   :  { %v3058_v34 = vadd.f32 %v3057_v55, %v3056_v1  ;;  %v4486_v1 = vld [vmem:[#allocation3 + $0xd4] sm:$0xf] }
 0x7bc   :  { %v3060_v17 = vadd.f32 %v3059_v16, %v3058_v34  ;;  %v4343_v34 = vld [vmem:[#allocation3 + $0xd8] sm:$0xf0]  ;;  %v4285_v16 = vld [vmem:[#allocation3 + $0x60] sm:$0xf] }
 0x7be   :  { %v3061_v5 = vrot.slane %v3060_v17, 4 }
 0x7c0   :  { %v3062_v9 = vadd.f32 %v3061_v5, %v3060_v17  ;;  %v4473_v17 = vld [vmem:[#allocation3 + $0x64] sm:$0xf0]  ;;  %v4346_v5 = vor.u32 %v4486_v1, %v4343_v34  ;;  %v4478_v1 = vld [vmem:[#allocation3 + $0x94] sm:$0xf]  ;;  %v4311_v34 = vld [vmem:[#allocation3 + $0x98] sm:$0xf0] }
 0x7c2   :  { %v3063_v58 = vrot.slane %v3062_v9, 2  ;;  %3608 = vmatpush.bf16.msrb.mxu1 %v4346_v5  ;;  %v4465_v5 = vld [vmem:[#allocation3 + $0x24] sm:$0xf0] }
 0x7c4   :  { %v3064_v11 = vadd.f32 %v3063_v58, %v3062_v9  ;;  %v4286_v9 = vor.u32 %v4473_v17, %v4285_v16  ;;  %v4472_v58 = vld [vmem:[#allocation3 + $0x64] sm:$0xf]  ;;  %v4314_v16 = vor.u32 %v4478_v1, %v4311_v34  ;;  %v4253_v17 = vld [vmem:[#allocation3 + $0x20] sm:$0xf] }
 0x7c6   :  { %4222 = vmatmul.msk.bf16.gmra.mxu3 %vm451_vm3, %v2776_v4  ;;  %4226 = vmatmul.msk.bf16.gmra.mxu1 %vm451_vm3, %v2776_v4  ;;  %v3065_v54 = vrot.slane %v3064_v11, 1  ;;  %v4287_v4 = vld [vmem:[#allocation3 + $0x68] sm:$0xf0] }
 0x7c8   :  { %v3066_v19 = vadd.f32 %v3065_v54, %v3064_v11  ;;  %v4333_v11 = vld [vmem:[#allocation3 + $0xc0] sm:$0xf]  ;;  %v4290_v54 = vor.u32 %v4472_v58, %v4287_v4  ;;  %v4254_v58 = vor.u32 %v4465_v5, %v4253_v17  ;;  %v4255_v4 = vld [vmem:[#allocation3 + $0x28] sm:$0xf0] }
 0x7ca   :  { %4612 = vrcp.f32 %v3066_v19  ;;  %v4485_v19 = vld [vmem:[#allocation3 + $0xc4] sm:$0xf0] }
 0x7d0   :  { %v4613_v44 = vpop.eup %4612 }
 0x7d1   :  { %v3070_v21 = vmul.f32 %v4613_v44, %v4601_v37  ;;  %v3069_v61 = vmul.f32 %v4613_v44, %v4599_v46  ;;  %v3068_v10 = vmul.f32 %v4613_v44, %v4597_v48  ;;  %v5787_v12 = vmul.f32 %v4613_v44, %v4607_v47  ;;  %v4475_v47 = vld [vmem:[#allocation3 + $0x74] sm:$0xf0] }
 0x7d2   :  { %v5789_v56 = vmul.f32 %v4613_v44, %v4605_v52  ;;  %v3071_v63 = vmul.f32 %v4613_v44, %v4603_v22  ;;  %v5796_v46 = vmul.f32 %v4613_v44, %v4611_v26  ;;  %v5798_v51 = vmul.f32 %v4613_v44, %v4609_v32  ;;  %v4349_v22 = vld [vmem:[#allocation3 + $0xe0] sm:$0xf]  ;;  %v4295_v32 = vld [vmem:[#allocation3 + $0x78] sm:$0xf0]  ;;  %v4487_v26 = vld [vmem:[#allocation3 + $0xd4] sm:$0xf0] }
 0x7d3   :  { %v3082_v20 = vsel %vm451_vm3, %v3070_v21, 0.0  ;;  %v3079_v33 = vsel %vm451_vm3, %v3069_v61, 0.0  ;;  %v3076_v40 = vsel %vm451_vm3, %v3068_v10, 0.0  ;;  %v3116_v3 = vpack.c.bf16 %v3069_v61, %v3068_v10  ;;  %v4484_v44 = vld [vmem:[#allocation3 + $0xc4] sm:$0xf] }
 0x7d4   :  { %3083 = vadd.xlane.f32.xlu1 %v3082_v20  ;;  %3080 = vadd.xlane.f32.xlu0 %v3079_v33  ;;  %v3091_v42 = vsel %vm451_vm3, %v5787_v12, 0.0  ;;  %v3088_v57 = vsel %vm451_vm3, %v5789_v56, 0.0  ;;  %v3085_v48 = vsel %vm451_vm3, %v3071_v63, 0.0  ;;  %v3097_v28 = vsel %vm451_vm3, %v5796_v46, 0.0  ;;  %v4277_v20 = vld [vmem:[#allocation3 + $0x50] sm:$0xf] }
 0x7d5   :  { %3077 = vadd.xlane.f32.xlu2 %v3076_v40  ;;  %v3117_v37 = vpack.c.bf16 %v3071_v63, %v3070_v21  ;;  %v3094_v7 = vsel %vm451_vm3, %v5798_v51, 0.0  ;;  %v4350_v52 = vor.u32 %v4489_v2, %v4349_v22  ;;  %v4294_v18 = vor.u32 %v4475_v47, %v4293_v43  ;;  %v4335_v21 = vld [vmem:[#allocation3 + $0xc8] sm:$0xf0]  ;;  %v4471_v33 = vld [vmem:[#allocation3 + $0x54] sm:$0xf0] }
 0x7d6   :  { %4227 = vmatmul.msk.bf16.vlgmr.msra.gmra.mxu3 %vm451_vm3, %v3116_v3  ;;  %4231 = vmatmul.msk.bf16.vlgmr.msra.gmra.mxu1 %vm451_vm3, %v3116_v3  ;;  %v4298_v15 = vor.u32 %v4474_v39, %v4295_v32  ;;  %v4342_v55 = vor.u32 %v4487_v26, %v4341_v41  ;;  %v4334_v61 = vor.u32 %v4485_v19, %v4333_v11  ;;  %v4470_v40 = vld [vmem:[#allocation3 + $0x54] sm:$0xf]  ;;  %v4481_v22 = vld [vmem:[#allocation3 + $0xa4] sm:$0xf0]  ;;  %v4261_v43 = vld [vmem:[#allocation3 + $0x30] sm:$0xf] }
 0x7d7   :  { %3509 = vmatpush.bf16.msrb.mxu2 %v4350_v52  ;;  %3459 = vmatpush.bf16.msrb.mxu0 %v4294_v18  ;;  %v4338_v10 = vor.u32 %v4484_v44, %v4335_v21  ;;  %v3118_v3 = vpack.c.bf16 %v5787_v12, %v5789_v56  ;;  %v4278_v38 = vor.u32 %v4471_v33, %v4277_v20  ;;  %v4482_v63 = vld [vmem:[#allocation3 + $0xb4] sm:$0xf]  ;;  %v4468_v12 = vld [vmem:[#allocation3 + $0x44] sm:$0xf]  ;;  %v4467_v47 = vld [vmem:[#allocation3 + $0x34] sm:$0xf0] }
 0x7d8   :  { %3557 = vmatpush.bf16.msrb.mxu3 %v4298_v15  ;;  %v4282_v45 = vor.u32 %v4470_v40, %v4279_v25  ;;  %v4480_v52 = vld [vmem:[#allocation3 + $0xa4] sm:$0xf]  ;;  %v4466_v39 = vld [vmem:[#allocation3 + $0x34] sm:$0xf]  ;;  %v4262_v18 = vor.u32 %v4467_v47, %v4261_v43  ;;  %v4263_v32 = vld [vmem:[#allocation3 + $0x38] sm:$0xf0] }
 0x7d9   :  { %3609 = vmatpush.bf16.msrb.mxu1 %v4338_v10  ;;  %v4322_v60 = vor.u32 %v4480_v52, %v4319_v8  ;;  %v4266_v15 = vor.u32 %v4466_v39, %v4263_v32  ;;  %v4309_v41 = vld [vmem:[#allocation3 + $0x90] sm:$0xf]  ;;  %v4479_v26 = vld [vmem:[#allocation3 + $0x94] sm:$0xf0]  ;;  %v4477_v19 = vld [vmem:[#allocation3 + $0x84] sm:$0xf0] }
 0x7da   :  { %v4476_v44 = vld [vmem:[#allocation3 + $0x84] sm:$0xf]  ;;  %v4245_v20 = vld [vmem:[#allocation3 + $0x10] sm:$0xf]  ;;  %v4463_v33 = vld [vmem:[#allocation3 + $0x14] sm:$0xf0] }
 0x7db   :  { %3510 = vmatpush.bf16.msrb.mxu2 %v4342_v55  ;;  %3460 = vmatpush.bf16.msrb.mxu0 %v4286_v9  ;;  %v4310_v55 = vor.u32 %v4479_v26, %v4309_v41  ;;  %v4464_v9 = vld [vmem:[#allocation3 + $0x24] sm:$0xf]  ;;  %v4462_v40 = vld [vmem:[#allocation3 + $0x14] sm:$0xf]  ;;  %v4247_v25 = vld [vmem:[#allocation3 + $0x18] sm:$0xf0] }
 0x7dc   :  { %3092 = vadd.xlane.f32.xlu1 %v3091_v42  ;;  %3089 = vadd.xlane.f32.xlu0 %v3088_v57  ;;  %v4327_v42 = vld [vmem:[#allocation3 + $0xb8] sm:$0xf0]  ;;  %v4258_v11 = vor.u32 %v4464_v9, %v4255_v4 }
 0x7dd   :  { %3086 = vadd.xlane.f32.xlu2 %v3085_v48  ;;  %3558 = vmatpush.bf16.msrb.mxu3 %v4290_v54  ;;  %v4330_v57 = vor.u32 %v4482_v63, %v4327_v42  ;;  %v4269_v48 = vld [vmem:[#allocation3 + $0x40] sm:$0xf]  ;;  %v4460_v63 = vld [vmem:[#allocation3 + $0x4] sm:$0xf]  ;;  %v4239_v42 = vld [vmem:[#allocation3 + $0x8] sm:$0xf0] }
 0x7de   :  { %v4301_v54 = vld [vmem:[#allocation3 + $0x80] sm:$0xf] }
 0x7df   :  { %3511 = vmatpush.bf16.msrb.mxu2 %v4334_v61  ;;  %3461 = vmatpush.bf16.msrb.mxu0 %v4278_v38  ;;  %v4302_v21 = vor.u32 %v4477_v19, %v4301_v54  ;;  %v4303_v61 = vld [vmem:[#allocation3 + $0x88] sm:$0xf0]  ;;  %v4246_v38 = vor.u32 %v4463_v33, %v4245_v20 }
 0x7e0   :  { %3610 = vmatpush.bf16.msrb.mxu1 %v4330_v57  ;;  %v4306_v10 = vor.u32 %v4476_v44, %v4303_v61 }
 0x7e1   :  { %3559 = vmatpush.bf16.msrb.mxu3 %v4282_v45  ;;  %v4250_v45 = vor.u32 %v4462_v40, %v4247_v25 }
 0x7e3   :  { %3512 = vmatpush.bf16.msrb.mxu2 %v4326_v62  ;;  %v4238_v62 = vor.u32 %v4461_v50, %v4237_v14 }
 0x7e4   :  { %3098 = vadd.xlane.f32.xlu0 %v3097_v28  ;;  %v4469_v28 = vld [vmem:[#allocation3 + $0x44] sm:$0xf0]  ;;  %3611 = vmatpush.bf16.msrb.mxu1 %v4322_v60 }
 0x7e5   :  { %3095 = vadd.xlane.f32.xlu2 %v3094_v7  ;;  %v4270_v56 = vor.u32 %v4469_v28, %v4269_v48  ;;  %v4317_v7 = vld [vmem:[#allocation3 + $0xa0] sm:$0xf]  ;;  %v4242_v48 = vor.u32 %v4460_v63, %v4239_v42 }
 0x7e6   :  { %4228 = vmatmul.msk.bf16.gmra.mxu3 %vm451_vm3, %v3117_v37  ;;  %4232 = vmatmul.msk.bf16.gmra.mxu1 %vm451_vm3, %v3117_v37  ;;  %v4271_v37 = vld [vmem:[#allocation3 + $0x48] sm:$0xf0]  ;;  %v4318_v29 = vor.u32 %v4481_v22, %v4317_v7 }
 0x7e7   :  { %v4274_v2 = vor.u32 %v4468_v12, %v4271_v37  ;;  %3462 = vmatpush.bf16.msrb.mxu0 %v4270_v56 }
 0x7e8   :  { %3513 = vmatpush.bf16.msrb.mxu2 %v4318_v29  ;;  %3612 = vmatpush.bf16.msrb.mxu1 %v4314_v16 }
 0x7e9   :  { %3560 = vmatpush.bf16.msrb.mxu3 %v4274_v2 }
 0x7eb   :  { %3463 = vmatpush.bf16.msrb.mxu0 %v4262_v18 }
 0x7ec   :  { %3514 = vmatpush.bf16.msrb.mxu2 %v4310_v55  ;;  %3613 = vmatpush.bf16.msrb.mxu1 %v4306_v10 }
 0x7ed   :  { %3561 = vmatpush.bf16.msrb.mxu3 %v4266_v15 }
 0x7ef   :  { %3464 = vmatpush.bf16.msrb.mxu0 %v4254_v58 }
 0x7f0   :  { %3515 = vmatpush.bf16.msrb.mxu2 %v4302_v21 }
 0x7f1   :  { %3562 = vmatpush.bf16.msrb.mxu3 %v4258_v11 }
 0x7f3   :  { %3465 = vmatpush.bf16.msrb.mxu0 %v4246_v38 }
 0x7f5   :  { %3563 = vmatpush.bf16.msrb.mxu3 %v4250_v45 }
 0x7f6   :  { %4229 = vmatmul.msk.bf16.gmra.mxu3 %vm451_vm3, %v3118_v3  ;;  %4233 = vmatmul.msk.bf16.gmra.mxu1 %vm451_vm3, %v3118_v3  ;;  %v3119_v3 = vpack.c.bf16 %v5796_v46, %v5798_v51 }
 0x7f7   :  { %3466 = vmatpush.bf16.msrb.mxu0 %v4238_v62 }
 0x7f9   :  { %3564 = vmatpush.bf16.msrb.mxu3 %v4242_v48 }
 0x806   :  { %4230 = vmatmul.msk.bf16.gmra.mxu3 %vm451_vm3, %v3119_v3  ;;  %4234 = vmatmul.msk.bf16.gmra.mxu1 %vm451_vm3, %v3119_v3 }
 0x807   :  { %v2741_v56 = vpop.xlane.xlu1 %2740  ;;  %v2747_v34 = vpop.xlane.xlu2 %2746 }
 0x808   :  { %v2735_v57 = vpop.xlane.xlu0 %2734  ;;  %v2759_v47 = vadd.f32 1e-09, %v2741_v56  ;;  %v2761_v21 = vadd.f32 1e-09, %v2747_v34 }
 0x809   :  { %v2757_v46 = vadd.f32 1e-09, %v2735_v57 }
 0x80b   :  { %4614 = vrcp.f32 %v2757_v46 }
 0x80f   :  { %v2744_v8 = vpop.xlane.xlu1 %2743  ;;  %v2750_v54 = vpop.xlane.xlu2 %2749 }
 0x810   :  { %v2738_v51 = vpop.xlane.xlu0 %2737  ;;  %v2760_v15 = vadd.f32 1e-09, %v2744_v8  ;;  %v2762_v33 = vadd.f32 1e-09, %v2750_v54 }
 0x811   :  { %v2758_v28 = vadd.f32 1e-09, %v2738_v51  ;;  %v4615_v7 = vpop.eup %4614 }
 0x813   :  { %v2867_v12 = vpop.f32.mrf.mxu1  ;;  %4616 = vrcp.f32 %v2758_v28 }
 0x814   :  { %v2888_v22 = vmul.f32 %v4615_v7, %v2867_v12  ;;  %4618 = vrcp.f32 %v2759_v47 }
 0x815   :  { %4620 = vrcp.f32 %v2760_v15 }
 0x816   :  { %v3247_v60 = vsub.f32 %v5321_v24, %v2888_v22  ;;  %4622 = vrcp.f32 %v2761_v21 }
 0x817   :  { %4624 = vrcp.f32 %v2762_v33  ;;  %v2756_v46 = vpop.xlane.xlu1 %2755 }
 0x818   :  { %v2753_v57 = vpop.xlane.xlu0 %2752  ;;  %v2764_v22 = vadd.f32 1e-09, %v2756_v46 }
 0x819   :  { %v2838_v37 = vpop.f32.mrf.mxu3  ;;  %v4617_v2 = vpop.eup %4616  ;;  %v2763_v12 = vadd.f32 1e-09, %v2753_v57 }
 0x81a   :  { %v2887_v39 = vmul.f32 %v4615_v7, %v2838_v37  ;;  %v4619_v5 = vpop.eup %4618 }
 0x81b   :  { %v2869_v29 = vpop.f32.mrf.mxu1  ;;  %v4621_v58 = vpop.eup %4620  ;;  %4626 = vrcp.f32 %v2763_v12  ;;  %v6086_v12 = vld [vmem:[#allocation26_spill] sm:$0xff] }
 0x81c   :  { %v2890_v52 = vmul.f32 %v4617_v2, %v2869_v29  ;;  %v3246_v26 = vsub.f32 %v5304_v0, %v2887_v39  ;;  %v4623_v50 = vpop.eup %4622  ;;  %4628 = vrcp.f32 %v2764_v22 }
 0x81d   :  { %v4625_v62 = vpop.eup %4624 }
 0x81e   :  { %v3249_v43 = vsub.f32 %v5323_v35, %v2890_v52 }
 0x820   :  { %v3279_v18 = vpack.c.bf16 %v3249_v43, %v3247_v60 }
 0x821   :  { %v2840_v32 = vpop.f32.mrf.mxu3  ;;  %v4627_v47 = vpop.eup %4626 }
 0x822   :  { %v2889_v41 = vmul.f32 %v4617_v2, %v2840_v32  ;;  %3516 = vmatmul.bf16.vlgmr.msrb.gmra.mxu2 %v3279_v18  ;;  %3614 = vmatmul.bf16.vlgmr.msrb.gmra.mxu1 %v3279_v18  ;;  %v4629_v18 = vpop.eup %4628 }
 0x823   :  { %v2872_v55 = vpop.f32.mrf.mxu1 }
 0x824   :  { %v3248_v1 = vsub.f32 %v5306_v36, %v2889_v41  ;;  %v2892_v9 = vmul.f32 %v4619_v5, %v2872_v55  ;;  %v6081_v55 = vld [vmem:[#allocation25_spill] sm:$0xff] }
 0x826   :  { %v3278_v16 = vpack.c.bf16 %v3248_v1, %v3246_v26  ;;  %v3251_v19 = vsub.f32 %v5325_v23, %v2892_v9 }
 0x828   :  { %3467 = vmatmul.bf16.vlgmr.msrb.gmra.mxu0 %v3278_v16  ;;  %3565 = vmatmul.bf16.vlgmr.msrb.gmra.mxu3 %v3278_v16 }
 0x829   :  { %v2843_v17 = vpop.f32.mrf.mxu3 }
 0x82a   :  { %v2891_v61 = vmul.f32 %v4619_v5, %v2843_v17 }
 0x82b   :  { %v2874_v4 = vpop.f32.mrf.mxu1 }
 0x82c   :  { %v2894_v11 = vmul.f32 %v4621_v58, %v2874_v4  ;;  %v3250_v3 = vsub.f32 %v5308_v53, %v2891_v61 }
 0x82e   :  { %v3253_v44 = vsub.f32 %v5327_v31, %v2894_v11  ;;  %v6082_v11 = vld [vmem:[#allocation23_spill] sm:$0xff] }
 0x830   :  { %v3281_v20 = vpack.c.bf16 %v3253_v44, %v3251_v19  ;;  %v6083_v19 = vld [vmem:[#allocation24_spill] sm:$0xff] }
 0x831   :  { %v2845_v10 = vpop.f32.mrf.mxu3 }
 0x832   :  { %v2893_v40 = vmul.f32 %v4621_v58, %v2845_v10  ;;  %3521 = vmatmul.bf16.gmra.mxu2 %v3281_v20  ;;  %3619 = vmatmul.bf16.gmra.mxu1 %v3281_v20 }
 0x833   :  { %v2877_v25 = vpop.f32.mrf.mxu1 }
 0x834   :  { %v3252_v38 = vsub.f32 %v5310_v13, %v2893_v40  ;;  %v2896_v63 = vmul.f32 %v4623_v50, %v2877_v25 }
 0x836   :  { %v3280_v45 = vpack.c.bf16 %v3252_v38, %v3250_v3  ;;  %v3255_v51 = vsub.f32 %v5329_v59, %v2896_v63  ;;  %v6085_v63 = vld [vmem:[#allocation35_spill] sm:$0xff] }
 0x838   :  { %3472 = vmatmul.bf16.gmra.mxu0 %v3280_v45  ;;  %3570 = vmatmul.bf16.gmra.mxu3 %v3280_v45 }
 0x839   :  { %v2848_v14 = vpop.f32.mrf.mxu3 }
 0x83a   :  { %v2895_v56 = vmul.f32 %v4623_v50, %v2848_v14  ;;  %v6084_v14 = vld [vmem:[#allocation34_spill] sm:$0xff] }
 0x83b   :  { %v2879_v42 = vpop.f32.mrf.mxu1 }
 0x83c   :  { %v2898_v48 = vmul.f32 %v4625_v62, %v2879_v42  ;;  %v3254_v29 = vsub.f32 %v5312_v27, %v2895_v56 }
 0x83e   :  { %v3257_v28 = vsub.f32 %v5331_v6, %v2898_v48 }
 0x840   :  { %v3283_v7 = vpack.c.bf16 %v3257_v28, %v3255_v51 }
 0x841   :  { %v2850_v37 = vpop.f32.mrf.mxu3 }
 0x842   :  { %v2897_v2 = vmul.f32 %v4625_v62, %v2850_v37  ;;  %3526 = vmatmul.bf16.gmra.mxu2 %v3283_v7  ;;  %3624 = vmatmul.bf16.gmra.mxu1 %v3283_v7  ;;  %v6087_v37 = vld [vmem:[#allocation27_spill] sm:$0xff] }
 0x843   :  { %v2882_v8 = vpop.f32.mrf.mxu1 }
 0x844   :  { %v3256_v52 = vsub.f32 %v5314_v49, %v2897_v2  ;;  %v2900_v39 = vmul.f32 %v4627_v47, %v2882_v8 }
 0x846   :  { %v3282_v60 = vpack.c.bf16 %v3256_v52, %v3254_v29  ;;  %v3259_v26 = vsub.f32 %v5333_v30, %v2900_v39 }
 0x847   :  { %v3081_v1 = vpop.xlane.xlu0 %3080  ;;  %v3084_v38 = vpop.xlane.xlu1 %3083 }
 0x848   :  { %3477 = vmatmul.bf16.gmra.mxu0 %v3282_v60  ;;  %3575 = vmatmul.bf16.gmra.mxu3 %v3282_v60  ;;  %v3078_v15 = vpop.xlane.xlu2 %3077  ;;  %v3101_v58 = vadd.f32 1e-09, %v3081_v1  ;;  %v3102_v42 = vadd.f32 1e-09, %v3084_v38 }
 0x849   :  { %v2853_v43 = vpop.f32.mrf.mxu3  ;;  %v3100_v16 = vadd.f32 1e-09, %v3078_v15 }
 0x84a   :  { %v2899_v17 = vmul.f32 %v4627_v47, %v2853_v43 }
 0x84b   :  { %v2884_v32 = vpop.f32.mrf.mxu1  ;;  %4630 = vrcp.f32 %v3100_v16 }
 0x84c   :  { %v2902_v41 = vmul.f32 %v4629_v18, %v2884_v32  ;;  %v3258_v54 = vsub.f32 %v6082_v11, %v2899_v17  ;;  %4632 = vrcp.f32 %v3101_v58  ;;  %v6088_v32 = vld [vmem:[#allocation36_spill] sm:$0xff] }
 0x84d   :  { %4634 = vrcp.f32 %v3102_v42  ;;  %v6090_v58 = vld [vmem:[#allocation28_spill] sm:$0xff]  ;;  %v6093_v42 = vld [vmem:[#allocation39_spill] sm:$0xff] }
 0x84e   :  { %v3261_v34 = vsub.f32 %v6081_v55, %v2902_v41  ;;  %v6089_v41 = vld [vmem:[#allocation37_spill] sm:$0xff] }
 0x84f   :  { %v3090_v47 = vpop.xlane.xlu0 %3089 }
 0x850   :  { %v3285_v9 = vpack.c.bf16 %v3261_v34, %v3259_v26  ;;  %v3087_v45 = vpop.xlane.xlu2 %3086  ;;  %v3104_v1 = vadd.f32 1e-09, %v3090_v47 }
 0x851   :  { %v2855_v5 = vpop.f32.mrf.mxu3  ;;  %v4631_v20 = vpop.eup %4630  ;;  %v3103_v51 = vadd.f32 1e-09, %v3087_v45 }
 0x852   :  { %v2901_v4 = vmul.f32 %v4629_v18, %v2855_v5  ;;  %3531 = vmatmul.bf16.gmra.mxu2 %v3285_v9  ;;  %3629 = vmatmul.bf16.gmra.mxu1 %v3285_v9  ;;  %v4633_v40 = vpop.eup %4632  ;;  %v3093_v18 = vpop.xlane.xlu1 %3092 }
 0x853   :  { %v3210_v21 = vpop.f32.mrf.mxu1  ;;  %4636 = vrcp.f32 %v3103_v51  ;;  %v4635_v52 = vpop.eup %4634  ;;  %v3105_v5 = vadd.f32 1e-09, %v3093_v18 }
 0x854   :  { %v3260_v44 = vsub.f32 %v6083_v19, %v2901_v4  ;;  %v3231_v33 = vmul.f32 %v4631_v20, %v3210_v21  ;;  %4638 = vrcp.f32 %v3104_v1  ;;  %v6096_v1 = vld [vmem:[#allocation40_spill] sm:$0xff] }
 0x855   :  { %4640 = vrcp.f32 %v3105_v5 }
 0x856   :  { %v3284_v61 = vpack.c.bf16 %v3260_v44, %v3258_v54  ;;  %v3263_v50 = vsub.f32 %v6084_v14, %v3231_v33  ;;  %v6091_v54 = vld [vmem:[#allocation29_spill] sm:$0xff] }
 0x857   :  { %v3099_v45 = vpop.xlane.xlu0 %3098 }
 0x858   :  { %3482 = vmatmul.bf16.gmra.mxu0 %v3284_v61  ;;  %3580 = vmatmul.bf16.gmra.mxu3 %v3284_v61  ;;  %v3096_v38 = vpop.xlane.xlu2 %3095 }
 0x859   :  { %v3181_v10 = vpop.f32.mrf.mxu3  ;;  %v4637_v60 = vpop.eup %4636 }
 0x85a   :  { %v3230_v57 = vmul.f32 %v4631_v20, %v3181_v10  ;;  %v4639_v20 = vpop.eup %4638 }
 0x85b   :  { %v3212_v3 = vpop.f32.mrf.mxu1 }
 0x85c   :  { %v3233_v25 = vmul.f32 %v4633_v40, %v3212_v3  ;;  %v3262_v56 = vsub.f32 %v6086_v12, %v3230_v57 }
 0x85e   :  { %v3265_v62 = vsub.f32 %v6085_v63, %v3233_v25 }
 0x860   :  { %v3287_v48 = vpack.c.bf16 %v3265_v62, %v3263_v50  ;;  %v6092_v50 = vld [vmem:[#allocation38_spill] sm:$0xff] }
 0x861   :  { %v3183_v46 = vpop.f32.mrf.mxu3 }
 0x862   :  { %v3232_v28 = vmul.f32 %v4633_v40, %v3183_v46  ;;  %3536 = vmatmul.bf16.gmra.mxu2 %v3287_v48  ;;  %3634 = vmatmul.bf16.gmra.mxu1 %v3287_v48  ;;  %v4641_v40 = vpop.eup %4640  ;;  %v3106_v48 = vadd.f32 1e-09, %v3096_v38 }
 0x863   :  { %v3215_v22 = vpop.f32.mrf.mxu1 }
 0x864   :  { %v3264_v7 = vsub.f32 %v6087_v37, %v3232_v28  ;;  %v3235_v8 = vmul.f32 %v4635_v52, %v3215_v22  ;;  %4642 = vrcp.f32 %v3106_v48  ;;  %v6094_v22 = vld [vmem:[#allocation30_spill] sm:$0xff] }
 0x866   :  { %v3286_v2 = vpack.c.bf16 %v3264_v7, %v3262_v56  ;;  %v3267_v15 = vsub.f32 %v6088_v32, %v3235_v8  ;;  %v3107_v56 = vadd.f32 1e-09, %v3099_v45 }
 0x868   :  { %3487 = vmatmul.bf16.gmra.mxu0 %v3286_v2  ;;  %3585 = vmatmul.bf16.gmra.mxu3 %v3286_v2  ;;  %4644 = vrcp.f32 %v3107_v56 }
 0x869   :  { %v3186_v29 = vpop.f32.mrf.mxu3 }
 0x86a   :  { %v3234_v34 = vmul.f32 %v4635_v52, %v3186_v29  ;;  %v6095_v29 = vld [vmem:[#allocation31_spill] sm:$0xff]  ;;  %v4643_v47 = vpop.eup %4642 }
 0x86b   :  { %v3217_v43 = vpop.f32.mrf.mxu1 }
 0x86c   :  { %v3237_v39 = vmul.f32 %v4637_v60, %v3217_v43  ;;  %v3266_v4 = vsub.f32 %v6090_v58, %v3234_v34 }
 0x86e   :  { %v3269_v26 = vsub.f32 %v6089_v41, %v3237_v39  ;;  %v4645_v18 = vpop.eup %4644 }
 0x870   :  { %v3289_v16 = vpack.c.bf16 %v3269_v26, %v3267_v15 }
 0x871   :  { %v3188_v17 = vpop.f32.mrf.mxu3 }
 0x872   :  { %v3236_v9 = vmul.f32 %v4637_v60, %v3188_v17  ;;  %3541 = vmatmul.bf16.gmra.mxu2 %v3289_v16  ;;  %3639 = vmatmul.bf16.gmra.mxu1 %v3289_v16  ;;  %v6097_v16 = vld [vmem:[#allocation41_spill] sm:$0xff] }
 0x873   :  { %v3220_v21 = vpop.f32.mrf.mxu1 }
 0x874   :  { %v3268_v44 = vsub.f32 %v6091_v54, %v3236_v9  ;;  %v3239_v33 = vmul.f32 %v4639_v20, %v3220_v21  ;;  %v6098_v21 = vld [vmem:[#allocation32_spill] sm:$0xff] }
 0x876   :  { %v3288_v61 = vpack.c.bf16 %v3268_v44, %v3266_v4  ;;  %v3271_v62 = vsub.f32 %v6092_v50, %v3239_v33 }
 0x878   :  { %3492 = vmatmul.bf16.gmra.mxu0 %v3288_v61  ;;  %3590 = vmatmul.bf16.gmra.mxu3 %v3288_v61 }
 0x879   :  { %v3191_v10 = vpop.f32.mrf.mxu3 }
 0x87a   :  { %v3238_v46 = vmul.f32 %v4639_v20, %v3191_v10  ;;  %v6099_v10 = vld [vmem:[#allocation33_spill] sm:$0xff] }
 0x87b   :  { %v3222_v3 = vpop.f32.mrf.mxu1 }
 0x87c   :  { %v3241_v25 = vmul.f32 %v4641_v40, %v3222_v3  ;;  %v3270_v2 = vsub.f32 %v6094_v22, %v3238_v46 }
 0x87e   :  { %v3273_v57 = vsub.f32 %v6093_v42, %v3241_v25 }
 0x880   :  { %v3291_v51 = vpack.c.bf16 %v3273_v57, %v3271_v62 }
 0x881   :  { %v3193_v28 = vpop.f32.mrf.mxu3 }
 0x882   :  { %v3240_v7 = vmul.f32 %v4641_v40, %v3193_v28  ;;  %3546 = vmatmul.bf16.gmra.mxu2 %v3291_v51  ;;  %3644 = vmatmul.bf16.gmra.mxu1 %v3291_v51  ;;  %v1762_v40 = vld [vmem:[%s6022_s9 + $0x8] sm:$0x3] }
 0x883   :  { %v3225_v8 = vpop.f32.mrf.mxu1  ;;  %v5849_v38 = vperm.slane %v1762_v40, 0  ;;  %v5852_v46 = vperm.slane %v1762_v40, 1 }
 0x884   :  { %v3272_v52 = vsub.f32 %v6095_v29, %v3240_v7  ;;  %v3243_v39 = vmul.f32 %v4643_v47, %v3225_v8 }
 0x886   :  { %v3290_v60 = vpack.c.bf16 %v3272_v52, %v3270_v2  ;;  %v3275_v34 = vsub.f32 %v6096_v1, %v3243_v39 }
 0x888   :  { %3497 = vmatmul.bf16.gmra.mxu0 %v3290_v60  ;;  %3595 = vmatmul.bf16.gmra.mxu3 %v3290_v60 }
 0x889   :  { %v3196_v43 = vpop.f32.mrf.mxu3 }
 0x88a   :  { %v3242_v5 = vmul.f32 %v4643_v47, %v3196_v43 }
 0x88b   :  { %v3227_v15 = vpop.f32.mrf.mxu1 }
 0x88c   :  { %v3245_v26 = vmul.f32 %v4645_v18, %v3227_v15  ;;  %v3274_v61 = vsub.f32 %v6098_v21, %v3242_v5 }
 0x88e   :  { %v3277_v17 = vsub.f32 %v6097_v16, %v3245_v26 }
 0x890   :  { %v3293_v9 = vpack.c.bf16 %v3277_v17, %v3275_v34 }
 0x891   :  { %v3198_v4 = vpop.f32.mrf.mxu3 }
 0x892   :  { %v3244_v44 = vmul.f32 %v4645_v18, %v3198_v4  ;;  %3551 = vmatmul.bf16.gmra.mxu2 %v3293_v9  ;;  %3649 = vmatmul.bf16.gmra.mxu1 %v3293_v9 }
 0x894   :  { %v3276_v20 = vsub.f32 %v6099_v10, %v3244_v44 }
 0x896   :  { %v3292_v33 = vpack.c.bf16 %v3276_v20, %v3274_v61 }
 0x898   :  { %3502 = vmatmul.bf16.gmra.mxu0 %v3292_v33  ;;  %3600 = vmatmul.bf16.gmra.mxu3 %v3292_v33 }
 0x89f   :  { %v3615_v3 = vpop.f32.mrf.mxu1 }
 0x8a5   :  { %v3468_v25 = vpop.f32.mrf.mxu0  ;;  %v3517_v62 = vpop.f32.mrf.mxu2 }
 0x8a6   :  { %v3469_v45 = vadd.f32 %v3468_v25, %v5849_v38 }
 0x8a7   :  { %v3617_v48 = vpop.f32.mrf.mxu1 }
 0x8a8   :  { %v3518_v57 = vadd.f32 %v3517_v62, %v3469_v45 }
 0x8aa   :  { %v3655_v51 = vmax.f32 %v3518_v57, 0.0 }
 0x8ab   :  { %v3566_v28 = vpop.f32.mrf.mxu3 }
 0x8ac   :  { %v3687_v56 = vadd.f32 %v3655_v51, %v5304_v0  ;;  %v3567_v7 = vadd.f32 %v3566_v28, %v5852_v46 }
 0x8ad   :  { %v3470_v2 = vpop.f32.mrf.mxu0  ;;  %v3519_v60 = vpop.f32.mrf.mxu2 }
 0x8ae   :  { %3719 = vst [vmem:[%s6023_s10] sm:$0xff] %v3687_v56  ;;  %v3616_v52 = vadd.f32 %v3615_v3, %v3567_v7  ;;  %v3471_v8 = vadd.f32 %v3470_v2, %v5849_v38 }
 0x8af   :  { %v3620_v39 = vpop.f32.mrf.mxu1 }
 0x8b0   :  { %v3656_v43 = vmax.f32 %v3616_v52, 0.0  ;;  %v3520_v47 = vadd.f32 %v3519_v60, %v3471_v8 }
 0x8b2   :  { %v3688_v18 = vadd.f32 %v3656_v43, %v5321_v24  ;;  %v3657_v15 = vmax.f32 %v3520_v47, 0.0 }
 0x8b3   :  { %v3568_v26 = vpop.f32.mrf.mxu3 }
 0x8b4   :  { %3720 = vst [vmem:[%s6023_s10 + $0x8] sm:$0xff] %v3688_v18  ;;  %v3689_v0 = vadd.f32 %v3657_v15, %v5306_v36  ;;  %v3569_v34 = vadd.f32 %v3568_v26, %v5852_v46 }
 0x8b5   :  { %v3473_v17 = vpop.f32.mrf.mxu0  ;;  %v3522_v4 = vpop.f32.mrf.mxu2 }
 0x8b6   :  { %3721 = vst [vmem:[%s6023_s10 + $0x10] sm:$0xff] %v3689_v0  ;;  %v3618_v5 = vadd.f32 %v3617_v48, %v3569_v34  ;;  %v3474_v9 = vadd.f32 %v3473_v17, %v5849_v38 }
 0x8b7   :  { %v3622_v61 = vpop.f32.mrf.mxu1 }
 0x8b8   :  { %v3658_v24 = vmax.f32 %v3618_v5, 0.0  ;;  %v3523_v44 = vadd.f32 %v3522_v4, %v3474_v9 }
 0x8ba   :  { %v3690_v20 = vadd.f32 %v3658_v24, %v5323_v35  ;;  %v3659_v33 = vmax.f32 %v3523_v44, 0.0 }
 0x8bb   :  { %v3571_v40 = vpop.f32.mrf.mxu3 }
 0x8bc   :  { %3722 = vst [vmem:[%s6023_s10 + $0x18] sm:$0xff] %v3690_v20  ;;  %v3691_v36 = vadd.f32 %v3659_v33, %v5308_v53  ;;  %v3572_v3 = vadd.f32 %v3571_v40, %v5852_v46 }
 0x8bd   :  { %v3475_v25 = vpop.f32.mrf.mxu0  ;;  %v3524_v57 = vpop.f32.mrf.mxu2 }
 0x8be   :  { %3723 = vst [vmem:[%s6023_s10 + $0x20] sm:$0xff] %v3691_v36  ;;  %v3621_v45 = vadd.f32 %v3620_v39, %v3572_v3  ;;  %v3476_v62 = vadd.f32 %v3475_v25, %v5849_v38 }
 0x8bf   :  { %v3625_v51 = vpop.f32.mrf.mxu1 }
 0x8c0   :  { %v3660_v35 = vmax.f32 %v3621_v45, 0.0  ;;  %v3525_v48 = vadd.f32 %v3524_v57, %v3476_v62 }
 0x8c2   :  { %v3692_v28 = vadd.f32 %v3660_v35, %v5325_v23  ;;  %v3661_v56 = vmax.f32 %v3525_v48, 0.0 }
 0x8c3   :  { %v3573_v7 = vpop.f32.mrf.mxu3 }
 0x8c4   :  { %3724 = vst [vmem:[%s6023_s10 + $0x28] sm:$0xff] %v3692_v28  ;;  %v3693_v53 = vadd.f32 %v3661_v56, %v5310_v13  ;;  %v3574_v2 = vadd.f32 %v3573_v7, %v5852_v46 }
 0x8c5   :  { %v3478_v52 = vpop.f32.mrf.mxu0  ;;  %v3527_v43 = vpop.f32.mrf.mxu2 }
 0x8c6   :  { %3725 = vst [vmem:[%s6023_s10 + $0x30] sm:$0xff] %v3693_v53  ;;  %v3623_v8 = vadd.f32 %v3622_v61, %v3574_v2  ;;  %v3479_v60 = vadd.f32 %v3478_v52, %v5849_v38 }
 0x8c7   :  { %v3627_v39 = vpop.f32.mrf.mxu1 }
 0x8c8   :  { %v3662_v23 = vmax.f32 %v3623_v8, 0.0  ;;  %v3528_v47 = vadd.f32 %v3527_v43, %v3479_v60 }
 0x8ca   :  { %v3694_v18 = vadd.f32 %v3662_v23, %v5327_v31  ;;  %v3663_v15 = vmax.f32 %v3528_v47, 0.0 }
 0x8cb   :  { %v3576_v26 = vpop.f32.mrf.mxu3 }
 0x8cc   :  { %3726 = vst [vmem:[%s6023_s10 + $0x38] sm:$0xff] %v3694_v18  ;;  %v3695_v13 = vadd.f32 %v3663_v15, %v5312_v27  ;;  %v3577_v0 = vadd.f32 %v3576_v26, %v5852_v46 }
 0x8cd   :  { %v3480_v34 = vpop.f32.mrf.mxu0  ;;  %v3529_v9 = vpop.f32.mrf.mxu2 }
 0x8ce   :  { %3727 = vst [vmem:[%s6023_s10 + $0x40] sm:$0xff] %v3695_v13  ;;  %v3626_v17 = vadd.f32 %v3625_v51, %v3577_v0  ;;  %v3481_v5 = vadd.f32 %v3480_v34, %v5849_v38 }
 0x8cf   :  { %v3630_v24 = vpop.f32.mrf.mxu1 }
 0x8d0   :  { %v3664_v31 = vmax.f32 %v3626_v17, 0.0  ;;  %v3530_v4 = vadd.f32 %v3529_v9, %v3481_v5 }
 0x8d2   :  { %v3696_v44 = vadd.f32 %v3664_v31, %v5329_v59  ;;  %v3665_v61 = vmax.f32 %v3530_v4, 0.0 }
 0x8d3   :  { %v3578_v20 = vpop.f32.mrf.mxu3 }
 0x8d4   :  { %3728 = vst [vmem:[%s6023_s10 + $0x48] sm:$0xff] %v3696_v44  ;;  %v3697_v27 = vadd.f32 %v3665_v61, %v5314_v49  ;;  %v3579_v33 = vadd.f32 %v3578_v20, %v5852_v46 }
 0x8d5   :  { %v3483_v40 = vpop.f32.mrf.mxu0  ;;  %v3532_v25 = vpop.f32.mrf.mxu2 }
 0x8d6   :  { %3729 = vst [vmem:[%s6023_s10 + $0x50] sm:$0xff] %v3697_v27  ;;  %v3628_v36 = vadd.f32 %v3627_v39, %v3579_v33  ;;  %v3484_v3 = vadd.f32 %v3483_v40, %v5849_v38 }
 0x8d7   :  { %v3632_v62 = vpop.f32.mrf.mxu1 }
 0x8d8   :  { %v3666_v59 = vmax.f32 %v3628_v36, 0.0  ;;  %v3533_v45 = vadd.f32 %v3532_v25, %v3484_v3 }
 0x8da   :  { %v3698_v57 = vadd.f32 %v3666_v59, %v5331_v6  ;;  %v3667_v35 = vmax.f32 %v3533_v45, 0.0 }
 0x8db   :  { %v3581_v48 = vpop.f32.mrf.mxu3 }
 0x8dc   :  { %3730 = vst [vmem:[%s6023_s10 + $0x58] sm:$0xff] %v3698_v57  ;;  %v3699_v49 = vadd.f32 %v3667_v35, %v6082_v11  ;;  %v3582_v51 = vadd.f32 %v3581_v48, %v5852_v46 }
 0x8dd   :  { %v3485_v28 = vpop.f32.mrf.mxu0  ;;  %v3534_v53 = vpop.f32.mrf.mxu2 }
 0x8de   :  { %3731 = vst [vmem:[%s6023_s10 + $0x60] sm:$0xff] %v3699_v49  ;;  %v3631_v56 = vadd.f32 %v3630_v24, %v3582_v51  ;;  %v3486_v7 = vadd.f32 %v3485_v28, %v5849_v38 }
 0x8df   :  { %v3635_v52 = vpop.f32.mrf.mxu1 }
 0x8e0   :  { %v3668_v6 = vmax.f32 %v3631_v56, 0.0  ;;  %v3535_v2 = vadd.f32 %v3534_v53, %v3486_v7 }
 0x8e2   :  { %v3700_v8 = vadd.f32 %v3668_v6, %v5333_v30  ;;  %v3669_v60 = vmax.f32 %v3535_v2, 0.0 }
 0x8e3   :  { %v3583_v43 = vpop.f32.mrf.mxu3 }
 0x8e4   :  { %3732 = vst [vmem:[%s6023_s10 + $0x68] sm:$0xff] %v3700_v8  ;;  %v3701_v11 = vadd.f32 %v3669_v60, %v6083_v19  ;;  %v3584_v23 = vadd.f32 %v3583_v43, %v5852_v46 }
 0x8e5   :  { %v3488_v47 = vpop.f32.mrf.mxu0  ;;  %v3537_v15 = vpop.f32.mrf.mxu2 }
 0x8e6   :  { %3733 = vst [vmem:[%s6023_s10 + $0x70] sm:$0xff] %v3701_v11  ;;  %v3633_v39 = vadd.f32 %v3632_v62, %v3584_v23  ;;  %v3489_v18 = vadd.f32 %v3488_v47, %v5849_v38 }
 0x8e7   :  { %v3637_v13 = vpop.f32.mrf.mxu1 }
 0x8e8   :  { %v3670_v30 = vmax.f32 %v3633_v39, 0.0  ;;  %v3538_v26 = vadd.f32 %v3537_v15, %v3489_v18 }
 0x8ea   :  { %v3702_v0 = vadd.f32 %v3670_v30, %v6081_v55  ;;  %v3671_v34 = vmax.f32 %v3538_v26, 0.0 }
 0x8eb   :  { %v3586_v17 = vpop.f32.mrf.mxu3 }
 0x8ec   :  { %3734 = vst [vmem:[%s6023_s10 + $0x78] sm:$0xff] %v3702_v0  ;;  %v3703_v19 = vadd.f32 %v3671_v34, %v6086_v12  ;;  %v3587_v5 = vadd.f32 %v3586_v17, %v5852_v46 }
 0x8ed   :  { %v3490_v9 = vpop.f32.mrf.mxu0  ;;  %v3539_v24 = vpop.f32.mrf.mxu2 }
 0x8ee   :  { %3735 = vst [vmem:[%s6023_s10 + $0x80] sm:$0xff] %v3703_v19  ;;  %v3636_v31 = vadd.f32 %v3635_v52, %v3587_v5  ;;  %v3491_v4 = vadd.f32 %v3490_v9, %v5849_v38 }
 0x8ef   :  { %v3640_v27 = vpop.f32.mrf.mxu1 }
 0x8f0   :  { %v3672_v55 = vmax.f32 %v3636_v31, 0.0  ;;  %v3540_v44 = vadd.f32 %v3539_v24, %v3491_v4 }
 0x8f2   :  { %v3704_v61 = vadd.f32 %v3672_v55, %v6084_v14  ;;  %v3673_v20 = vmax.f32 %v3540_v44, 0.0 }
 0x8f3   :  { %v3588_v33 = vpop.f32.mrf.mxu3 }
 0x8f4   :  { %3736 = vst [vmem:[%s6023_s10 + $0x88] sm:$0xff] %v3704_v61  ;;  %v3705_v12 = vadd.f32 %v3673_v20, %v6087_v37  ;;  %v3589_v40 = vadd.f32 %v3588_v33, %v5852_v46 }
 0x8f5   :  { %v3493_v36 = vpop.f32.mrf.mxu0  ;;  %v3542_v14 = vpop.f32.mrf.mxu2 }
 0x8f6   :  { %3737 = vst [vmem:[%s6023_s10 + $0x90] sm:$0xff] %v3705_v12  ;;  %v3638_v3 = vadd.f32 %v3637_v13, %v3589_v40  ;;  %v3494_v25 = vadd.f32 %v3493_v36, %v5849_v38 }
 0x8f7   :  { %v3642_v49 = vpop.f32.mrf.mxu1 }
 0x8f8   :  { %v3674_v59 = vmax.f32 %v3638_v3, 0.0  ;;  %v3543_v45 = vadd.f32 %v3542_v14, %v3494_v25 }
 0x8fa   :  { %v3706_v62 = vadd.f32 %v3674_v59, %v6085_v63  ;;  %v3675_v57 = vmax.f32 %v3543_v45, 0.0 }
 0x8fb   :  { %v3591_v35 = vpop.f32.mrf.mxu3 }
 0x8fc   :  { %3738 = vst [vmem:[%s6023_s10 + $0x98] sm:$0xff] %v3706_v62  ;;  %v3707_v37 = vadd.f32 %v3675_v57, %v6090_v58  ;;  %v3592_v48 = vadd.f32 %v3591_v35, %v5852_v46 }
 0x8fd   :  { %v3495_v51 = vpop.f32.mrf.mxu0  ;;  %v3544_v63 = vpop.f32.mrf.mxu2 }
 0x8fe   :  { %3739 = vst [vmem:[%s6023_s10 + $0xa0] sm:$0xff] %v3707_v37  ;;  %v3641_v28 = vadd.f32 %v3640_v27, %v3592_v48  ;;  %v3496_v56 = vadd.f32 %v3495_v51, %v5849_v38 }
 0x900   :  { %v3676_v7 = vmax.f32 %v3641_v28, 0.0  ;;  %v3545_v53 = vadd.f32 %v3544_v63, %v3496_v56 }
 0x902   :  { %v3708_v6 = vadd.f32 %v3676_v7, %v6088_v32  ;;  %v3677_v2 = vmax.f32 %v3545_v53, 0.0  ;;  %v3645_v32 = vpop.f32.mrf.mxu1 }
 0x903   :  { %v3593_v52 = vpop.f32.mrf.mxu3 }
 0x904   :  { %3740 = vst [vmem:[%s6023_s10 + $0xa8] sm:$0xff] %v3708_v6  ;;  %v3709_v58 = vadd.f32 %v3677_v2, %v6091_v54  ;;  %v3594_v8 = vadd.f32 %v3593_v52, %v5852_v46 }
 0x905   :  { %v3498_v60 = vpop.f32.mrf.mxu0  ;;  %v3547_v23 = vpop.f32.mrf.mxu2 }
 0x906   :  { %3741 = vst [vmem:[%s6023_s10 + $0xb0] sm:$0xff] %v3709_v58  ;;  %v3643_v43 = vadd.f32 %v3642_v49, %v3594_v8  ;;  %v3499_v11 = vadd.f32 %v3498_v60, %v5849_v38 }
 0x908   :  { %v3678_v47 = vmax.f32 %v3643_v43, 0.0  ;;  %v3548_v39 = vadd.f32 %v3547_v23, %v3499_v11 }
 0x90a   :  { %v3710_v18 = vadd.f32 %v3678_v47, %v6089_v41  ;;  %v3679_v15 = vmax.f32 %v3548_v39, 0.0  ;;  %v3647_v5 = vpop.f32.mrf.mxu1 }
 0x90b   :  { %v3596_v30 = vpop.f32.mrf.mxu3 }
 0x90c   :  { %3742 = vst [vmem:[%s6023_s10 + $0xb8] sm:$0xff] %v3710_v18  ;;  %v3711_v54 = vadd.f32 %v3679_v15, %v6094_v22  ;;  %v3597_v26 = vadd.f32 %v3596_v30, %v5852_v46 }
 0x90d   :  { %v3500_v13 = vpop.f32.mrf.mxu0  ;;  %v3549_v17 = vpop.f32.mrf.mxu2 }
 0x90e   :  { %3743 = vst [vmem:[%s6023_s10 + $0xc0] sm:$0xff] %v3711_v54  ;;  %v3646_v0 = vadd.f32 %v3645_v32, %v3597_v26  ;;  %v3501_v34 = vadd.f32 %v3500_v13, %v5849_v38 }
 0x910   :  { %v3680_v41 = vmax.f32 %v3646_v0, 0.0  ;;  %v3550_v19 = vadd.f32 %v3549_v17, %v3501_v34 }
 0x912   :  { %v3712_v9 = vadd.f32 %v3680_v41, %v6092_v50  ;;  %v3681_v31 = vmax.f32 %v3550_v19, 0.0  ;;  %v3650_v40 = vpop.f32.mrf.mxu1 }
 0x913   :  { %v3598_v4 = vpop.f32.mrf.mxu3 }
 0x914   :  { %3744 = vst [vmem:[%s6023_s10 + $0xc8] sm:$0xff] %v3712_v9  ;;  %v3713_v22 = vadd.f32 %v3681_v31, %v6095_v29  ;;  %v3599_v24 = vadd.f32 %v3598_v4, %v5852_v46 }
 0x915   :  { %v3503_v55 = vpop.f32.mrf.mxu0  ;;  %v3552_v20 = vpop.f32.mrf.mxu2 }
 0x916   :  { %3745 = vst [vmem:[%s6023_s10 + $0xd0] sm:$0xff] %v3713_v22  ;;  %v3648_v44 = vadd.f32 %v3647_v5, %v3599_v24  ;;  %v3504_v61 = vadd.f32 %v3503_v55, %v5849_v38 }
 0x918   :  { %v3682_v50 = vmax.f32 %v3648_v44, 0.0  ;;  %v3553_v27 = vadd.f32 %v3552_v20, %v3504_v61 }
 0x91a   :  { %v3714_v33 = vadd.f32 %v3682_v50, %v6093_v42  ;;  %v3683_v12 = vmax.f32 %v3553_v27, 0.0  ;;  %v3652_v49 = vpop.f32.mrf.mxu1 }
 0x91b   :  { %v3601_v36 = vpop.f32.mrf.mxu3 }
 0x91c   :  { %3746 = vst [vmem:[%s6023_s10 + $0xd8] sm:$0xff] %v3714_v33  ;;  %v3715_v29 = vadd.f32 %v3683_v12, %v6098_v21  ;;  %v3602_v3 = vadd.f32 %v3601_v36, %v5852_v46 }
 0x91d   :  { %v3505_v25 = vpop.f32.mrf.mxu0  ;;  %v3554_v42 = vpop.f32.mrf.mxu2 }
 0x91e   :  { %3747 = vst [vmem:[%s6023_s10 + $0xe0] sm:$0xff] %v3715_v29  ;;  %v3651_v14 = vadd.f32 %v3650_v40, %v3602_v3  ;;  %v3506_v59 = vadd.f32 %v3505_v25, %v5849_v38 }
 0x920   :  { %v3684_v45 = vmax.f32 %v3651_v14, 0.0  ;;  %v3555_v62 = vadd.f32 %v3554_v42, %v3506_v59 }
 0x922   :  { %v3716_v57 = vadd.f32 %v3684_v45, %v6096_v1  ;;  %v3685_v35 = vmax.f32 %v3555_v62, 0.0 }
 0x923   :  { %v3603_v37 = vpop.f32.mrf.mxu3 }
 0x924   :  { %3748 = vst [vmem:[%s6023_s10 + $0xe8] sm:$0xff] %v3716_v57  ;;  %v3717_v21 = vadd.f32 %v3685_v35, %v6099_v10  ;;  %v3604_v48 = vadd.f32 %v3603_v37, %v5852_v46 }
 0x926   :  { %3749 = vst [vmem:[%s6023_s10 + $0xf0] sm:$0xff] %v3717_v21  ;;  %v3653_v38 = vadd.f32 %v3652_v49, %v3604_v48 }
 0x928   :  { %v3686_v51 = vmax.f32 %v3653_v38, 0.0 }
 0x92a   :  { %v3718_v28 = vadd.f32 %v3686_v51, %v6097_v16 }
 0x92c   :  { %3750 = vst [vmem:[%s6023_s10 + $0xf8] sm:$0xff] %v3718_v28 }
 0x92d   :  { %3755 = vsyncpa [#allocation6], 1 }
 0x92e   :  { %3756 = vsyncpa [#allocation8], 1 }
 0x92f   :  { %3757 = vsyncpa [#allocation11], 1 }
 0x930   :  { %3758 = vsyncmov [#allocation4] }
 0x933   :  { %s3759_s12 = vpop.sfrf %3758 }
 0x934   :  { %p4363_p0 = scmp.ne.s32.totalorder %s3759_s12, 0 }
 0x936   :  { %3763 = shalt.err (%p4363_p0)  }
 0x937   :  { %3765 = vsyncmov [#allocation4 + $0x1] }
 0x93a   :  { %s3766_s13 = vpop.sfrf %3765 }
 0x93b   :  { %p4364_p1 = scmp.ne.s32.totalorder %s3766_s13, 0 }
 0x93d   :  { %3770 = shalt.err (%p4364_p1)  }

</bundles_post_ra>
